<compile_context>
chip_gen: v6e
topology: v6e:2x2x1
jax: 0.10.0
libtpu: 0.0.40
codegen_flags: <defaults>
</compile_context>

<pallas_src>
import functools
import math

import jax
import jax.numpy as jnp
from jax.experimental import pallas as pl


# ----------------------------------------------------------------------------
# Pallas kernels
# ----------------------------------------------------------------------------
def _gemm_bias_act_kernel(w_ref, x_ref, b_ref, o_ref, *, act):
    """o = act(w @ x + b).  w:(P,K) bf16, x:(K,M) bf16, b:(P,1) f32, o:(P,M)."""
    y = jnp.dot(w_ref[...], x_ref[...], preferred_element_type=jnp.float32)
    y = y + b_ref[...]                     # (P,1) broadcasts across the lane axis
    if act == "relu":
        y = jnp.maximum(y, 0.0)
    elif act == "sigmoid":
        y = 1.0 / (1.0 + jnp.exp(-y))      # f32 elementwise (exact, stays in [0,1])
    o_ref[...] = y.astype(o_ref.dtype)


def gemm_bias_act(w, x, b, act="none", out_dtype=jnp.bfloat16):
    """Fused GEMM+bias+activation, transposed orientation (Cout, M): the big
    spatial axis M sits on the lane (last) dim -> lane-dense stores."""
    P, K = w.shape
    K2, M = x.shape
    assert K == K2
    kernel = functools.partial(_gemm_bias_act_kernel, act=act)
    return pl.pallas_call(
        kernel,
        out_shape=jax.ShapeDtypeStruct((P, M), out_dtype),
        grid=(1,),
        in_specs=[
            pl.BlockSpec((P, K), lambda i: (0, 0)),
            pl.BlockSpec((K, M), lambda i: (0, 0)),
            pl.BlockSpec((P, 1), lambda i: (0, 0)),
        ],
        out_specs=pl.BlockSpec((P, M), lambda i: (0, 0)),
    )(w.astype(jnp.bfloat16), x.astype(jnp.bfloat16), b.astype(jnp.float32))


def _latent_kernel(h_ref, eps_ref, w1_ref, b1_ref, w2_ref, b2_ref,
                   w3_ref, b3_ref, wd1_ref, bd1_ref,
                   mu_ref, lv_ref, d1_ref):
    """Fused latent block: fc1, fc2, reparameterize, fc3 and the first decoder
    ConvTranspose (1x1 spatial input == plain GEMM) + ReLU.  bf16 matmuls with
    f32 accumulation; all elementwise math in f32; intermediates stay in VMEM."""
    h = h_ref[...]                                                    # (B,1024) bf16
    mu = jnp.dot(h, w1_ref[...], preferred_element_type=jnp.float32) + b1_ref[...]
    lv = jnp.dot(h, w2_ref[...], preferred_element_type=jnp.float32) + b2_ref[...]
    mu_ref[...] = mu
    lv_ref[...] = lv
    z = mu + jnp.exp(lv * 0.5) * eps_ref[...]                         # reparameterize
    h3 = jnp.dot(z.astype(jnp.bfloat16), w3_ref[...],
                 preferred_element_type=jnp.float32) + b3_ref[...]    # fc3
    d1 = jnp.dot(h3.astype(jnp.bfloat16), wd1_ref[...],
                 preferred_element_type=jnp.float32) + bd1_ref[...]   # deconv1 as GEMM
    d1_ref[...] = jnp.maximum(d1, 0.0)                                # ReLU


def latent_block(h, eps, w1, b1, w2, b2, w3, b3, wd1, bd1):
    B = h.shape[0]
    Z = w1.shape[1]
    N1 = wd1.shape[1]

    def fullspec(shape):
        return pl.BlockSpec(shape, lambda i: (0, 0))

    args = (h.astype(jnp.bfloat16), eps.astype(jnp.float32),
            w1, b1, w2, b2, w3, b3, wd1, bd1)
    return pl.pallas_call(
        _latent_kernel,
        out_shape=(
            jax.ShapeDtypeStruct((B, Z), jnp.float32),
            jax.ShapeDtypeStruct((B, Z), jnp.float32),
            jax.ShapeDtypeStruct((B, N1), jnp.float32),
        ),
        grid=(1,),
        in_specs=[fullspec(a.shape) for a in args],
        out_specs=(fullspec((B, Z)), fullspec((B, Z)), fullspec((B, N1))),
    )(*args)


# ----------------------------------------------------------------------------
# Channels-first conv / deconv glue (tiny XLA data movement only)
# ----------------------------------------------------------------------------
def _im2col_cf(x, k, stride, pad):
    """x: (Cin,B,H,W) -> cols (k*k*Cin, B*OH*OW), tap-major / channel-minor rows."""
    if pad:
        x = jnp.pad(x, ((0, 0), (0, 0), (pad, pad), (pad, pad)))
    C, B, H, W = x.shape
    OH = (H - k) // stride + 1
    OW = (W - k) // stride + 1
    taps = []
    for dy in range(k):
        for dx in range(k):
            t = x[:, :, dy:dy + stride * (OH - 1) + 1:stride,
                        dx:dx + stride * (OW - 1) + 1:stride]
            taps.append(t.reshape(C, B * OH * OW))
    return jnp.concatenate(taps, axis=0), OH, OW


def conv2d_cf(x, w_g, b_col, k, stride, pad, act, out_dtype=jnp.bfloat16):
    """x: (Cin,B,H,W); w_g: (Cout, k*k*Cin); returns (Cout,B,OH,OW)."""
    _, B, _, _ = x.shape
    cols, OH, OW = _im2col_cf(x, k, stride, pad)
    y = gemm_bias_act(w_g, cols, b_col, act, out_dtype)       # (Cout, B*OH*OW)
    return y.reshape(-1, B, OH, OW)


def _upsample2_cf(x):
    """Zero-insertion x2 upsampling of the last two (spatial) dims."""
    C, B, H, W = x.shape
    z = jnp.zeros_like(x)
    xh = jnp.stack([x, z], axis=3).reshape(C, B, 2 * H, W)[:, :, :2 * H - 1, :]
    zh = jnp.zeros_like(xh)
    xw = jnp.stack([xh, zh], axis=4).reshape(C, B, 2 * H - 1, 2 * W)[:, :, :, :2 * W - 1]
    return xw


def conv_transpose2d_cf(x, w_g, b_col, k, pad, act, out_dtype=jnp.bfloat16):
    """Stride-2 ConvTranspose2d = zero-insert upsample + stride-1 conv with the
    spatially-flipped, channel-swapped weight and padding k-1-pad."""
    up = _upsample2_cf(x)
    return conv2d_cf(up, w_g, b_col, k, 1, k - 1 - pad, act, out_dtype)


# ----------------------------------------------------------------------------
# Parameters (PyTorch layouts) and one-time kernel-ready conversion
# ----------------------------------------------------------------------------
def _init(key, shape, fan_in):
    bound = 1.0 / math.sqrt(fan_in)
    return jax.random.uniform(key, shape, jnp.float32, -bound, bound)


def make_params(key, image_channels=1, h_dim=1024, z_dim=32):
    ks = jax.random.split(key, 20)
    p = {}
    p["e1_w"] = _init(ks[0], (16, image_channels, 3, 3), image_channels * 9)
    p["e1_b"] = _init(ks[1], (16,), image_channels * 9)
    p["e2_w"] = _init(ks[2], (32, 16, 3, 3), 16 * 9)
    p["e2_b"] = _init(ks[3], (32,), 16 * 9)
    p["e3_w"] = _init(ks[4], (64, 32, 3, 3), 32 * 9)
    p["e3_b"] = _init(ks[5], (64,), 32 * 9)
    p["fc1_w"] = _init(ks[6], (z_dim, h_dim), h_dim)
    p["fc1_b"] = _init(ks[7], (z_dim,), h_dim)
    p["fc2_w"] = _init(ks[8], (z_dim, h_dim), h_dim)
    p["fc2_b"] = _init(ks[9], (z_dim,), h_dim)
    p["fc3_w"] = _init(ks[10], (h_dim, z_dim), z_dim)
    p["fc3_b"] = _init(ks[11], (h_dim,), z_dim)
    p["d1_w"] = _init(ks[12], (h_dim, 64, 3, 3), h_dim * 9)
    p["d1_b"] = _init(ks[13], (64,), h_dim * 9)
    p["d2_w"] = _init(ks[14], (64, 32, 3, 3), 64 * 9)
    p["d2_b"] = _init(ks[15], (32,), 64 * 9)
    p["d3_w"] = _init(ks[16], (32, 16, 4, 4), 32 * 16)
    p["d3_b"] = _init(ks[17], (16,), 32 * 16)
    p["d4_w"] = _init(ks[18], (16, image_channels, 4, 4), 16 * 16)
    p["d4_b"] = _init(ks[19], (image_channels,), 16 * 16)
    return p


def prepare_params(p):
    """One-time conversion to kernel-ready matrices: bf16 GEMM weights in
    (Cout, k*k*Cin) tap-major order (matching _im2col_cf), f32 column biases,
    flipped/channel-swapped deconv weights, and deconv-1 folded into a
    (1024, 9*64) GEMM weight with a 9x-tiled bias."""
    bf, f32 = jnp.bfloat16, jnp.float32
    kp = {}
    # encoder convs: (Cout,Cin,k,k) -> (Cout, k*k*Cin), column order (dy,dx,ci)
    for n in ("e1", "e2", "e3"):
        w = p[n + "_w"]
        cout, cin, k, _ = w.shape
        kp[n + "_w"] = jnp.transpose(w, (0, 2, 3, 1)).reshape(cout, k * k * cin).astype(bf)
        kp[n + "_b"] = p[n + "_b"].reshape(cout, 1).astype(f32)
    # fc layers: torch Linear (out,in) -> (in,out)
    for n in ("fc1", "fc2", "fc3"):
        kp[n + "_w"] = p[n + "_w"].T.astype(bf)
        kp[n + "_b"] = p[n + "_b"].reshape(1, -1).astype(f32)
    # deconv1 on a 1x1 map: out[b,(i*3+j)*64+co] = sum_ci z[b,ci]*w_t[ci,co,i,j]+b[co]
    wd1 = p["d1_w"]                                        # (1024, 64, 3, 3)
    kp["d1_w"] = jnp.transpose(wd1, (0, 2, 3, 1)).reshape(wd1.shape[0], -1).astype(bf)
    kp["d1_b"] = jnp.tile(p["d1_b"], 9).reshape(1, -1).astype(f32)
    # deconvs 2..4 as equivalent stride-1 convs (flip spatial, swap in/out ch)
    for n in ("d2", "d3", "d4"):
        wt = p[n + "_w"]                                   # (Cin, Cout, k, k)
        cin, cout, k, _ = wt.shape
        wg = jnp.transpose(jnp.flip(wt, (2, 3)), (1, 2, 3, 0)).reshape(cout, k * k * cin)
        kp[n + "_w"] = wg.astype(bf)
        kp[n + "_b"] = p[n + "_b"].reshape(cout, 1).astype(f32)
    return kp


# ----------------------------------------------------------------------------
# Forward pass (mirrors VAE.forward)
# ----------------------------------------------------------------------------
def vae_forward(kp, x, eps):
    """x: (B,1,36,36) NCHW f32 -> (recon (B,1,20,20), mu (B,32), logvar (B,32))."""
    B = x.shape[0]
    xc = jnp.transpose(x, (1, 0, 2, 3)).astype(jnp.bfloat16)               # (1,B,36,36)
    # encoder
    h1 = conv2d_cf(xc, kp["e1_w"], kp["e1_b"], 3, 2, 1, "relu")            # (16,B,18,18)
    h2 = conv2d_cf(h1, kp["e2_w"], kp["e2_b"], 3, 2, 1, "relu")            # (32,B, 9, 9)
    h3 = conv2d_cf(h2, kp["e3_w"], kp["e3_b"], 3, 2, 0, "relu")            # (64,B, 4, 4)
    # NCHW flatten (matches torch nn.Flatten on (B,64,4,4))
    h = jnp.transpose(h3.reshape(64, B, 16), (1, 0, 2)).reshape(B, 1024)   # (B,1024)
    # latent block + first deconv, fused in one kernel
    mu, log_var, d1 = latent_block(
        h, eps,
        kp["fc1_w"], kp["fc1_b"], kp["fc2_w"], kp["fc2_b"],
        kp["fc3_w"], kp["fc3_b"], kp["d1_w"], kp["d1_b"])
    # d1: (B, 9*64), columns ordered (i, j, co) -> channels-first (64,B,3,3)
    d1_sp = jnp.transpose(d1.reshape(B, 3, 3, 64), (3, 0, 1, 2)).astype(jnp.bfloat16)
    # decoder
    g2 = conv_transpose2d_cf(d1_sp, kp["d2_w"], kp["d2_b"], 3, 1, "relu")  # (32,B, 5, 5)
    g3 = conv_transpose2d_cf(g2, kp["d3_w"], kp["d3_b"], 4, 1, "relu")     # (16,B,10,10)
    g4 = conv_transpose2d_cf(g3, kp["d4_w"], kp["d4_b"], 4, 1, "sigmoid",
                             out_dtype=jnp.float32)                        # ( 1,B,20,20)
    recon = jnp.transpose(g4, (1, 0, 2, 3))                                # (B,1,20,20)
    return recon, mu, log_var


if __name__ == "__main__":
    key = jax.random.PRNGKey(0)
    k_param, k_x, k_eps = jax.random.split(key, 3)

    params = make_params(k_param)
    kparams = prepare_params(params)

    # 36x36 single-channel input -> encoder flatten is exactly h_dim = 64*4*4 = 1024
    x = jax.random.normal(k_x, (2, 1, 36, 36), jnp.float32)
    eps = jax.random.normal(k_eps, (2, 32), jnp.float32)   # torch.randn(*mu.size())

    fwd = jax.jit(vae_forward)
    recon, mu, log_var = fwd(kparams, x, eps)
    jax.block_until_ready((recon, mu, log_var))

    assert recon.shape == (2, 1, 20, 20)
    assert mu.shape == (2, 32) and log_var.shape == (2, 32)
    assert bool(jnp.all(jnp.isfinite(recon)))
    assert bool(jnp.all((recon >= 0.0) & (recon <= 1.0)))
    print("KERNEL_OK")
</pallas_src>

<mosaic_0001>
module attributes {stable_mosaic.version = 11 : i64} {
  func.func @_gemm_bias_act_kernel(%arg0: i32, %arg1: memref<16x9xbf16, #tpu.memory_space<vmem>>, %arg2: memref<9x648xbf16, #tpu.memory_space<vmem>>, %arg3: memref<16x1xf32, #tpu.memory_space<vmem>>, %arg4: memref<16x648xbf16, #tpu.memory_space<vmem>>) attributes {dimension_semantics = [#tpu.dimension_semantics<arbitrary>], iteration_bounds = array<i64: 1>, scalar_prefetch = 0 : i64, scratch_operands = 0 : i64, tpu.core_type = #tpu.core_type<tc>, window_params = [{pipeline_mode = #tpu.pipeline_mode<synchronous>, transform_indices = @transform_0, window_bounds = array<i64: 16, 9>}, {pipeline_mode = #tpu.pipeline_mode<synchronous>, transform_indices = @transform_1, window_bounds = array<i64: 9, 648>}, {pipeline_mode = #tpu.pipeline_mode<synchronous>, transform_indices = @transform_2, window_bounds = array<i64: 16, 1>}, {pipeline_mode = #tpu.pipeline_mode<synchronous>, transform_indices = @transform_3, window_bounds = array<i64: 16, 648>}]} {
    %c0 = arith.constant 0 : index
    %c0_0 = arith.constant 0 : index
    %0 = vector.load %arg1[%c0, %c0_0] : memref<16x9xbf16, #tpu.memory_space<vmem>>, vector<16x9xbf16>
    %c0_1 = arith.constant 0 : index
    %c0_2 = arith.constant 0 : index
    %1 = vector.load %arg2[%c0_1, %c0_2] : memref<9x648xbf16, #tpu.memory_space<vmem>>, vector<9x648xbf16>
    %cst = arith.constant dense<0.000000e+00> : vector<16x648xf32>
    %2 = tpu.matmul %0, %1, %cst {dimension_numbers = #tpu.dot_dimension_numbers<[1], [0], [0], [1], [0, 0, 1, 1], [], []>} : vector<16x9xbf16>, vector<9x648xbf16>, vector<16x648xf32> -> vector<16x648xf32>
    %c0_3 = arith.constant 0 : index
    %c0_4 = arith.constant 0 : index
    %3 = vector.load %arg3[%c0_3, %c0_4] : memref<16x1xf32, #tpu.memory_space<vmem>>, vector<16x1xf32>
    %4 = vector.broadcast %3 : vector<16x1xf32> to vector<16x648xf32>
    %5 = arith.addf %2, %4 : vector<16x648xf32>
    %cst_5 = arith.constant 0.000000e+00 : f32
    %6 = vector.broadcast %cst_5 : f32 to vector<16x648xf32>
    %7 = arith.maximumf %5, %6 : vector<16x648xf32>
    %8 = arith.truncf %7 : vector<16x648xf32> to vector<16x648xbf16>
    %c0_6 = arith.constant 0 : index
    %c0_7 = arith.constant 0 : index
    %9 = vector.load %arg4[%c0_6, %c0_7] : memref<16x648xbf16, #tpu.memory_space<vmem>>, vector<16x648xbf16>
    tpu.vector_store %arg4[%c0_6, %c0_7], %8 {strides = array<i32>} : memref<16x648xbf16, #tpu.memory_space<vmem>>, vector<16x648xbf16>,
    return
  }
  func.func @transform_0(%arg0: i32) -> (i32, i32) {
    %c0_i32 = arith.constant 0 : i32
    %c0_i32_0 = arith.constant 0 : i32
    %c0_i32_1 = arith.constant 0 : i32
    return %c0_i32, %c0_i32_0 : i32, i32
  }
  func.func @transform_1(%arg0: i32) -> (i32, i32) {
    %c0_i32 = arith.constant 0 : i32
    %c0_i32_0 = arith.constant 0 : i32
    %c0_i32_1 = arith.constant 0 : i32
    return %c0_i32, %c0_i32_0 : i32, i32
  }
  func.func @transform_2(%arg0: i32) -> (i32, i32) {
    %c0_i32 = arith.constant 0 : i32
    %c0_i32_0 = arith.constant 0 : i32
    %c0_i32_1 = arith.constant 0 : i32
    return %c0_i32, %c0_i32_0 : i32, i32
  }
  func.func @transform_3(%arg0: i32) -> (i32, i32) {
    %c0_i32 = arith.constant 0 : i32
    %c0_i32_0 = arith.constant 0 : i32
    %c0_i32_1 = arith.constant 0 : i32
    return %c0_i32, %c0_i32_0 : i32, i32
  }
}

module attributes {stable_mosaic.version = 11 : i64} {
  func.func @_gemm_bias_act_kernel(%arg0: i32, %arg1: memref<32x144xbf16, #tpu.memory_space<vmem>>, %arg2: memref<144x162xbf16, #tpu.memory_space<vmem>>, %arg3: memref<32x1xf32, #tpu.memory_space<vmem>>, %arg4: memref<32x162xbf16, #tpu.memory_space<vmem>>) attributes {dimension_semantics = [#tpu.dimension_semantics<arbitrary>], iteration_bounds = array<i64: 1>, scalar_prefetch = 0 : i64, scratch_operands = 0 : i64, tpu.core_type = #tpu.core_type<tc>, window_params = [{pipeline_mode = #tpu.pipeline_mode<synchronous>, transform_indices = @transform_0, window_bounds = array<i64: 32, 144>}, {pipeline_mode = #tpu.pipeline_mode<synchronous>, transform_indices = @transform_1, window_bounds = array<i64: 144, 162>}, {pipeline_mode = #tpu.pipeline_mode<synchronous>, transform_indices = @transform_2, window_bounds = array<i64: 32, 1>}, {pipeline_mode = #tpu.pipeline_mode<synchronous>, transform_indices = @transform_3, window_bounds = array<i64: 32, 162>}]} {
    %c0 = arith.constant 0 : index
    %c0_0 = arith.constant 0 : index
    %0 = vector.load %arg1[%c0, %c0_0] : memref<32x144xbf16, #tpu.memory_space<vmem>>, vector<32x144xbf16>
    %c0_1 = arith.constant 0 : index
    %c0_2 = arith.constant 0 : index
    %1 = vector.load %arg2[%c0_1, %c0_2] : memref<144x162xbf16, #tpu.memory_space<vmem>>, vector<144x162xbf16>
    %cst = arith.constant dense<0.000000e+00> : vector<32x162xf32>
    %2 = tpu.matmul %0, %1, %cst {dimension_numbers = #tpu.dot_dimension_numbers<[1], [0], [0], [1], [0, 0, 1, 1], [], []>} : vector<32x144xbf16>, vector<144x162xbf16>, vector<32x162xf32> -> vector<32x162xf32>
    %c0_3 = arith.constant 0 : index
    %c0_4 = arith.constant 0 : index
    %3 = vector.load %arg3[%c0_3, %c0_4] : memref<32x1xf32, #tpu.memory_space<vmem>>, vector<32x1xf32>
    %4 = vector.broadcast %3 : vector<32x1xf32> to vector<32x162xf32>
    %5 = arith.addf %2, %4 : vector<32x162xf32>
    %cst_5 = arith.constant 0.000000e+00 : f32
    %6 = vector.broadcast %cst_5 : f32 to vector<32x162xf32>
    %7 = arith.maximumf %5, %6 : vector<32x162xf32>
    %8 = arith.truncf %7 : vector<32x162xf32> to vector<32x162xbf16>
    %c0_6 = arith.constant 0 : index
    %c0_7 = arith.constant 0 : index
    %9 = vector.load %arg4[%c0_6, %c0_7] : memref<32x162xbf16, #tpu.memory_space<vmem>>, vector<32x162xbf16>
    tpu.vector_store %arg4[%c0_6, %c0_7], %8 {strides = array<i32>} : memref<32x162xbf16, #tpu.memory_space<vmem>>, vector<32x162xbf16>,
    return
  }
  func.func @transform_0(%arg0: i32) -> (i32, i32) {
    %c0_i32 = arith.constant 0 : i32
    %c0_i32_0 = arith.constant 0 : i32
    %c0_i32_1 = arith.constant 0 : i32
    return %c0_i32, %c0_i32_0 : i32, i32
  }
  func.func @transform_1(%arg0: i32) -> (i32, i32) {
    %c0_i32 = arith.constant 0 : i32
    %c0_i32_0 = arith.constant 0 : i32
    %c0_i32_1 = arith.constant 0 : i32
    return %c0_i32, %c0_i32_0 : i32, i32
  }
  func.func @transform_2(%arg0: i32) -> (i32, i32) {
    %c0_i32 = arith.constant 0 : i32
    %c0_i32_0 = arith.constant 0 : i32
    %c0_i32_1 = arith.constant 0 : i32
    return %c0_i32, %c0_i32_0 : i32, i32
  }
  func.func @transform_3(%arg0: i32) -> (i32, i32) {
    %c0_i32 = arith.constant 0 : i32
    %c0_i32_0 = arith.constant 0 : i32
    %c0_i32_1 = arith.constant 0 : i32
    return %c0_i32, %c0_i32_0 : i32, i32
  }
}

module attributes {stable_mosaic.version = 11 : i64} {
  func.func @_gemm_bias_act_kernel(%arg0: i32, %arg1: memref<64x288xbf16, #tpu.memory_space<vmem>>, %arg2: memref<288x32xbf16, #tpu.memory_space<vmem>>, %arg3: memref<64x1xf32, #tpu.memory_space<vmem>>, %arg4: memref<64x32xbf16, #tpu.memory_space<vmem>>) attributes {dimension_semantics = [#tpu.dimension_semantics<arbitrary>], iteration_bounds = array<i64: 1>, scalar_prefetch = 0 : i64, scratch_operands = 0 : i64, tpu.core_type = #tpu.core_type<tc>, window_params = [{pipeline_mode = #tpu.pipeline_mode<synchronous>, transform_indices = @transform_0, window_bounds = array<i64: 64, 288>}, {pipeline_mode = #tpu.pipeline_mode<synchronous>, transform_indices = @transform_1, window_bounds = array<i64: 288, 32>}, {pipeline_mode = #tpu.pipeline_mode<synchronous>, transform_indices = @transform_2, window_bounds = array<i64: 64, 1>}, {pipeline_mode = #tpu.pipeline_mode<synchronous>, transform_indices = @transform_3, window_bounds = array<i64: 64, 32>}]} {
    %c0 = arith.constant 0 : index
    %c0_0 = arith.constant 0 : index
    %0 = vector.load %arg1[%c0, %c0_0] : memref<64x288xbf16, #tpu.memory_space<vmem>>, vector<64x288xbf16>
    %c0_1 = arith.constant 0 : index
    %c0_2 = arith.constant 0 : index
    %1 = vector.load %arg2[%c0_1, %c0_2] : memref<288x32xbf16, #tpu.memory_space<vmem>>, vector<288x32xbf16>
    %cst = arith.constant dense<0.000000e+00> : vector<64x32xf32>
    %2 = tpu.matmul %0, %1, %cst {dimension_numbers = #tpu.dot_dimension_numbers<[1], [0], [0], [1], [0, 0, 1, 1], [], []>} : vector<64x288xbf16>, vector<288x32xbf16>, vector<64x32xf32> -> vector<64x32xf32>
    %c0_3 = arith.constant 0 : index
    %c0_4 = arith.constant 0 : index
    %3 = vector.load %arg3[%c0_3, %c0_4] : memref<64x1xf32, #tpu.memory_space<vmem>>, vector<64x1xf32>
    %4 = vector.broadcast %3 : vector<64x1xf32> to vector<64x32xf32>
    %5 = arith.addf %2, %4 : vector<64x32xf32>
    %cst_5 = arith.constant 0.000000e+00 : f32
    %6 = vector.broadcast %cst_5 : f32 to vector<64x32xf32>
    %7 = arith.maximumf %5, %6 : vector<64x32xf32>
    %8 = arith.truncf %7 : vector<64x32xf32> to vector<64x32xbf16>
    %c0_6 = arith.constant 0 : index
    %c0_7 = arith.constant 0 : index
    %9 = vector.load %arg4[%c0_6, %c0_7] : memref<64x32xbf16, #tpu.memory_space<vmem>>, vector<64x32xbf16>
    tpu.vector_store %arg4[%c0_6, %c0_7], %8 {strides = array<i32>} : memref<64x32xbf16, #tpu.memory_space<vmem>>, vector<64x32xbf16>,
    return
  }
  func.func @transform_0(%arg0: i32) -> (i32, i32) {
    %c0_i32 = arith.constant 0 : i32
    %c0_i32_0 = arith.constant 0 : i32
    %c0_i32_1 = arith.constant 0 : i32
    return %c0_i32, %c0_i32_0 : i32, i32
  }
  func.func @transform_1(%arg0: i32) -> (i32, i32) {
    %c0_i32 = arith.constant 0 : i32
    %c0_i32_0 = arith.constant 0 : i32
    %c0_i32_1 = arith.constant 0 : i32
    return %c0_i32, %c0_i32_0 : i32, i32
  }
  func.func @transform_2(%arg0: i32) -> (i32, i32) {
    %c0_i32 = arith.constant 0 : i32
    %c0_i32_0 = arith.constant 0 : i32
    %c0_i32_1 = arith.constant 0 : i32
    return %c0_i32, %c0_i32_0 : i32, i32
  }
  func.func @transform_3(%arg0: i32) -> (i32, i32) {
    %c0_i32 = arith.constant 0 : i32
    %c0_i32_0 = arith.constant 0 : i32
    %c0_i32_1 = arith.constant 0 : i32
    return %c0_i32, %c0_i32_0 : i32, i32
  }
}

module attributes {stable_mosaic.version = 11 : i64} {
  func.func @_latent_kernel(%arg0: i32, %arg1: memref<2x1024xbf16, #tpu.memory_space<vmem>>, %arg2: memref<2x32xf32, #tpu.memory_space<vmem>>, %arg3: memref<1024x32xbf16, #tpu.memory_space<vmem>>, %arg4: memref<1x32xf32, #tpu.memory_space<vmem>>, %arg5: memref<1024x32xbf16, #tpu.memory_space<vmem>>, %arg6: memref<1x32xf32, #tpu.memory_space<vmem>>, %arg7: memref<32x1024xbf16, #tpu.memory_space<vmem>>, %arg8: memref<1x1024xf32, #tpu.memory_space<vmem>>, %arg9: memref<1024x576xbf16, #tpu.memory_space<vmem>>, %arg10: memref<1x576xf32, #tpu.memory_space<vmem>>, %arg11: memref<2x32xf32, #tpu.memory_space<vmem>>, %arg12: memref<2x32xf32, #tpu.memory_space<vmem>>, %arg13: memref<2x576xf32, #tpu.memory_space<vmem>>) attributes {dimension_semantics = [#tpu.dimension_semantics<arbitrary>], iteration_bounds = array<i64: 1>, scalar_prefetch = 0 : i64, scratch_operands = 0 : i64, tpu.core_type = #tpu.core_type<tc>, window_params = [{pipeline_mode = #tpu.pipeline_mode<synchronous>, transform_indices = @transform_0, window_bounds = array<i64: 2, 1024>}, {pipeline_mode = #tpu.pipeline_mode<synchronous>, transform_indices = @transform_1, window_bounds = array<i64: 2, 32>}, {pipeline_mode = #tpu.pipeline_mode<synchronous>, transform_indices = @transform_2, window_bounds = array<i64: 1024, 32>}, {pipeline_mode = #tpu.pipeline_mode<synchronous>, transform_indices = @transform_3, window_bounds = array<i64: 1, 32>}, {pipeline_mode = #tpu.pipeline_mode<synchronous>, transform_indices = @transform_4, window_bounds = array<i64: 1024, 32>}, {pipeline_mode = #tpu.pipeline_mode<synchronous>, transform_indices = @transform_5, window_bounds = array<i64: 1, 32>}, {pipeline_mode = #tpu.pipeline_mode<synchronous>, transform_indices = @transform_6, window_bounds = array<i64: 32, 1024>}, {pipeline_mode = #tpu.pipeline_mode<synchronous>, transform_indices = @transform_7, window_bounds = array<i64: 1, 1024>}, {pipeline_mode = #tpu.pipeline_mode<synchronous>, transform_indices = @transform_8, window_bounds = array<i64: 1024, 576>}, {pipeline_mode = #tpu.pipeline_mode<synchronous>, transform_indices = @transform_9, window_bounds = array<i64: 1, 576>}, {pipeline_mode = #tpu.pipeline_mode<synchronous>, transform_indices = @transform_10, window_bounds = array<i64: 2, 32>}, {pipeline_mode = #tpu.pipeline_mode<synchronous>, transform_indices = @transform_11, window_bounds = array<i64: 2, 32>}, {pipeline_mode = #tpu.pipeline_mode<synchronous>, transform_indices = @transform_12, window_bounds = array<i64: 2, 576>}]} {
    %c0 = arith.constant 0 : index
    %c0_0 = arith.constant 0 : index
    %0 = vector.load %arg1[%c0, %c0_0] : memref<2x1024xbf16, #tpu.memory_space<vmem>>, vector<2x1024xbf16>
    %c0_1 = arith.constant 0 : index
    %c0_2 = arith.constant 0 : index
    %1 = vector.load %arg3[%c0_1, %c0_2] : memref<1024x32xbf16, #tpu.memory_space<vmem>>, vector<1024x32xbf16>
    %cst = arith.constant dense<0.000000e+00> : vector<2x32xf32>
    %2 = tpu.matmul %0, %1, %cst {dimension_numbers = #tpu.dot_dimension_numbers<[1], [0], [0], [1], [0, 0, 1, 1], [], []>} : vector<2x1024xbf16>, vector<1024x32xbf16>, vector<2x32xf32> -> vector<2x32xf32>
    %c0_3 = arith.constant 0 : index
    %c0_4 = arith.constant 0 : index
    %3 = vector.load %arg4[%c0_3, %c0_4] : memref<1x32xf32, #tpu.memory_space<vmem>>, vector<1x32xf32>
    %4 = vector.broadcast %3 : vector<1x32xf32> to vector<2x32xf32>
    %5 = arith.addf %2, %4 : vector<2x32xf32>
    %c0_5 = arith.constant 0 : index
    %c0_6 = arith.constant 0 : index
    %6 = vector.load %arg5[%c0_5, %c0_6] : memref<1024x32xbf16, #tpu.memory_space<vmem>>, vector<1024x32xbf16>
    %cst_7 = arith.constant dense<0.000000e+00> : vector<2x32xf32>
    %7 = tpu.matmul %0, %6, %cst_7 {dimension_numbers = #tpu.dot_dimension_numbers<[1], [0], [0], [1], [0, 0, 1, 1], [], []>} : vector<2x1024xbf16>, vector<1024x32xbf16>, vector<2x32xf32> -> vector<2x32xf32>
    %c0_8 = arith.constant 0 : index
    %c0_9 = arith.constant 0 : index
    %8 = vector.load %arg6[%c0_8, %c0_9] : memref<1x32xf32, #tpu.memory_space<vmem>>, vector<1x32xf32>
    %9 = vector.broadcast %8 : vector<1x32xf32> to vector<2x32xf32>
    %10 = arith.addf %7, %9 : vector<2x32xf32>
    %c0_10 = arith.constant 0 : index
    %c0_11 = arith.constant 0 : index
    %11 = vector.load %arg11[%c0_10, %c0_11] : memref<2x32xf32, #tpu.memory_space<vmem>>, vector<2x32xf32>
    tpu.vector_store %arg11[%c0_10, %c0_11], %5 {strides = array<i32>} : memref<2x32xf32, #tpu.memory_space<vmem>>, vector<2x32xf32>,
    %c0_12 = arith.constant 0 : index
    %c0_13 = arith.constant 0 : index
    %12 = vector.load %arg12[%c0_12, %c0_13] : memref<2x32xf32, #tpu.memory_space<vmem>>, vector<2x32xf32>
    tpu.vector_store %arg12[%c0_12, %c0_13], %10 {strides = array<i32>} : memref<2x32xf32, #tpu.memory_space<vmem>>, vector<2x32xf32>,
    %cst_14 = arith.constant 5.000000e-01 : f32
    %13 = vector.broadcast %cst_14 : f32 to vector<2x32xf32>
    %14 = arith.mulf %10, %13 : vector<2x32xf32>
    %15 = math.exp %14 : vector<2x32xf32>
    %c0_15 = arith.constant 0 : index
    %c0_16 = arith.constant 0 : index
    %16 = vector.load %arg2[%c0_15, %c0_16] : memref<2x32xf32, #tpu.memory_space<vmem>>, vector<2x32xf32>
    %17 = arith.mulf %15, %16 : vector<2x32xf32>
    %18 = arith.addf %5, %17 : vector<2x32xf32>
    %19 = arith.truncf %18 : vector<2x32xf32> to vector<2x32xbf16>
    %c0_17 = arith.constant 0 : index
    %c0_18 = arith.constant 0 : index
    %20 = vector.load %arg7[%c0_17, %c0_18] : memref<32x1024xbf16, #tpu.memory_space<vmem>>, vector<32x1024xbf16>
    %cst_19 = arith.constant dense<0.000000e+00> : vector<2x1024xf32>
    %21 = tpu.matmul %19, %20, %cst_19 {dimension_numbers = #tpu.dot_dimension_numbers<[1], [0], [0], [1], [0, 0, 1, 1], [], []>} : vector<2x32xbf16>, vector<32x1024xbf16>, vector<2x1024xf32> -> vector<2x1024xf32>
    %c0_20 = arith.constant 0 : index
    %c0_21 = arith.constant 0 : index
    %22 = vector.load %arg8[%c0_20, %c0_21] : memref<1x1024xf32, #tpu.memory_space<vmem>>, vector<1x1024xf32>
    %23 = vector.broadcast %22 : vector<1x1024xf32> to vector<2x1024xf32>
    %24 = arith.addf %21, %23 : vector<2x1024xf32>
    %25 = arith.truncf %24 : vector<2x1024xf32> to vector<2x1024xbf16>
    %c0_22 = arith.constant 0 : index
    %c0_23 = arith.constant 0 : index
    %26 = vector.load %arg9[%c0_22, %c0_23] : memref<1024x576xbf16, #tpu.memory_space<vmem>>, vector<1024x576xbf16>
    %cst_24 = arith.constant dense<0.000000e+00> : vector<2x576xf32>
    %27 = tpu.matmul %25, %26, %cst_24 {dimension_numbers = #tpu.dot_dimension_numbers<[1], [0], [0], [1], [0, 0, 1, 1], [], []>} : vector<2x1024xbf16>, vector<1024x576xbf16>, vector<2x576xf32> -> vector<2x576xf32>
    %c0_25 = arith.constant 0 : index
    %c0_26 = arith.constant 0 : index
    %28 = vector.load %arg10[%c0_25, %c0_26] : memref<1x576xf32, #tpu.memory_space<vmem>>, vector<1x576xf32>
    %29 = vector.broadcast %28 : vector<1x576xf32> to vector<2x576xf32>
    %30 = arith.addf %27, %29 : vector<2x576xf32>
    %cst_27 = arith.constant 0.000000e+00 : f32
    %31 = vector.broadcast %cst_27 : f32 to vector<2x576xf32>
    %32 = arith.maximumf %30, %31 : vector<2x576xf32>
    %c0_28 = arith.constant 0 : index
    %c0_29 = arith.constant 0 : index
    %33 = vector.load %arg13[%c0_28, %c0_29] : memref<2x576xf32, #tpu.memory_space<vmem>>, vector<2x576xf32>
    tpu.vector_store %arg13[%c0_28, %c0_29], %32 {strides = array<i32>} : memref<2x576xf32, #tpu.memory_space<vmem>>, vector<2x576xf32>,
    return
  }
  func.func @transform_0(%arg0: i32) -> (i32, i32) {
    %c0_i32 = arith.constant 0 : i32
    %c0_i32_0 = arith.constant 0 : i32
    %c0_i32_1 = arith.constant 0 : i32
    return %c0_i32, %c0_i32_0 : i32, i32
  }
  func.func @transform_1(%arg0: i32) -> (i32, i32) {
    %c0_i32 = arith.constant 0 : i32
    %c0_i32_0 = arith.constant 0 : i32
    %c0_i32_1 = arith.constant 0 : i32
    return %c0_i32, %c0_i32_0 : i32, i32
  }
  func.func @transform_2(%arg0: i32) -> (i32, i32) {
    %c0_i32 = arith.constant 0 : i32
    %c0_i32_0 = arith.constant 0 : i32
    %c0_i32_1 = arith.constant 0 : i32
    return %c0_i32, %c0_i32_0 : i32, i32
  }
  func.func @transform_3(%arg0: i32) -> (i32, i32) {
    %c0_i32 = arith.constant 0 : i32
    %c0_i32_0 = arith.constant 0 : i32
    %c0_i32_1 = arith.constant 0 : i32
    return %c0_i32, %c0_i32_0 : i32, i32
  }
  func.func @transform_4(%arg0: i32) -> (i32, i32) {
    %c0_i32 = arith.constant 0 : i32
    %c0_i32_0 = arith.constant 0 : i32
    %c0_i32_1 = arith.constant 0 : i32
    return %c0_i32, %c0_i32_0 : i32, i32
  }
  func.func @transform_5(%arg0: i32) -> (i32, i32) {
    %c0_i32 = arith.constant 0 : i32
    %c0_i32_0 = arith.constant 0 : i32
    %c0_i32_1 = arith.constant 0 : i32
    return %c0_i32, %c0_i32_0 : i32, i32
  }
  func.func @transform_6(%arg0: i32) -> (i32, i32) {
    %c0_i32 = arith.constant 0 : i32
    %c0_i32_0 = arith.constant 0 : i32
    %c0_i32_1 = arith.constant 0 : i32
    return %c0_i32, %c0_i32_0 : i32, i32
  }
  func.func @transform_7(%arg0: i32) -> (i32, i32) {
    %c0_i32 = arith.constant 0 : i32
    %c0_i32_0 = arith.constant 0 : i32
    %c0_i32_1 = arith.constant 0 : i32
    return %c0_i32, %c0_i32_0 : i32, i32
  }
  func.func @transform_8(%arg0: i32) -> (i32, i32) {
    %c0_i32 = arith.constant 0 : i32
    %c0_i32_0 = arith.constant 0 : i32
    %c0_i32_1 = arith.constant 0 : i32
    return %c0_i32, %c0_i32_0 : i32, i32
  }
  func.func @transform_9(%arg0: i32) -> (i32, i32) {
    %c0_i32 = arith.constant 0 : i32
    %c0_i32_0 = arith.constant 0 : i32
    %c0_i32_1 = arith.constant 0 : i32
    return %c0_i32, %c0_i32_0 : i32, i32
  }
  func.func @transform_10(%arg0: i32) -> (i32, i32) {
    %c0_i32 = arith.constant 0 : i32
    %c0_i32_0 = arith.constant 0 : i32
    %c0_i32_1 = arith.constant 0 : i32
    return %c0_i32, %c0_i32_0 : i32, i32
  }
  func.func @transform_11(%arg0: i32) -> (i32, i32) {
    %c0_i32 = arith.constant 0 : i32
    %c0_i32_0 = arith.constant 0 : i32
    %c0_i32_1 = arith.constant 0 : i32
    return %c0_i32, %c0_i32_0 : i32, i32
  }
  func.func @transform_12(%arg0: i32) -> (i32, i32) {
    %c0_i32 = arith.constant 0 : i32
    %c0_i32_0 = arith.constant 0 : i32
    %c0_i32_1 = arith.constant 0 : i32
    return %c0_i32, %c0_i32_0 : i32, i32
  }
}

module attributes {stable_mosaic.version = 11 : i64} {
  func.func @_gemm_bias_act_kernel(%arg0: i32, %arg1: memref<32x576xbf16, #tpu.memory_space<vmem>>, %arg2: memref<576x50xbf16, #tpu.memory_space<vmem>>, %arg3: memref<32x1xf32, #tpu.memory_space<vmem>>, %arg4: memref<32x50xbf16, #tpu.memory_space<vmem>>) attributes {dimension_semantics = [#tpu.dimension_semantics<arbitrary>], iteration_bounds = array<i64: 1>, scalar_prefetch = 0 : i64, scratch_operands = 0 : i64, tpu.core_type = #tpu.core_type<tc>, window_params = [{pipeline_mode = #tpu.pipeline_mode<synchronous>, transform_indices = @transform_0, window_bounds = array<i64: 32, 576>}, {pipeline_mode = #tpu.pipeline_mode<synchronous>, transform_indices = @transform_1, window_bounds = array<i64: 576, 50>}, {pipeline_mode = #tpu.pipeline_mode<synchronous>, transform_indices = @transform_2, window_bounds = array<i64: 32, 1>}, {pipeline_mode = #tpu.pipeline_mode<synchronous>, transform_indices = @transform_3, window_bounds = array<i64: 32, 50>}]} {
    %c0 = arith.constant 0 : index
    %c0_0 = arith.constant 0 : index
    %0 = vector.load %arg1[%c0, %c0_0] : memref<32x576xbf16, #tpu.memory_space<vmem>>, vector<32x576xbf16>
    %c0_1 = arith.constant 0 : index
    %c0_2 = arith.constant 0 : index
    %1 = vector.load %arg2[%c0_1, %c0_2] : memref<576x50xbf16, #tpu.memory_space<vmem>>, vector<576x50xbf16>
    %cst = arith.constant dense<0.000000e+00> : vector<32x50xf32>
    %2 = tpu.matmul %0, %1, %cst {dimension_numbers = #tpu.dot_dimension_numbers<[1], [0], [0], [1], [0, 0, 1, 1], [], []>} : vector<32x576xbf16>, vector<576x50xbf16>, vector<32x50xf32> -> vector<32x50xf32>
    %c0_3 = arith.constant 0 : index
    %c0_4 = arith.constant 0 : index
    %3 = vector.load %arg3[%c0_3, %c0_4] : memref<32x1xf32, #tpu.memory_space<vmem>>, vector<32x1xf32>
    %4 = vector.broadcast %3 : vector<32x1xf32> to vector<32x50xf32>
    %5 = arith.addf %2, %4 : vector<32x50xf32>
    %cst_5 = arith.constant 0.000000e+00 : f32
    %6 = vector.broadcast %cst_5 : f32 to vector<32x50xf32>
    %7 = arith.maximumf %5, %6 : vector<32x50xf32>
    %8 = arith.truncf %7 : vector<32x50xf32> to vector<32x50xbf16>
    %c0_6 = arith.constant 0 : index
    %c0_7 = arith.constant 0 : index
    %9 = vector.load %arg4[%c0_6, %c0_7] : memref<32x50xbf16, #tpu.memory_space<vmem>>, vector<32x50xbf16>
    tpu.vector_store %arg4[%c0_6, %c0_7], %8 {strides = array<i32>} : memref<32x50xbf16, #tpu.memory_space<vmem>>, vector<32x50xbf16>,
    return
  }
  func.func @transform_0(%arg0: i32) -> (i32, i32) {
    %c0_i32 = arith.constant 0 : i32
    %c0_i32_0 = arith.constant 0 : i32
    %c0_i32_1 = arith.constant 0 : i32
    return %c0_i32, %c0_i32_0 : i32, i32
  }
  func.func @transform_1(%arg0: i32) -> (i32, i32) {
    %c0_i32 = arith.constant 0 : i32
    %c0_i32_0 = arith.constant 0 : i32
    %c0_i32_1 = arith.constant 0 : i32
    return %c0_i32, %c0_i32_0 : i32, i32
  }
  func.func @transform_2(%arg0: i32) -> (i32, i32) {
    %c0_i32 = arith.constant 0 : i32
    %c0_i32_0 = arith.constant 0 : i32
    %c0_i32_1 = arith.constant 0 : i32
    return %c0_i32, %c0_i32_0 : i32, i32
  }
  func.func @transform_3(%arg0: i32) -> (i32, i32) {
    %c0_i32 = arith.constant 0 : i32
    %c0_i32_0 = arith.constant 0 : i32
    %c0_i32_1 = arith.constant 0 : i32
    return %c0_i32, %c0_i32_0 : i32, i32
  }
}

module attributes {stable_mosaic.version = 11 : i64} {
  func.func @_gemm_bias_act_kernel(%arg0: i32, %arg1: memref<16x512xbf16, #tpu.memory_space<vmem>>, %arg2: memref<512x200xbf16, #tpu.memory_space<vmem>>, %arg3: memref<16x1xf32, #tpu.memory_space<vmem>>, %arg4: memref<16x200xbf16, #tpu.memory_space<vmem>>) attributes {dimension_semantics = [#tpu.dimension_semantics<arbitrary>], iteration_bounds = array<i64: 1>, scalar_prefetch = 0 : i64, scratch_operands = 0 : i64, tpu.core_type = #tpu.core_type<tc>, window_params = [{pipeline_mode = #tpu.pipeline_mode<synchronous>, transform_indices = @transform_0, window_bounds = array<i64: 16, 512>}, {pipeline_mode = #tpu.pipeline_mode<synchronous>, transform_indices = @transform_1, window_bounds = array<i64: 512, 200>}, {pipeline_mode = #tpu.pipeline_mode<synchronous>, transform_indices = @transform_2, window_bounds = array<i64: 16, 1>}, {pipeline_mode = #tpu.pipeline_mode<synchronous>, transform_indices = @transform_3, window_bounds = array<i64: 16, 200>}]} {
    %c0 = arith.constant 0 : index
    %c0_0 = arith.constant 0 : index
    %0 = vector.load %arg1[%c0, %c0_0] : memref<16x512xbf16, #tpu.memory_space<vmem>>, vector<16x512xbf16>
    %c0_1 = arith.constant 0 : index
    %c0_2 = arith.constant 0 : index
    %1 = vector.load %arg2[%c0_1, %c0_2] : memref<512x200xbf16, #tpu.memory_space<vmem>>, vector<512x200xbf16>
    %cst = arith.constant dense<0.000000e+00> : vector<16x200xf32>
    %2 = tpu.matmul %0, %1, %cst {dimension_numbers = #tpu.dot_dimension_numbers<[1], [0], [0], [1], [0, 0, 1, 1], [], []>} : vector<16x512xbf16>, vector<512x200xbf16>, vector<16x200xf32> -> vector<16x200xf32>
    %c0_3 = arith.constant 0 : index
    %c0_4 = arith.constant 0 : index
    %3 = vector.load %arg3[%c0_3, %c0_4] : memref<16x1xf32, #tpu.memory_space<vmem>>, vector<16x1xf32>
    %4 = vector.broadcast %3 : vector<16x1xf32> to vector<16x200xf32>
    %5 = arith.addf %2, %4 : vector<16x200xf32>
    %cst_5 = arith.constant 0.000000e+00 : f32
    %6 = vector.broadcast %cst_5 : f32 to vector<16x200xf32>
    %7 = arith.maximumf %5, %6 : vector<16x200xf32>
    %8 = arith.truncf %7 : vector<16x200xf32> to vector<16x200xbf16>
    %c0_6 = arith.constant 0 : index
    %c0_7 = arith.constant 0 : index
    %9 = vector.load %arg4[%c0_6, %c0_7] : memref<16x200xbf16, #tpu.memory_space<vmem>>, vector<16x200xbf16>
    tpu.vector_store %arg4[%c0_6, %c0_7], %8 {strides = array<i32>} : memref<16x200xbf16, #tpu.memory_space<vmem>>, vector<16x200xbf16>,
    return
  }
  func.func @transform_0(%arg0: i32) -> (i32, i32) {
    %c0_i32 = arith.constant 0 : i32
    %c0_i32_0 = arith.constant 0 : i32
    %c0_i32_1 = arith.constant 0 : i32
    return %c0_i32, %c0_i32_0 : i32, i32
  }
  func.func @transform_1(%arg0: i32) -> (i32, i32) {
    %c0_i32 = arith.constant 0 : i32
    %c0_i32_0 = arith.constant 0 : i32
    %c0_i32_1 = arith.constant 0 : i32
    return %c0_i32, %c0_i32_0 : i32, i32
  }
  func.func @transform_2(%arg0: i32) -> (i32, i32) {
    %c0_i32 = arith.constant 0 : i32
    %c0_i32_0 = arith.constant 0 : i32
    %c0_i32_1 = arith.constant 0 : i32
    return %c0_i32, %c0_i32_0 : i32, i32
  }
  func.func @transform_3(%arg0: i32) -> (i32, i32) {
    %c0_i32 = arith.constant 0 : i32
    %c0_i32_0 = arith.constant 0 : i32
    %c0_i32_1 = arith.constant 0 : i32
    return %c0_i32, %c0_i32_0 : i32, i32
  }
}

module attributes {stable_mosaic.version = 11 : i64} {
  func.func @_gemm_bias_act_kernel(%arg0: i32, %arg1: memref<1x256xbf16, #tpu.memory_space<vmem>>, %arg2: memref<256x800xbf16, #tpu.memory_space<vmem>>, %arg3: memref<1x1xf32, #tpu.memory_space<vmem>>, %arg4: memref<1x800xf32, #tpu.memory_space<vmem>>) attributes {dimension_semantics = [#tpu.dimension_semantics<arbitrary>], iteration_bounds = array<i64: 1>, scalar_prefetch = 0 : i64, scratch_operands = 0 : i64, tpu.core_type = #tpu.core_type<tc>, window_params = [{pipeline_mode = #tpu.pipeline_mode<synchronous>, transform_indices = @transform_0, window_bounds = array<i64: 1, 256>}, {pipeline_mode = #tpu.pipeline_mode<synchronous>, transform_indices = @transform_1, window_bounds = array<i64: 256, 800>}, {pipeline_mode = #tpu.pipeline_mode<synchronous>, transform_indices = @transform_2, window_bounds = array<i64: 1, 1>}, {pipeline_mode = #tpu.pipeline_mode<synchronous>, transform_indices = @transform_3, window_bounds = array<i64: 1, 800>}]} {
    %c0 = arith.constant 0 : index
    %c0_0 = arith.constant 0 : index
    %0 = vector.load %arg1[%c0, %c0_0] : memref<1x256xbf16, #tpu.memory_space<vmem>>, vector<1x256xbf16>
    %c0_1 = arith.constant 0 : index
    %c0_2 = arith.constant 0 : index
    %1 = vector.load %arg2[%c0_1, %c0_2] : memref<256x800xbf16, #tpu.memory_space<vmem>>, vector<256x800xbf16>
    %cst = arith.constant dense<0.000000e+00> : vector<1x800xf32>
    %2 = tpu.matmul %0, %1, %cst {dimension_numbers = #tpu.dot_dimension_numbers<[1], [0], [0], [1], [0, 0, 1, 1], [], []>} : vector<1x256xbf16>, vector<256x800xbf16>, vector<1x800xf32> -> vector<1x800xf32>
    %c0_3 = arith.constant 0 : index
    %c0_4 = arith.constant 0 : index
    %3 = vector.load %arg3[%c0_3, %c0_4] : memref<1x1xf32, #tpu.memory_space<vmem>>, vector<1x1xf32>
    %4 = vector.broadcast %3 : vector<1x1xf32> to vector<1x800xf32>
    %5 = arith.addf %2, %4 : vector<1x800xf32>
    %cst_5 = arith.constant 0.000000e+00 : f32
    %6 = vector.broadcast %cst_5 : f32 to vector<1x800xf32>
    %7 = arith.subf %6, %5 : vector<1x800xf32>
    %8 = math.exp %7 : vector<1x800xf32>
    %cst_6 = arith.constant 1.000000e+00 : f32
    %9 = vector.broadcast %cst_6 : f32 to vector<1x800xf32>
    %10 = arith.addf %9, %8 : vector<1x800xf32>
    %cst_7 = arith.constant 1.000000e+00 : f32
    %11 = vector.broadcast %cst_7 : f32 to vector<1x800xf32>
    %12 = arith.divf %11, %10 : vector<1x800xf32>
    %c0_8 = arith.constant 0 : index
    %c0_9 = arith.constant 0 : index
    %13 = vector.load %arg4[%c0_8, %c0_9] : memref<1x800xf32, #tpu.memory_space<vmem>>, vector<1x800xf32>
    tpu.vector_store %arg4[%c0_8, %c0_9], %12 {strides = array<i32>} : memref<1x800xf32, #tpu.memory_space<vmem>>, vector<1x800xf32>,
    return
  }
  func.func @transform_0(%arg0: i32) -> (i32, i32) {
    %c0_i32 = arith.constant 0 : i32
    %c0_i32_0 = arith.constant 0 : i32
    %c0_i32_1 = arith.constant 0 : i32
    return %c0_i32, %c0_i32_0 : i32, i32
  }
  func.func @transform_1(%arg0: i32) -> (i32, i32) {
    %c0_i32 = arith.constant 0 : i32
    %c0_i32_0 = arith.constant 0 : i32
    %c0_i32_1 = arith.constant 0 : i32
    return %c0_i32, %c0_i32_0 : i32, i32
  }
  func.func @transform_2(%arg0: i32) -> (i32, i32) {
    %c0_i32 = arith.constant 0 : i32
    %c0_i32_0 = arith.constant 0 : i32
    %c0_i32_1 = arith.constant 0 : i32
    return %c0_i32, %c0_i32_0 : i32, i32
  }
  func.func @transform_3(%arg0: i32) -> (i32, i32) {
    %c0_i32 = arith.constant 0 : i32
    %c0_i32_0 = arith.constant 0 : i32
    %c0_i32_1 = arith.constant 0 : i32
    return %c0_i32, %c0_i32_0 : i32, i32
  }
}

</mosaic_0001>

<bundles_post_ra>
// kernel: vae_forward.7
= control target key start
LH: loop header
LB: loop body
LE: loop exit
PB: predicated region body
PF: predicated region fallthrough
CT: control target
= control target key end

     0   :  { %8 = vsyncpa [#allocation3], 0  ;;  %s354_s12 = smov [#allocation2]   ;;  %s426_s0 = inlined_call_operand.hbm [shape: bf16[16,9], index: 0, kind: input, shape index: {}]   ;;  %s427_s1 = inlined_call_operand.vmem [shape: bf16[9,648], index: 1, kind: input, shape index: {}]   ;;  %s428_s2 = inlined_call_operand.vmem [shape: f32[16,1], index: 2, kind: input, shape index: {}]   ;;  %s429_s3 = inlined_call_operand.vmem [shape: bf16[16,648], index: 3, kind: output, shape index: {}]  }
   0x1   :  { %s14_s13 = sshll.u32 %s354_s12, 4  ;;  %s15_s13 = int_to_ptr.vmem [resolvable:$true] %s14_s13 }
   0x2   :  { %s340_s14 = scalar_lea.vmem %s15_s13, 128  ;;  %p345_p1 = scmp.lt.s32.totalorder %s15_s13, %s15_s13 }
   0x3   :  { %p341_p0 = scmp.ne.s32.totalorder %s15_s13, %s340_s14  ;;  %p346_p2 = scmp.lt.s32.totalorder %s340_s14, %s340_s14 }
   0x5   :  { %p347_p3 = por %p346_p2, %p345_p1 }
   0x7   :  { %p348_p4 = pnand %p347_p3, %p341_p0 }
   0x9   :  { %351 = shalt.err (!%p348_p4)
}
   0xa   :  { %s355_s15 = smov 64   ;;  %s356_s16 = smov 4  }
   0xb   :  { %20 = dma.hbm_to_vmem [thread:$0]  %s426_s0, 128, %s15_s13, [#allocation3], %s355_s15, %s355_s15, %s356_s16  }
   0xc   :  { %352 = dma.done.wait [#allocation3], 128  }
   0xd   :  { %353 = vsyncadd [#allocation3], 4294967168  ;;  %vm82_vm0 = vcmask 1043456   ;;  %v357_v0 = vmov 0   ;;  %vm83_vm1 = vcmask 1044480   ;;  %v358_v1 = vmov 65535  }
   0xe   :  { %136 = vmatprep.mubr.bf16.mxu0 %v357_v0  ;;  %179 = vmatprep.mubr.bf16.mxu1 %v357_v0  ;;  %v84_v2 = vsel %vm82_vm0, 4294967295, %v358_v1  ;;  %v322_v4 = vld [vmem:[%s427_s1 + $0x4] ss:$24 sps:$4 sm:$0x1f]   ;;  %vm78_vm2 = vcmask 72704   ;;  %v38_v18 = vld [vmem:[%s428_s2 + $0x8] sm:$0xff] }
   0xf   :  { %321 = vset.pattern.permute.xlu0 %v357_v0  ;;  %v85_v3 = vsel %vm83_vm1, %v84_v2, 0  ;;  %v324_v5 = vld [vmem:[%s427_s1] ss:$24 sps:$4 sm:$0x1f]   ;;  %vm283_vm3 = vcmask 64516  }
  0x10   :  { %v90_v6 = vand.u32 %v322_v4, %v85_v3  ;;  %v325_v7 = vld [vmem:[%s427_s1 + $0xc] ss:$24 sps:$4 sm:$0x1f]   ;;  %v87_v9 = vand.u32 %v324_v5, %v85_v3  ;;  %v328_v10 = vld [vmem:[%s427_s1 + $0x8] ss:$24 sps:$4 sm:$0x1f]   ;;  %vm284_vm4 = vmor %vm283_vm3, %vm82_vm0 }
  0x11   :  { %v327_v8 = vld [vmem:[#allocation2] sm:$0xff]   ;;  %v96_v11 = vand.u32 %v325_v7, %v85_v3  ;;  %v329_v12 = vld [vmem:[%s427_s1 + $0x10] ss:$24 sps:$4 sm:$0x1f]   ;;  %v93_v14 = vand.u32 %v328_v10, %v85_v3 }
  0x12   :  { %118 = vmatprep.subr.bf16.mxu0 %v90_v6  ;;  %v37_v13 = vld [vmem:[%s428_s2] sm:$0xff]  ;;  %v331_v15 = vld [vmem:[%s427_s1 + $0x14] ss:$24 sps:$4 sm:$0x1f]   ;;  %v99_v16 = vand.u32 %v329_v12, %v85_v3 }
  0x13   :  { %119 = vmatpush1.bf16.msra.mxu0 %v87_v9  ;;  %41 = vperm.xlu0 %321, %v37_v13   ;;  %v102_v17 = vand.u32 %v331_v15, %v85_v3 }
  0x14   :  { %161 = vmatprep.subr.bf16.mxu1 %v96_v11 }
  0x15   :  { %162 = vmatpush1.bf16.msra.mxu1 %v93_v14  ;;  %204 = vmatprep.subr.bf16.mxu0 %v102_v17 }
  0x16   :  { %301 = vmatmul.mubr.msk.bf16.vlgmr.msra.gmra.mxu0 %vm78_vm2, %v327_v8 }
  0x17   :  { %222 = vmatprep.mubr.bf16.mxu0 %v357_v0  ;;  %205 = vmatpush1.bf16.msra.mxu0 %v99_v16 }
  0x18   :  { %302 = vmatmul.mubr.msk.bf16.vlgmr.msra.gmra.mxu1 %vm78_vm2, %v327_v8  ;;  %46 = vperm.xlu0 %321, %v38_v18  }
  0x1e   :  { %303 = vmatmul.mubr.msk.bf16.vlgmr.msra.gmra.mxu0 %vm78_vm2, %v327_v8 }
  0x8e   :  { %v42_v19 = vpop.permute.xlu0 %41 }
  0x93   :  { %v47_v22 = vpop.permute.xlu0 %46 }
  0xd6   :  { %v138_v20 = vpop.f32.mrf.mxu0 }
  0xd7   :  { %v139_v21 = vadd.f32 %v138_v20, %v42_v19 }
  0xd8   :  { %v140_v23 = vpop.f32.mrf.mxu0  ;;  %v181_v24 = vpop.f32.mrf.mxu1 }
  0xd9   :  { %v141_v25 = vadd.f32 %v140_v23, %v42_v19  ;;  %v182_v26 = vadd.f32 %v181_v24, %v42_v19  ;;  %v233_v27 = vmax.f32 %v139_v21, 0.0 }
  0xda   :  { %v142_v28 = vpop.f32.mrf.mxu0  ;;  %v183_v29 = vpop.f32.mrf.mxu1 }
  0xdb   :  { %v234_v30 = vmax.f32 %v141_v25, 0.0  ;;  %v235_v31 = vmax.f32 %v182_v26, 0.0  ;;  %v143_v32 = vadd.f32 %v142_v28, %v47_v22  ;;  %v184_v33 = vadd.f32 %v183_v29, %v42_v19 }
  0xdc   :  { %v144_v34 = vpop.f32.mrf.mxu0  ;;  %v185_v35 = vpop.f32.mrf.mxu1 }
  0xdd   :  { %v310_v36 = vpack.c.bf16 %v234_v30, %v233_v27  ;;  %v236_v37 = vmax.f32 %v184_v33, 0.0  ;;  %v145_v38 = vadd.f32 %v144_v34, %v47_v22  ;;  %v239_v39 = vmax.f32 %v143_v32, 0.0 }
  0xde   :  { %v186_v40 = vadd.f32 %v185_v35, %v47_v22  ;;  %v224_v41 = vpop.f32.mrf.mxu0  ;;  %v187_v42 = vpop.f32.mrf.mxu1 }
  0xdf   :  { %281 = vst [vmem:[%s429_s3] sm:$0xff] %v310_v36  ;;  %v311_v43 = vpack.c.bf16 %v236_v37, %v235_v31  ;;  %v240_v44 = vmax.f32 %v145_v38, 0.0  ;;  %v225_v45 = vadd.f32 %v224_v41, %v42_v19  ;;  %v188_v46 = vadd.f32 %v187_v42, %v47_v22 }
  0xe0   :  { %v241_v47 = vmax.f32 %v186_v40, 0.0  ;;  %v226_v48 = vpop.f32.mrf.mxu0 }
  0xe1   :  { %282 = vst [vmem:[%s429_s3 + $0x8] sm:$0xff] %v311_v43  ;;  %v313_v49 = vpack.c.bf16 %v240_v44, %v239_v39  ;;  %v242_v50 = vmax.f32 %v188_v46, 0.0  ;;  %v227_v51 = vadd.f32 %v226_v48, %v42_v19  ;;  %v237_v53 = vmax.f32 %v225_v45, 0.0 }
  0xe2   :  { %v228_v52 = vpop.f32.mrf.mxu0 }
  0xe3   :  { %286 = vst [vmem:[%s429_s3 + $0x18] sm:$0xff] %v313_v49  ;;  %v314_v54 = vpack.c.bf16 %v242_v50, %v241_v47  ;;  %v238_v55 = vmax.f32 %v227_v51, 0.0  ;;  %v229_v56 = vadd.f32 %v228_v52, %v47_v22 }
  0xe4   :  { %v230_v57 = vpop.f32.mrf.mxu0 }
  0xe5   :  { %287 = vst [vmem:[%s429_s3 + $0x20] sm:$0xff] %v314_v54  ;;  %v312_v58 = vpack.c.bf16 %v238_v55, %v237_v53  ;;  %v231_v59 = vadd.f32 %v230_v57, %v47_v22  ;;  %v243_v60 = vmax.f32 %v229_v56, 0.0 }
  0xe7   :  { %285 = vst.msk [vmem:[%s429_s3 + $0x10] sm:$0xff] %vm284_vm4, %v312_v58  ;;  %v244_v61 = vmax.f32 %v231_v59, 0.0 }
  0xe9   :  { %v315_v62 = vpack.c.bf16 %v244_v61, %v243_v60 }
  0xeb   :  { %288 = vst.msk [vmem:[%s429_s3 + $0x28] sm:$0xff] %vm284_vm4, %v315_v62 }
  0xec   :  { %293 = vsyncpa [#allocation3], 1 }

// kernel: vae_forward.8
= control target key start
LH: loop header
LB: loop body
LE: loop exit
PB: predicated region body
PF: predicated region fallthrough
CT: control target
= control target key end

     0   :  { %v358_v1 = vmov 0   ;;  %vm169_vm0 = vcmask 130048   ;;  %vm261_vm1 = vcmask 1043456   ;;  %vm262_vm2 = vcmask 277508   ;;  %s481_s1 = inlined_call_operand.vmem [shape: bf16[144,162], index: 1, kind: input, shape index: {}]   ;;  %s482_s0 = inlined_call_operand.vmem [shape: bf16[32,144], index: 0, kind: input, shape index: {}]   ;;  %s483_s2 = inlined_call_operand.vmem [shape: f32[32,1], index: 2, kind: input, shape index: {}]   ;;  %s484_s3 = inlined_call_operand.vmem [shape: bf16[32,162], index: 3, kind: output, shape index: {}]  }
   0x1   :  { %v325_v0 = vld [vmem:[%s481_s1 + $0x74] ss:$8 sps:$4 sm:$0xff]   ;;  %324 = vset.pattern.permute.xlu1 %v358_v1  ;;  %323 = vset.pattern.permute.xlu0 %v358_v1  ;;  %v327_v2 = vld [vmem:[%s481_s1 + $0x70] ss:$8 sps:$4 sm:$0xff]   ;;  %v328_v3 = vld [vmem:[%s481_s1 + $0x64] ss:$8 sps:$4 sm:$0xff]  }
   0x2   :  { %176 = vmatprep.subr.bf16.mxu0 %v325_v0  ;;  %304 = vmatprep.subr.bf16.mxu1 %v325_v0  ;;  %v330_v4 = vld [vmem:[%s481_s1 + $0x60] ss:$8 sps:$4 sm:$0xff]   ;;  %v331_v5 = vld [vmem:[%s481_s1 + $0x54] ss:$8 sps:$4 sm:$0xff]   ;;  %v333_v6 = vld [vmem:[%s481_s1 + $0x50] ss:$8 sps:$4 sm:$0xff]  }
   0x3   :  { %177 = vmatpush1.bf16.msra.mxu0 %v327_v2  ;;  %313 = vmatpush1.bf16.msra.mxu1 %v327_v2  ;;  %v334_v7 = vld [vmem:[%s481_s1 + $0x44] ss:$8 sps:$4 sm:$0xff]   ;;  %v336_v8 = vld [vmem:[%s481_s1 + $0x40] ss:$8 sps:$4 sm:$0xff]   ;;  %v337_v9 = vld [vmem:[%s481_s1 + $0x34] ss:$8 sps:$4 sm:$0xff]  }
   0x4   :  { %178 = vmatprep.subr.bf16.mxu0 %v328_v3  ;;  %305 = vmatprep.subr.bf16.mxu1 %v328_v3  ;;  %v354_v10 = vld [vmem:[%s482_s0 + $0x4] ss:$8 sps:$4 sm:$0xff]   ;;  %v357_v11 = vld [vmem:[%s482_s0 + $0x14] ss:$8 sps:$4 sm:$0xff]   ;;  %v339_v12 = vld [vmem:[%s481_s1 + $0x30] ss:$8 sps:$4 sm:$0xff]  }
   0x5   :  { %v39_v13 = vld [vmem:[%s483_s2 + $0x10] sm:$0xff]  ;;  %v37_v14 = vld [vmem:[%s483_s2] sm:$0xff]  ;;  %294 = vmatprep.mubr.msk.bf16.mxu0 %vm169_vm0, %v354_v10  ;;  %295 = vmatprep.mubr.msk.bf16.mxu1 %vm169_vm0, %v357_v11  ;;  %v40_v17 = vld [vmem:[%s483_s2 + $0x18] sm:$0xff] }
   0x6   :  { %v340_v15 = vld [vmem:[%s481_s1 + $0x24] ss:$8 sps:$4 sm:$0xff]   ;;  %53 = vperm.xlu1 %324, %v39_v13   ;;  %43 = vperm.xlu0 %323, %v37_v14   ;;  %v342_v16 = vld [vmem:[%s481_s1 + $0x20] ss:$8 sps:$4 sm:$0xff]   ;;  %v343_v19 = vld [vmem:[%s481_s1 + $0x14] ss:$8 sps:$4 sm:$0xff]  }
   0x7   :  { %179 = vmatpush1.bf16.msra.mxu0 %v330_v4  ;;  %314 = vmatpush1.bf16.msra.mxu1 %v330_v4  ;;  %v38_v18 = vld [vmem:[%s483_s2 + $0x8] sm:$0xff]  ;;  %v345_v20 = vld [vmem:[%s481_s1 + $0x10] ss:$8 sps:$4 sm:$0xff]   ;;  %vm457_vm3 = vmor %vm262_vm2, %vm261_vm1 }
   0x8   :  { %180 = vmatprep.subr.bf16.mxu0 %v331_v5  ;;  %306 = vmatprep.subr.bf16.mxu1 %v331_v5  ;;  %v346_v21 = vld [vmem:[%s481_s1 + $0x4] ss:$8 sps:$4 sm:$0xff]   ;;  %v348_v22 = vld [vmem:[%s481_s1] ss:$8 sps:$4 sm:$0xff]   ;;  %v355_v26 = vld [vmem:[%s482_s0 + $0x10] ss:$8 sps:$4 sm:$0xff]  }
   0x9   :  { %v349_v23 = vld [vmem:[%s481_s1 + $0x84] ss:$8 sps:$4 sm:$0xff]   ;;  %v351_v24 = vld [vmem:[%s481_s1 + $0x80] ss:$8 sps:$4 sm:$0xff]  }
   0xa   :  { %58 = vperm.xlu1 %324, %v40_v17   ;;  %48 = vperm.xlu0 %323, %v38_v18   ;;  %v352_v25 = vld [vmem:[%s482_s0] ss:$8 sps:$4 sm:$0xff]  }
   0xb   :  { %181 = vmatpush1.bf16.msra.mxu0 %v333_v6  ;;  %315 = vmatpush1.bf16.msra.mxu1 %v333_v6 }
   0xc   :  { %182 = vmatprep.subr.bf16.mxu0 %v334_v7  ;;  %307 = vmatprep.subr.bf16.mxu1 %v334_v7 }
   0xf   :  { %183 = vmatpush1.bf16.msra.mxu0 %v336_v8  ;;  %316 = vmatpush1.bf16.msra.mxu1 %v336_v8 }
  0x10   :  { %184 = vmatprep.subr.bf16.mxu0 %v337_v9  ;;  %308 = vmatprep.subr.bf16.mxu1 %v337_v9 }
  0x13   :  { %185 = vmatpush1.bf16.msra.mxu0 %v339_v12  ;;  %317 = vmatpush1.bf16.msra.mxu1 %v339_v12 }
  0x14   :  { %186 = vmatprep.subr.bf16.mxu0 %v340_v15  ;;  %309 = vmatprep.subr.bf16.mxu1 %v340_v15 }
  0x17   :  { %187 = vmatpush1.bf16.msra.mxu0 %v342_v16  ;;  %318 = vmatpush1.bf16.msra.mxu1 %v342_v16 }
  0x18   :  { %188 = vmatprep.subr.bf16.mxu0 %v343_v19  ;;  %310 = vmatprep.subr.bf16.mxu1 %v343_v19 }
  0x1b   :  { %189 = vmatpush1.bf16.msra.mxu0 %v345_v20  ;;  %319 = vmatpush1.bf16.msra.mxu1 %v345_v20 }
  0x1c   :  { %190 = vmatprep.subr.bf16.mxu0 %v346_v21  ;;  %311 = vmatprep.subr.bf16.mxu1 %v346_v21 }
  0x1f   :  { %191 = vmatpush1.bf16.msra.mxu0 %v348_v22  ;;  %320 = vmatpush1.bf16.msra.mxu1 %v348_v22 }
  0x20   :  { %206 = vmatprep.subr.bf16.mxu0 %v349_v23  ;;  %312 = vmatprep.subr.bf16.mxu1 %v349_v23 }
  0x23   :  { %207 = vmatpush2.bf16.msra.mxu0 %v351_v24  ;;  %321 = vmatpush2.bf16.msra.mxu1 %v351_v24 }
  0x26   :  { %209 = vmatmul.mubr.bf16.vlgmr.msra.gmra.mxu0 %v352_v25  ;;  %219 = vmatmul.mubr.bf16.vlgmr.msra.gmra.mxu1 %v355_v26 }
  0x81   :  { %v54_v27 = vpop.permute.xlu1 %53  ;;  %v44_v28 = vpop.permute.xlu0 %43 }
  0x85   :  { %v59_v41 = vpop.permute.xlu1 %58  ;;  %v49_v42 = vpop.permute.xlu0 %48 }
  0xe6   :  { %v210_v29 = vpop.f32.mrf.mxu0  ;;  %v220_v30 = vpop.f32.mrf.mxu1 }
  0xe7   :  { %v211_v31 = vadd.f32 %v210_v29, %v44_v28  ;;  %v221_v32 = vadd.f32 %v220_v30, %v54_v27 }
  0xe8   :  { %v212_v33 = vpop.f32.mrf.mxu0  ;;  %v222_v34 = vpop.f32.mrf.mxu1 }
  0xe9   :  { %v213_v35 = vadd.f32 %v212_v33, %v44_v28  ;;  %v223_v36 = vadd.f32 %v222_v34, %v54_v27  ;;  %v229_v39 = vmax.f32 %v211_v31, 0.0  ;;  %v233_v40 = vmax.f32 %v221_v32, 0.0 }
  0xea   :  { %v214_v37 = vpop.f32.mrf.mxu0  ;;  %v224_v38 = vpop.f32.mrf.mxu1 }
  0xeb   :  { %v230_v43 = vmax.f32 %v213_v35, 0.0  ;;  %v234_v44 = vmax.f32 %v223_v36, 0.0  ;;  %v215_v46 = vadd.f32 %v214_v37, %v49_v42  ;;  %v225_v47 = vadd.f32 %v224_v38, %v59_v41 }
  0xec   :  { %v216_v48 = vpop.f32.mrf.mxu0  ;;  %v226_v49 = vpop.f32.mrf.mxu1 }
  0xed   :  { %v300_v50 = vpack.c.bf16 %v230_v43, %v229_v39  ;;  %v302_v51 = vpack.c.bf16 %v234_v44, %v233_v40  ;;  %v217_v52 = vadd.f32 %v216_v48, %v49_v42  ;;  %v227_v53 = vadd.f32 %v226_v49, %v59_v41 }
  0xee   :  { %v231_v54 = vmax.f32 %v215_v46, 0.0  ;;  %v235_v55 = vmax.f32 %v225_v47, 0.0 }
  0xef   :  { %264 = vst.msk [vmem:[%s484_s3] sm:$0xff] %vm457_vm3, %v300_v50  ;;  %266 = vst.msk [vmem:[%s484_s3 + $0x10] sm:$0xff] %vm457_vm3, %v302_v51  ;;  %v232_v56 = vmax.f32 %v217_v52, 0.0  ;;  %v236_v57 = vmax.f32 %v227_v53, 0.0 }
  0xf1   :  { %v301_v58 = vpack.c.bf16 %v232_v56, %v231_v54  ;;  %v303_v59 = vpack.c.bf16 %v236_v57, %v235_v55 }
  0xf3   :  { %265 = vst.msk [vmem:[%s484_s3 + $0x8] sm:$0xff] %vm457_vm3, %v301_v58  ;;  %267 = vst.msk [vmem:[%s484_s3 + $0x18] sm:$0xff] %vm457_vm3, %v303_v59 }

// kernel: vae_forward.9
= control target key start
LH: loop header
LB: loop body
LE: loop exit
PB: predicated region body
PF: predicated region fallthrough
CT: control target
= control target key end

     0   :  { %v640_v1 = vmov 0   ;;  %vm283_vm0 = vcmask 261120   ;;  %vm466_vm1 = vcmask 257024   ;;  %s811_s1 = inlined_call_operand.vmem [shape: bf16[288,32], index: 1, kind: input, shape index: {}]   ;;  %s812_s0 = inlined_call_operand.vmem [shape: bf16[64,288], index: 0, kind: input, shape index: {}]   ;;  %s813_s2 = inlined_call_operand.vmem [shape: f32[64,1], index: 2, kind: input, shape index: {}]   ;;  %s814_s3 = inlined_call_operand.vmem [shape: bf16[64,32], index: 3, kind: output, shape index: {}]  }
   0x1   :  { %v606_v0 = vld [vmem:[%s811_s1 + $0x78] sm:$0xff]   ;;  %604 = vset.pattern.permute.xlu0 %v640_v1  ;;  %605 = vset.pattern.permute.xlu1 %v640_v1  ;;  %v608_v3 = vld [vmem:[%s811_s1 + $0x70] sm:$0xff]   ;;  %v610_v5 = vld [vmem:[%s811_s1 + $0x68] sm:$0xff]  }
   0x2   :  { %v607_v2 = vld [vmem:[%s811_s1 + $0x38] sm:$0xff]   ;;  %529 = vmatprep.subr.bf16.mxu0 %v606_v0  ;;  %587 = vmatprep.subr.bf16.mxu1 %v606_v0  ;;  %v609_v4 = vld [vmem:[%s811_s1 + $0x30] sm:$0xff]   ;;  %v611_v6 = vld [vmem:[%s811_s1 + $0x28] sm:$0xff]  }
   0x3   :  { %530 = vmatpush3.bf16.msra.mxu0 %v607_v2  ;;  %595 = vmatpush3.bf16.msra.mxu1 %v607_v2  ;;  %v612_v7 = vld [vmem:[%s811_s1 + $0x60] sm:$0xff]   ;;  %v614_v9 = vld [vmem:[%s811_s1 + $0x58] sm:$0xff]   ;;  %v616_v11 = vld [vmem:[%s811_s1 + $0x50] sm:$0xff]  }
   0x4   :  { %531 = vmatprep.subr.bf16.mxu0 %v608_v3  ;;  %588 = vmatprep.subr.bf16.mxu1 %v608_v3  ;;  %v613_v8 = vld [vmem:[%s811_s1 + $0x20] sm:$0xff]   ;;  %v615_v10 = vld [vmem:[%s811_s1 + $0x18] sm:$0xff]   ;;  %v617_v14 = vld [vmem:[%s811_s1 + $0x10] sm:$0xff]  }
   0x5   :  { %v624_v12 = vld [vmem:[%s812_s0 + $0x4] ss:$12 sps:$4 sm:$0xff]   ;;  %v627_v13 = vld [vmem:[%s812_s0 + $0x4c] ss:$12 sps:$4 sm:$0xff]   ;;  %v625_v23 = vld [vmem:[%s812_s0 + $0x48] ss:$12 sps:$4 sm:$0xff]  }
   0x6   :  { %v618_v15 = vld [vmem:[%s811_s1 + $0x48] sm:$0xff]   ;;  %328 = vmatprep.mubr.bf16.mxu0 %v624_v12  ;;  %352 = vmatprep.mubr.bf16.mxu1 %v627_v13  ;;  %v620_v17 = vld [vmem:[%s811_s1 + $0x40] sm:$0xff]   ;;  %v69_v20 = vld [vmem:[%s813_s2 + $0x10] sm:$0xff] }
   0x7   :  { %532 = vmatpush3.bf16.msra.mxu0 %v609_v4  ;;  %596 = vmatpush3.bf16.msra.mxu1 %v609_v4  ;;  %v619_v16 = vld [vmem:[%s811_s1 + $0x8] sm:$0xff]   ;;  %v621_v18 = vld [vmem:[%s811_s1] sm:$0xff]   ;;  %v70_v25 = vld [vmem:[%s813_s2 + $0x18] sm:$0xff] }
   0x8   :  { %533 = vmatprep.subr.bf16.mxu0 %v610_v5  ;;  %589 = vmatprep.subr.bf16.mxu1 %v610_v5  ;;  %v67_v19 = vld [vmem:[%s813_s2] sm:$0xff]  ;;  %v628_v21 = vld [vmem:[%s811_s1 + $0x88] sm:$0xff]   ;;  %v73_v33 = vld [vmem:[%s813_s2 + $0x30] sm:$0xff] }
   0x9   :  { %v622_v22 = vld [vmem:[%s812_s0] ss:$12 sps:$4 sm:$0xff]   ;;  %77 = vperm.xlu0 %604, %v67_v19   ;;  %87 = vperm.xlu1 %605, %v69_v20   ;;  %v630_v26 = vld [vmem:[%s812_s0 + $0x1c] ss:$12 sps:$4 sm:$0xff]   ;;  %v633_v31 = vld [vmem:[%s812_s0 + $0x18] ss:$12 sps:$4 sm:$0xff]  }
   0xa   :  { %v68_v24 = vld [vmem:[%s813_s2 + $0x8] sm:$0xff]  ;;  %v629_v27 = vld [vmem:[%s811_s1 + $0x80] sm:$0xff]   ;;  %v74_v34 = vld [vmem:[%s813_s2 + $0x38] sm:$0xff] }
   0xb   :  { %534 = vmatpush3.bf16.msra.mxu0 %v611_v6  ;;  %597 = vmatpush3.bf16.msra.mxu1 %v611_v6  ;;  %v632_v28 = vld [vmem:[%s812_s0 + $0x8] ss:$12 sps:$4 sm:$0xff]   ;;  %v71_v29 = vld [vmem:[%s813_s2 + $0x20] sm:$0xff]  ;;  %v638_v37 = vld [vmem:[%s812_s0 + $0x30] ss:$12 sps:$4 sm:$0xff]  }
   0xc   :  { %535 = vmatprep.subr.bf16.mxu0 %v612_v7  ;;  %590 = vmatprep.subr.bf16.mxu1 %v612_v7  ;;  %v72_v30 = vld [vmem:[%s813_s2 + $0x28] sm:$0xff]  ;;  %v635_v35 = vld [vmem:[%s812_s0 + $0x34] ss:$12 sps:$4 sm:$0xff]   ;;  %v637_v36 = vld [vmem:[%s812_s0 + $0x38] ss:$12 sps:$4 sm:$0xff]  }
   0xd   :  { %82 = vperm.xlu0 %604, %v68_v24   ;;  %92 = vperm.xlu1 %605, %v70_v25   ;;  %v634_v32 = vld [vmem:[%s812_s0 + $0x20] ss:$12 sps:$4 sm:$0xff]   ;;  %v639_v38 = vld [vmem:[%s812_s0 + $0x50] ss:$12 sps:$4 sm:$0xff]  }
   0xf   :  { %536 = vmatpush3.bf16.msra.mxu0 %v613_v8  ;;  %598 = vmatpush3.bf16.msra.mxu1 %v613_v8 }
  0x10   :  { %537 = vmatprep.subr.bf16.mxu0 %v614_v9  ;;  %591 = vmatprep.subr.bf16.mxu1 %v614_v9 }
  0x11   :  { %97 = vperm.xlu0 %604, %v71_v29   ;;  %102 = vperm.xlu1 %605, %v72_v30  }
  0x13   :  { %538 = vmatpush3.bf16.msra.mxu0 %v615_v10  ;;  %599 = vmatpush3.bf16.msra.mxu1 %v615_v10 }
  0x14   :  { %539 = vmatprep.subr.bf16.mxu0 %v616_v11  ;;  %592 = vmatprep.subr.bf16.mxu1 %v616_v11 }
  0x15   :  { %107 = vperm.xlu0 %604, %v73_v33   ;;  %112 = vperm.xlu1 %605, %v74_v34  }
  0x17   :  { %540 = vmatpush3.bf16.msra.mxu0 %v617_v14  ;;  %600 = vmatpush3.bf16.msra.mxu1 %v617_v14 }
  0x18   :  { %541 = vmatprep.subr.bf16.mxu0 %v618_v15  ;;  %593 = vmatprep.subr.bf16.mxu1 %v618_v15 }
  0x1b   :  { %542 = vmatpush3.bf16.msra.mxu0 %v619_v16  ;;  %601 = vmatpush3.bf16.msra.mxu1 %v619_v16 }
  0x1c   :  { %543 = vmatprep.subr.bf16.mxu0 %v620_v17  ;;  %594 = vmatprep.subr.bf16.mxu1 %v620_v17 }
  0x1f   :  { %544 = vmatpush3.bf16.msra.mxu0 %v621_v18  ;;  %602 = vmatpush3.bf16.msra.mxu1 %v621_v18 }
  0x20   :  { %575 = vmatprep.subr.bf16.mxu1 %v628_v21 }
  0x22   :  { %329 = vmatmul.mubr.bf16.vlgmr.msra.gmra.mxu0 %v622_v22  ;;  %353 = vmatmul.mubr.bf16.vlgmr.msra.gmra.mxu1 %v625_v23 }
  0x23   :  { %576 = vmatpush3.bf16.msra.mxu1 %v628_v21  ;;  %336 = vmatprep.mubr.bf16.mxu0 %v630_v26 }
  0x24   :  { %577 = vmatprep.subr.bf16.mxu1 %v629_v27  ;;  %579 = vmatprep.mubr.msk.bf16.mxu1 %vm283_vm0, %v632_v28 }
  0x27   :  { %578 = vmatpush3.bf16.msra.mxu1 %v629_v27 }
  0x2a   :  { %337 = vmatmul.mubr.bf16.gmra.mxu0 %v633_v31  ;;  %580 = vmatmul.mubr.msk.bf16.vlgmr.msra.gmra.mxu1 %vm283_vm0, %v634_v32 }
  0x2b   :  { %344 = vmatprep.mubr.bf16.mxu0 %v635_v35  ;;  %583 = vmatprep.mubr.msk.bf16.mxu1 %vm283_vm0, %v637_v36 }
  0x32   :  { %345 = vmatmul.mubr.bf16.gmra.mxu0 %v638_v37  ;;  %584 = vmatmul.mubr.msk.bf16.gmra.mxu1 %vm283_vm0, %v639_v38 }
  0x84   :  { %v78_v39 = vpop.permute.xlu0 %77  ;;  %v88_v40 = vpop.permute.xlu1 %87 }
  0x88   :  { %v83_v41 = vpop.permute.xlu0 %82  ;;  %v93_v46 = vpop.permute.xlu1 %92 }
  0x8c   :  { %v98_v49 = vpop.permute.xlu0 %97  ;;  %v103_v55 = vpop.permute.xlu1 %102 }
  0x90   :  { %v108_v61 = vpop.permute.xlu0 %107  ;;  %v113_v9 = vpop.permute.xlu1 %112 }
  0xe2   :  { %v545_v42 = vpop.f32.mrf.mxu0  ;;  %v563_v43 = vpop.f32.mrf.mxu1 }
  0xe4   :  { %v546_v44 = vpop.f32.mrf.mxu0  ;;  %v564_v45 = vpop.f32.mrf.mxu1 }
  0xe5   :  { %v547_v50 = vadd.f32 %v546_v44, %v545_v42  ;;  %v565_v58 = vadd.f32 %v564_v45, %v563_v43 }
  0xe6   :  { %v548_v47 = vpop.f32.mrf.mxu0  ;;  %v566_v48 = vpop.f32.mrf.mxu1 }
  0xe7   :  { %v331_v57 = vadd.f32 %v547_v50, %v78_v39  ;;  %v355_v5 = vadd.f32 %v565_v58, %v108_v61 }
  0xe8   :  { %v549_v51 = vpop.f32.mrf.mxu0  ;;  %v567_v52 = vpop.f32.mrf.mxu1 }
  0xe9   :  { %v550_v56 = vadd.f32 %v549_v51, %v548_v47  ;;  %v568_v6 = vadd.f32 %v567_v52, %v566_v48 }
  0xea   :  { %v551_v53 = vpop.f32.mrf.mxu0  ;;  %v581_v54 = vpop.f32.mrf.mxu1 }
  0xeb   :  { %v334_v4 = vadd.f32 %v550_v56, %v83_v41  ;;  %v358_v20 = vadd.f32 %v568_v6, %v113_v9 }
  0xec   :  { %v552_v59 = vpop.f32.mrf.mxu0  ;;  %v395_v60 = vpop.f32.mrf.mxu1 }
  0xed   :  { %v553_v62 = vadd.f32 %v552_v59, %v551_v53  ;;  %v396_v63 = vadd.f32 %v395_v60, %v331_v57 }
  0xee   :  { %v554_v0 = vpop.f32.mrf.mxu0  ;;  %v582_v1 = vpop.f32.mrf.mxu1 }
  0xef   :  { %v339_v2 = vadd.f32 %v553_v62, %v88_v40  ;;  %v426_v3 = vmax.f32 %v396_v63, 0.0 }
  0xf0   :  { %v555_v7 = vpop.f32.mrf.mxu0  ;;  %v398_v8 = vpop.f32.mrf.mxu1 }
  0xf1   :  { %v404_v10 = vadd.f32 %v581_v54, %v339_v2  ;;  %v521_v11 = vpack.c.bf16 %v426_v3, %v426_v3  ;;  %v556_v12 = vadd.f32 %v555_v7, %v554_v0  ;;  %v399_v13 = vadd.f32 %v398_v8, %v334_v4 }
  0xf2   :  { %v557_v14 = vpop.f32.mrf.mxu0  ;;  %v585_v15 = vpop.f32.mrf.mxu1 }
  0xf3   :  { %v428_v16 = vmax.f32 %v404_v10, 0.0  ;;  %467 = vst.msk [vmem:[%s814_s3] sm:$0xf] %vm466_vm1, %v521_v11  ;;  %v342_v17 = vadd.f32 %v556_v12, %v93_v46  ;;  %v427_v18 = vmax.f32 %v399_v13, 0.0  ;;  %v420_v19 = vadd.f32 %v585_v15, %v355_v5 }
  0xf4   :  { %v558_v21 = vpop.f32.mrf.mxu0  ;;  %v411_v22 = vpop.f32.mrf.mxu1 }
  0xf5   :  { %v523_v23 = vpack.c.bf16 %v428_v16, %v428_v16  ;;  %v407_v24 = vadd.f32 %v582_v1, %v342_v17  ;;  %v522_v25 = vpack.c.bf16 %v427_v18, %v427_v18  ;;  %v432_v26 = vmax.f32 %v420_v19, 0.0 }
  0xf6   :  { %v559_v27 = vadd.f32 %v558_v21, %v557_v14  ;;  %v560_v28 = vpop.f32.mrf.mxu0  ;;  %v586_v29 = vpop.f32.mrf.mxu1 }
  0xf7   :  { %469 = vst.msk [vmem:[%s814_s3 + $0x8] sm:$0xf] %vm466_vm1, %v523_v23  ;;  %v429_v30 = vmax.f32 %v407_v24, 0.0  ;;  %468 = vst.msk [vmem:[%s814_s3 + $0x4] sm:$0xf] %vm466_vm1, %v522_v25  ;;  %v527_v31 = vpack.c.bf16 %v432_v26, %v432_v26  ;;  %v423_v32 = vadd.f32 %v586_v29, %v358_v20 }
  0xf8   :  { %v347_v33 = vadd.f32 %v559_v27, %v98_v49  ;;  %v561_v34 = vpop.f32.mrf.mxu0  ;;  %v414_v42 = vpop.f32.mrf.mxu1 }
  0xf9   :  { %v524_v35 = vpack.c.bf16 %v429_v30, %v429_v30  ;;  %473 = vst.msk [vmem:[%s814_s3 + $0x18] sm:$0xf] %vm466_vm1, %v527_v31  ;;  %v433_v36 = vmax.f32 %v423_v32, 0.0  ;;  %v562_v37 = vadd.f32 %v561_v34, %v560_v28 }
  0xfa   :  { %v412_v38 = vadd.f32 %v411_v22, %v347_v33 }
  0xfb   :  { %470 = vst.msk [vmem:[%s814_s3 + $0xc] sm:$0xf] %vm466_vm1, %v524_v35  ;;  %v528_v39 = vpack.c.bf16 %v433_v36, %v433_v36  ;;  %v350_v40 = vadd.f32 %v562_v37, %v103_v55 }
  0xfc   :  { %v430_v41 = vmax.f32 %v412_v38, 0.0 }
  0xfd   :  { %474 = vst.msk [vmem:[%s814_s3 + $0x1c] sm:$0xf] %vm466_vm1, %v528_v39  ;;  %v415_v43 = vadd.f32 %v414_v42, %v350_v40 }
  0xfe   :  { %v525_v44 = vpack.c.bf16 %v430_v41, %v430_v41 }
  0xff   :  { %v431_v45 = vmax.f32 %v415_v43, 0.0 }
 0x100   :  { %471 = vst.msk [vmem:[%s814_s3 + $0x10] sm:$0xf] %vm466_vm1, %v525_v44 }
 0x101   :  { %v526_v46 = vpack.c.bf16 %v431_v45, %v431_v45 }
 0x103   :  { %472 = vst.msk [vmem:[%s814_s3 + $0x14] sm:$0xf] %vm466_vm1, %v526_v46 }

// kernel: vae_forward.11
= control target key start
LH: loop header
LB: loop body
LE: loop exit
PB: predicated region body
PF: predicated region fallthrough
CT: control target
= control target key end

     0   :  { %v755_v1 = vmov 0   ;;  %vm389_vm0 = vcmask 523264   ;;  %vm563_vm1 = vcmask 404480   ;;  %s944_s1 = inlined_call_operand.vmem [shape: bf16[576,50], index: 1, kind: input, shape index: {}]   ;;  %s945_s0 = inlined_call_operand.vmem [shape: bf16[32,576], index: 0, kind: input, shape index: {}]   ;;  %s946_s2 = inlined_call_operand.vmem [shape: f32[32,1], index: 2, kind: input, shape index: {}]   ;;  %s947_s3 = inlined_call_operand.vmem [shape: bf16[32,50], index: 3, kind: output, shape index: {}]  }
   0x1   :  { %v705_v0 = vld [vmem:[%s944_s1 + $0x78] sm:$0xff]   ;;  %703 = vset.pattern.permute.xlu0 %v755_v1  ;;  %704 = vset.pattern.permute.xlu1 %v755_v1  ;;  %v709_v5 = vld [vmem:[%s944_s1 + $0x70] sm:$0xff]   ;;  %v713_v9 = vld [vmem:[%s944_s1 + $0x68] sm:$0xff]  }
   0x2   :  { %v706_v2 = vld [vmem:[%s944_s1 + $0xf8] sm:$0xff]   ;;  %628 = vmatprep.subr.bf16.mxu0 %v705_v0  ;;  %v710_v6 = vld [vmem:[%s944_s1 + $0xf0] sm:$0xff]   ;;  %v714_v10 = vld [vmem:[%s944_s1 + $0xe8] sm:$0xff]  }
   0x3   :  { %v707_v3 = vld [vmem:[%s944_s1 + $0x38] sm:$0xff]   ;;  %656 = vmatprep.subr.bf16.mxu1 %v706_v2  ;;  %v711_v7 = vld [vmem:[%s944_s1 + $0x30] sm:$0xff]   ;;  %v715_v11 = vld [vmem:[%s944_s1 + $0x28] sm:$0xff]  }
   0x4   :  { %v708_v4 = vld [vmem:[%s944_s1 + $0xb8] sm:$0xff]   ;;  %629 = vmatpush3.bf16.msra.mxu0 %v707_v3  ;;  %v712_v8 = vld [vmem:[%s944_s1 + $0xb0] sm:$0xff]   ;;  %v716_v12 = vld [vmem:[%s944_s1 + $0xa8] sm:$0xff]  }
   0x5   :  { %657 = vmatpush3.bf16.msra.mxu1 %v708_v4  ;;  %630 = vmatprep.subr.bf16.mxu0 %v709_v5  ;;  %v717_v13 = vld [vmem:[%s944_s1 + $0x60] sm:$0xff]   ;;  %v721_v17 = vld [vmem:[%s944_s1 + $0x58] sm:$0xff]   ;;  %v725_v21 = vld [vmem:[%s944_s1 + $0x50] sm:$0xff]  }
   0x6   :  { %658 = vmatprep.subr.bf16.mxu1 %v710_v6  ;;  %v718_v14 = vld [vmem:[%s944_s1 + $0xe0] sm:$0xff]   ;;  %v722_v18 = vld [vmem:[%s944_s1 + $0xd8] sm:$0xff]   ;;  %v726_v22 = vld [vmem:[%s944_s1 + $0xd0] sm:$0xff]  }
   0x7   :  { %v719_v15 = vld [vmem:[%s944_s1 + $0x20] sm:$0xff]   ;;  %v723_v19 = vld [vmem:[%s944_s1 + $0x18] sm:$0xff]   ;;  %v727_v23 = vld [vmem:[%s944_s1 + $0x10] sm:$0xff]  }
   0x8   :  { %631 = vmatpush3.bf16.msra.mxu0 %v711_v7  ;;  %v720_v16 = vld [vmem:[%s944_s1 + $0xa0] sm:$0xff]   ;;  %v724_v20 = vld [vmem:[%s944_s1 + $0x98] sm:$0xff]   ;;  %v728_v24 = vld [vmem:[%s944_s1 + $0x90] sm:$0xff]  }
   0x9   :  { %659 = vmatpush3.bf16.msra.mxu1 %v712_v8  ;;  %632 = vmatprep.subr.bf16.mxu0 %v713_v9  ;;  %v729_v25 = vld [vmem:[%s944_s1 + $0x48] sm:$0xff]   ;;  %v733_v29 = vld [vmem:[%s944_s1 + $0x40] sm:$0xff]   ;;  %v743_v37 = vld [vmem:[%s944_s1 + $0x118] sm:$0xff]  }
   0xa   :  { %660 = vmatprep.subr.bf16.mxu1 %v714_v10  ;;  %v730_v26 = vld [vmem:[%s944_s1 + $0xc8] sm:$0xff]   ;;  %v734_v30 = vld [vmem:[%s944_s1 + $0xc0] sm:$0xff]   ;;  %v744_v38 = vld [vmem:[%s944_s1 + $0x110] sm:$0xff]  }
   0xb   :  { %v731_v27 = vld [vmem:[%s944_s1 + $0x8] sm:$0xff]   ;;  %v735_v31 = vld [vmem:[%s944_s1] sm:$0xff]   ;;  %v101_v47 = vld [vmem:[%s946_s2 + $0x10] sm:$0xff] }
   0xc   :  { %633 = vmatpush3.bf16.msra.mxu0 %v715_v11  ;;  %v732_v28 = vld [vmem:[%s944_s1 + $0x88] sm:$0xff]   ;;  %v736_v32 = vld [vmem:[%s944_s1 + $0x80] sm:$0xff]   ;;  %115 = vperm.xlu1 %704, %v101_v47   ;;  %v102_v49 = vld [vmem:[%s946_s2 + $0x18] sm:$0xff] }
   0xd   :  { %661 = vmatpush3.bf16.msra.mxu1 %v716_v12  ;;  %634 = vmatprep.subr.bf16.mxu0 %v717_v13  ;;  %v737_v33 = vld [vmem:[%s945_s0] ss:$20 sps:$4 sm:$0xff]   ;;  %v739_v34 = vld [vmem:[%s945_s0 + $0x4] ss:$20 sps:$4 sm:$0xff]   ;;  %v740_v35 = vld [vmem:[%s945_s0 + $0x8] ss:$20 sps:$4 sm:$0xff]  }
   0xe   :  { %662 = vmatprep.subr.bf16.mxu1 %v718_v14  ;;  %v742_v36 = vld [vmem:[%s945_s0 + $0xc] ss:$20 sps:$4 sm:$0xff]   ;;  %428 = vmatprep.mubr.bf16.mxu0 %v739_v34  ;;  %v747_v40 = vld [vmem:[%s945_s0 + $0x34] ss:$20 sps:$4 sm:$0xff]   ;;  %v750_v43 = vld [vmem:[%s945_s0 + $0x30] ss:$20 sps:$4 sm:$0xff]  }
   0xf   :  { %477 = vmatprep.mubr.bf16.mxu1 %v742_v36  ;;  %v745_v39 = vld [vmem:[%s945_s0 + $0x2c] ss:$20 sps:$4 sm:$0xff]   ;;  %v749_v41 = vld [vmem:[%s945_s0 + $0x28] ss:$20 sps:$4 sm:$0xff]   ;;  %v753_v44 = vld [vmem:[%s945_s0 + $0x10] ss:$20 sps:$4 sm:$0xff]  }
  0x10   :  { %635 = vmatpush3.bf16.msra.mxu0 %v719_v15  ;;  %v751_v42 = vld [vmem:[%s944_s1 + $0x108] sm:$0xff]   ;;  %v752_v45 = vld [vmem:[%s944_s1 + $0x100] sm:$0xff]   ;;  %120 = vperm.xlu1 %704, %v102_v49  }
  0x11   :  { %663 = vmatpush3.bf16.msra.mxu1 %v720_v16  ;;  %636 = vmatprep.subr.bf16.mxu0 %v721_v17  ;;  %v99_v46 = vld [vmem:[%s946_s2] sm:$0xff]  ;;  %v100_v48 = vld [vmem:[%s946_s2 + $0x8] sm:$0xff] }
  0x12   :  { %664 = vmatprep.subr.bf16.mxu1 %v722_v18  ;;  %105 = vperm.xlu0 %703, %v99_v46   ;;  %v754_v50 = vld [vmem:[%s945_s0 + $0x38] ss:$20 sps:$4 sm:$0xff]  }
  0x14   :  { %637 = vmatpush3.bf16.msra.mxu0 %v723_v19 }
  0x15   :  { %665 = vmatpush3.bf16.msra.mxu1 %v724_v20  ;;  %638 = vmatprep.subr.bf16.mxu0 %v725_v21 }
  0x16   :  { %666 = vmatprep.subr.bf16.mxu1 %v726_v22  ;;  %110 = vperm.xlu0 %703, %v100_v48  }
  0x18   :  { %639 = vmatpush3.bf16.msra.mxu0 %v727_v23 }
  0x19   :  { %667 = vmatpush3.bf16.msra.mxu1 %v728_v24  ;;  %640 = vmatprep.subr.bf16.mxu0 %v729_v25 }
  0x1a   :  { %668 = vmatprep.subr.bf16.mxu1 %v730_v26 }
  0x1c   :  { %641 = vmatpush3.bf16.msra.mxu0 %v731_v27 }
  0x1d   :  { %669 = vmatpush3.bf16.msra.mxu1 %v732_v28  ;;  %642 = vmatprep.subr.bf16.mxu0 %v733_v29 }
  0x1e   :  { %670 = vmatprep.subr.bf16.mxu1 %v734_v30 }
  0x20   :  { %643 = vmatpush3.bf16.msra.mxu0 %v735_v31 }
  0x21   :  { %671 = vmatpush3.bf16.msra.mxu1 %v736_v32  ;;  %690 = vmatprep.subr.bf16.mxu0 %v743_v37 }
  0x23   :  { %429 = vmatmul.mubr.bf16.vlgmr.msra.gmra.mxu0 %v737_v33 }
  0x24   :  { %478 = vmatmul.mubr.bf16.vlgmr.msra.gmra.mxu1 %v740_v35  ;;  %691 = vmatpush3.bf16.msra.mxu0 %v743_v37 }
  0x25   :  { %692 = vmatprep.subr.bf16.mxu0 %v744_v38  ;;  %436 = vmatprep.mubr.bf16.mxu0 %v745_v39 }
  0x26   :  { %485 = vmatprep.mubr.bf16.mxu1 %v747_v40 }
  0x28   :  { %693 = vmatpush3.bf16.msra.mxu0 %v744_v38 }
  0x29   :  { %694 = vmatprep.subr.bf16.mxu0 %v751_v42 }
  0x2b   :  { %437 = vmatmul.mubr.bf16.gmra.mxu0 %v749_v41 }
  0x2c   :  { %486 = vmatmul.mubr.bf16.gmra.mxu1 %v750_v43  ;;  %698 = vmatprep.mubr.msk.bf16.mxu0 %vm389_vm0, %v753_v44 }
  0x2d   :  { %695 = vmatpush3.bf16.msra.mxu0 %v751_v42 }
  0x2e   :  { %696 = vmatprep.subr.bf16.mxu0 %v752_v45 }
  0x31   :  { %697 = vmatpush3.bf16.msra.mxu0 %v752_v45 }
  0x34   :  { %699 = vmatmul.mubr.msk.bf16.vlgmr.msra.gmra.mxu0 %vm389_vm0, %v754_v50 }
  0x87   :  { %v116_v0 = vpop.permute.xlu1 %115 }
  0x8b   :  { %v121_v15 = vpop.permute.xlu1 %120 }
  0x8d   :  { %v106_v60 = vpop.permute.xlu0 %105 }
  0x91   :  { %v111_v11 = vpop.permute.xlu0 %110 }
  0xe3   :  { %v644_v51 = vpop.f32.mrf.mxu0 }
  0xe4   :  { %v672_v52 = vpop.f32.mrf.mxu1 }
  0xe5   :  { %v645_v53 = vpop.f32.mrf.mxu0 }
  0xe6   :  { %v673_v54 = vpop.f32.mrf.mxu1  ;;  %v646_v62 = vadd.f32 %v645_v53, %v644_v51 }
  0xe7   :  { %v647_v55 = vpop.f32.mrf.mxu0  ;;  %v674_v7 = vadd.f32 %v673_v54, %v672_v52 }
  0xe8   :  { %v675_v56 = vpop.f32.mrf.mxu1  ;;  %v431_v8 = vadd.f32 %v646_v62, %v106_v60 }
  0xe9   :  { %v648_v57 = vpop.f32.mrf.mxu0 }
  0xea   :  { %v676_v58 = vpop.f32.mrf.mxu1  ;;  %v649_v9 = vadd.f32 %v648_v57, %v647_v55  ;;  %v480_v21 = vadd.f32 %v674_v7, %v431_v8 }
  0xeb   :  { %v650_v59 = vpop.f32.mrf.mxu0  ;;  %v677_v24 = vadd.f32 %v676_v58, %v675_v56 }
  0xec   :  { %v678_v61 = vpop.f32.mrf.mxu1  ;;  %v434_v19 = vadd.f32 %v649_v9, %v111_v11 }
  0xed   :  { %v651_v63 = vpop.f32.mrf.mxu0 }
  0xee   :  { %v652_v1 = vadd.f32 %v651_v63, %v650_v59  ;;  %v679_v2 = vpop.f32.mrf.mxu1  ;;  %v483_v31 = vadd.f32 %v677_v24, %v434_v19 }
  0xef   :  { %v680_v3 = vadd.f32 %v679_v2, %v678_v61  ;;  %v653_v4 = vpop.f32.mrf.mxu0 }
  0xf0   :  { %v439_v5 = vadd.f32 %v652_v1, %v116_v0  ;;  %v681_v6 = vpop.f32.mrf.mxu1 }
  0xf1   :  { %v654_v10 = vpop.f32.mrf.mxu0 }
  0xf2   :  { %v655_v12 = vadd.f32 %v654_v10, %v653_v4  ;;  %v682_v13 = vpop.f32.mrf.mxu1  ;;  %v488_v14 = vadd.f32 %v680_v3, %v439_v5 }
  0xf3   :  { %v683_v16 = vadd.f32 %v682_v13, %v681_v6 }
  0xf4   :  { %v442_v17 = vadd.f32 %v655_v12, %v121_v15  ;;  %v700_v18 = vpop.f32.mrf.mxu0 }
  0xf5   :  { %v537_v20 = vadd.f32 %v700_v18, %v488_v14 }
  0xf6   :  { %v528_v22 = vpop.f32.mrf.mxu0  ;;  %v491_v23 = vadd.f32 %v683_v16, %v442_v17 }
  0xf7   :  { %v545_v25 = vmax.f32 %v537_v20, 0.0  ;;  %v529_v26 = vadd.f32 %v528_v22, %v480_v21 }
  0xf8   :  { %v701_v27 = vpop.f32.mrf.mxu0 }
  0xf9   :  { %v626_v28 = vpack.c.bf16 %v545_v25, %v545_v25  ;;  %v543_v29 = vmax.f32 %v529_v26, 0.0  ;;  %v540_v30 = vadd.f32 %v701_v27, %v491_v23 }
  0xfa   :  { %v531_v32 = vpop.f32.mrf.mxu0 }
  0xfb   :  { %566 = vst.msk [vmem:[%s947_s3 + $0x8] sm:$0xf] %vm563_vm1, %v626_v28  ;;  %v624_v33 = vpack.c.bf16 %v543_v29, %v543_v29  ;;  %v546_v34 = vmax.f32 %v540_v30, 0.0  ;;  %v532_v35 = vadd.f32 %v531_v32, %v483_v31 }
  0xfd   :  { %564 = vst.msk [vmem:[%s947_s3] sm:$0xf] %vm563_vm1, %v624_v33  ;;  %v627_v36 = vpack.c.bf16 %v546_v34, %v546_v34  ;;  %v544_v37 = vmax.f32 %v532_v35, 0.0 }
  0xff   :  { %567 = vst.msk [vmem:[%s947_s3 + $0xc] sm:$0xf] %vm563_vm1, %v627_v36  ;;  %v625_v38 = vpack.c.bf16 %v544_v37, %v544_v37 }
 0x101   :  { %565 = vst.msk [vmem:[%s947_s3 + $0x4] sm:$0xf] %vm563_vm1, %v625_v38 }

// kernel: vae_forward.10
= control target key start
LH: loop header
LB: loop body
LE: loop exit
PB: predicated region body
PF: predicated region fallthrough
CT: control target
= control target key end

     0   :  { %18 = vsyncpa [#allocation3], 0  ;;  %v182_v28 = vlaneseq  ;;  %v5778_v36 = vmov 1966171168   ;;  %s7456_s0 = inlined_call_operand.vmem [shape: bf16[2,1024], index: 0, kind: input, shape index: {}]   ;;  %s7457_s1 = inlined_call_operand.vmem [shape: f32[2,32], index: 1, kind: input, shape index: {}]   ;;  %s7458_s2 = inlined_call_operand.vmem [shape: bf16[1024,32], index: 2, kind: input, shape index: {}]   ;;  %s7459_s3 = inlined_call_operand.vmem [shape: f32[1,32], index: 3, kind: input, shape index: {}]   ;;  %s7460_s4 = inlined_call_operand.vmem [shape: bf16[1024,32], index: 4, kind: input, shape index: {}]   ;;  %s7461_s5 = inlined_call_operand.vmem [shape: f32[1,32], index: 5, kind: input, shape index: {}]   ;;  %s7462_s6 = inlined_call_operand.vmem [shape: bf16[32,1024], index: 6, kind: input, shape index: {}]   ;;  %s7463_s7 = inlined_call_operand.vmem [shape: f32[1,1024], index: 7, kind: input, shape index: {}]   ;;  %s7464_s8 = inlined_call_operand.vmem [shape: bf16[1024,576], index: 8, kind: input, shape index: {}]   ;;  %s7465_s9 = inlined_call_operand.vmem [shape: f32[1,576], index: 9, kind: input, shape index: {}]   ;;  %s7466_s10 = inlined_call_operand.hbm [shape: f32[2,32], index: 10, kind: output, shape index: {0}]   ;;  %s7467_s11 = inlined_call_operand.hbm [shape: f32[2,32], index: 11, kind: output, shape index: {1}]   ;;  %s7468_s12 = inlined_call_operand.vmem [shape: f32[2,576], index: 12, kind: output, shape index: {2}]  }
   0x1   :  { %v5155_v0 = vld [vmem:[%s7458_s2 + $0x78] sm:$0xff]   ;;  %v5159_v4 = vld [vmem:[%s7458_s2 + $0x70] sm:$0xff]   ;;  %v5163_v8 = vld [vmem:[%s7458_s2 + $0x68] sm:$0xff]   ;;  %v180_v37 = vunpack.c.l.s4 %v5778_v36 }
   0x2   :  { %v5156_v1 = vld [vmem:[%s7458_s2 + $0xf8] sm:$0xff]   ;;  %4886 = vmatprep.subr.bf16.mxu0 %v5155_v0  ;;  %v5160_v5 = vld [vmem:[%s7458_s2 + $0xf0] sm:$0xff]   ;;  %v5164_v9 = vld [vmem:[%s7458_s2 + $0xe8] sm:$0xff]   ;;  %v5944_v33 = vshrl.u32 %v182_v28, 7 }
   0x3   :  { %v5157_v2 = vld [vmem:[%s7458_s2 + $0x38] sm:$0xff]   ;;  %4908 = vmatprep.subr.bf16.mxu1 %v5156_v1  ;;  %v5161_v6 = vld [vmem:[%s7458_s2 + $0x30] sm:$0xff]   ;;  %v5165_v10 = vld [vmem:[%s7458_s2 + $0x28] sm:$0xff]   ;;  %v181_v39 = vunpack.c.0.s8 %v180_v37 }
   0x4   :  { %v5158_v3 = vld [vmem:[%s7458_s2 + $0xb8] sm:$0xff]   ;;  %4887 = vmatpush3.bf16.msra.mxu0 %v5157_v2  ;;  %v5162_v7 = vld [vmem:[%s7458_s2 + $0xb0] sm:$0xff]   ;;  %v5166_v11 = vld [vmem:[%s7458_s2 + $0xa8] sm:$0xff]  }
   0x5   :  { %4909 = vmatpush3.bf16.msra.mxu1 %v5158_v3  ;;  %4888 = vmatprep.subr.bf16.mxu0 %v5159_v4  ;;  %v5167_v12 = vld [vmem:[%s7458_s2 + $0x60] sm:$0xff]   ;;  %v5171_v16 = vld [vmem:[%s7458_s2 + $0x58] sm:$0xff]   ;;  %v5175_v20 = vld [vmem:[%s7458_s2 + $0x50] sm:$0xff]   ;;  %v5956_v41 = vsub.s32 %v181_v39, %v5944_v33 }
   0x6   :  { %4910 = vmatprep.subr.bf16.mxu1 %v5160_v5  ;;  %v5168_v13 = vld [vmem:[%s7458_s2 + $0xe0] sm:$0xff]   ;;  %v5172_v17 = vld [vmem:[%s7458_s2 + $0xd8] sm:$0xff]   ;;  %v5176_v21 = vld [vmem:[%s7458_s2 + $0xd0] sm:$0xff]  }
   0x7   :  { %v5169_v14 = vld [vmem:[%s7458_s2 + $0x20] sm:$0xff]   ;;  %v5173_v18 = vld [vmem:[%s7458_s2 + $0x18] sm:$0xff]   ;;  %v5177_v22 = vld [vmem:[%s7458_s2 + $0x10] sm:$0xff]  }
   0x8   :  { %4889 = vmatpush3.bf16.msra.mxu0 %v5161_v6  ;;  %v5170_v15 = vld [vmem:[%s7458_s2 + $0xa0] sm:$0xff]   ;;  %v5174_v19 = vld [vmem:[%s7458_s2 + $0x98] sm:$0xff]   ;;  %v5178_v23 = vld [vmem:[%s7458_s2 + $0x90] sm:$0xff]  }
   0x9   :  { %4911 = vmatpush3.bf16.msra.mxu1 %v5162_v7  ;;  %4890 = vmatprep.subr.bf16.mxu0 %v5163_v8  ;;  %v5179_v24 = vld [vmem:[%s7458_s2 + $0x48] sm:$0xff]   ;;  %v5183_v29 = vld [vmem:[%s7458_s2 + $0x40] sm:$0xff]   ;;  %v5187_v35 = vld [vmem:[%s7458_s2 + $0x178] sm:$0xff]  }
   0xa   :  { %4912 = vmatprep.subr.bf16.mxu1 %v5164_v9  ;;  %v5180_v25 = vld [vmem:[%s7458_s2 + $0xc8] sm:$0xff]   ;;  %v5184_v30 = vld [vmem:[%s7458_s2 + $0xc0] sm:$0xff]   ;;  %v5188_v38 = vld [vmem:[%s7458_s2 + $0x1f8] sm:$0xff]  }
   0xb   :  { %v5181_v26 = vld [vmem:[%s7458_s2 + $0x8] sm:$0xff]   ;;  %v5185_v31 = vld [vmem:[%s7458_s2] sm:$0xff]   ;;  %v5189_v47 = vld [vmem:[%s7458_s2 + $0x138] sm:$0xff]  }
   0xc   :  { %4891 = vmatpush3.bf16.msra.mxu0 %v5165_v10  ;;  %v5182_v27 = vld [vmem:[%s7458_s2 + $0x88] sm:$0xff]   ;;  %v5186_v32 = vld [vmem:[%s7458_s2 + $0x80] sm:$0xff]   ;;  %v5190_v49 = vld [vmem:[%s7458_s2 + $0x1b8] sm:$0xff]  }
   0xd   :  { %4913 = vmatpush3.bf16.msra.mxu1 %v5166_v11  ;;  %4892 = vmatprep.subr.bf16.mxu0 %v5167_v12  ;;  %v41_v34 = vld [vmem:[%s7456_s0] sm:$0xff]  ;;  %v5191_v52 = vld [vmem:[%s7458_s2 + $0x170] sm:$0xff]   ;;  %v5195_v58 = vld [vmem:[%s7458_s2 + $0x168] sm:$0xff]  }
   0xe   :  { %4914 = vmatprep.subr.bf16.mxu1 %v5168_v13  ;;  %v178_v40 = vcombine.high %v41_v34, %v41_v34  ;;  %v185_v42 = vrot.slane %v41_v34, %v5956_v41  ;;  %v5192_v54 = vld [vmem:[%s7458_s2 + $0x1f0] sm:$0xff]   ;;  %v5196_v59 = vld [vmem:[%s7458_s2 + $0x1e8] sm:$0xff]   ;;  %v5199_v62 = vld [vmem:[%s7458_s2 + $0x160] sm:$0xff]  }
   0xf   :  { %v5193_v55 = vld [vmem:[%s7458_s2 + $0x130] sm:$0xff]   ;;  %v5197_v60 = vld [vmem:[%s7458_s2 + $0x128] sm:$0xff]   ;;  %v5200_v63 = vld [vmem:[%s7458_s2 + $0x1e0] sm:$0xff]  }
  0x10   :  { %4893 = vmatpush3.bf16.msra.mxu0 %v5169_v14  ;;  %v5960_v43 = vrot.slane %v178_v40, %v5956_v41  ;;  %v193_v44 = vcombine.high %v185_v42, %v185_v42  ;;  %v5963_v45 = vrot.slane %v185_v42, %v5956_v41  ;;  %v5194_v57 = vld [vmem:[%s7458_s2 + $0x1b0] sm:$0xff]   ;;  %v5198_v61 = vld [vmem:[%s7458_s2 + $0x1a8] sm:$0xff]   ;;  %v5201_v0 = vld [vmem:[%s7458_s2 + $0x120] sm:$0xff]  }
  0x11   :  { %4915 = vmatpush3.bf16.msra.mxu1 %v5170_v15  ;;  %4894 = vmatprep.subr.bf16.mxu0 %v5171_v16  ;;  %v5202_v1 = vld [vmem:[%s7458_s2 + $0x1a0] sm:$0xff]   ;;  %v5203_v2 = vld [vmem:[%s7458_s2 + $0x158] sm:$0xff]   ;;  %v5207_v6 = vld [vmem:[%s7458_s2 + $0x150] sm:$0xff]  }
  0x12   :  { %4916 = vmatprep.subr.bf16.mxu1 %v5172_v17  ;;  %v194_v46 = vcombine.high %v5960_v43, %v5960_v43  ;;  %v5971_v48 = vrot.slane %v193_v44, %v5956_v41  ;;  %v5981_v51 = vcombine.high %v5963_v45, %v5963_v45  ;;  %v5204_v3 = vld [vmem:[%s7458_s2 + $0x1d8] sm:$0xff]   ;;  %v5208_v7 = vld [vmem:[%s7458_s2 + $0x1d0] sm:$0xff]   ;;  %v5211_v10 = vld [vmem:[%s7458_s2 + $0x148] sm:$0xff]  }
  0x13   :  { %v5205_v4 = vld [vmem:[%s7458_s2 + $0x118] sm:$0xff]   ;;  %v5209_v8 = vld [vmem:[%s7458_s2 + $0x110] sm:$0xff]   ;;  %v5212_v11 = vld [vmem:[%s7458_s2 + $0x1c8] sm:$0xff]  }
  0x14   :  { %4895 = vmatpush3.bf16.msra.mxu0 %v5173_v18  ;;  %v5977_v50 = vrot.slane %v194_v46, %v5956_v41  ;;  %651 = vmatprep.mubr.bf16.mxu0 %v5971_v48  ;;  %v5989_v53 = vcombine.high %v5971_v48, %v5971_v48  ;;  %v5206_v5 = vld [vmem:[%s7458_s2 + $0x198] sm:$0xff]   ;;  %v5210_v9 = vld [vmem:[%s7458_s2 + $0x190] sm:$0xff]   ;;  %v5213_v12 = vld [vmem:[%s7458_s2 + $0x108] sm:$0xff]   ;;  %v6083_v18 = vrot.slane %v5960_v43, %v5956_v41 }
  0x15   :  { %4917 = vmatpush3.bf16.msra.mxu1 %v5174_v19  ;;  %4896 = vmatprep.subr.bf16.mxu0 %v5175_v20  ;;  %v5214_v13 = vld [vmem:[%s7458_s2 + $0x188] sm:$0xff]   ;;  %v5215_v14 = vld [vmem:[%s7458_s2 + $0x140] sm:$0xff]   ;;  %v5220_v19 = vld [vmem:[%s7460_s4 + $0x78] sm:$0xff]  }
  0x16   :  { %4918 = vmatprep.subr.bf16.mxu1 %v5176_v21  ;;  %v6000_v56 = vcombine.high %v5977_v50, %v5977_v50  ;;  %691 = vmatprep.mubr.bf16.mxu1 %v5989_v53  ;;  %v5216_v15 = vld [vmem:[%s7458_s2 + $0x1c0] sm:$0xff]   ;;  %v5221_v20 = vld [vmem:[%s7460_s4 + $0xf8] sm:$0xff]   ;;  %v5228_v28 = vld [vmem:[%s7460_s4 + $0x68] sm:$0xff]  }
  0x17   :  { %v5217_v16 = vld [vmem:[%s7458_s2 + $0x100] sm:$0xff]   ;;  %v5222_v21 = vld [vmem:[%s7460_s4 + $0x38] sm:$0xff]   ;;  %v5240_v41 = vld [vmem:[%s7460_s4 + $0x50] sm:$0xff]  }
  0x18   :  { %4897 = vmatpush3.bf16.msra.mxu0 %v5177_v22  ;;  %v5218_v17 = vld [vmem:[%s7458_s2 + $0x180] sm:$0xff]   ;;  %v5223_v22 = vld [vmem:[%s7460_s4 + $0xb8] sm:$0xff]   ;;  %v5241_v42 = vld [vmem:[%s7460_s4 + $0xd0] sm:$0xff]  }
  0x19   :  { %4919 = vmatpush3.bf16.msra.mxu1 %v5178_v23  ;;  %4898 = vmatprep.subr.bf16.mxu0 %v5179_v24  ;;  %v6099_v23 = vcombine.high %v6083_v18, %v6083_v18  ;;  %v5224_v24 = vld [vmem:[%s7460_s4 + $0x70] sm:$0xff]   ;;  %v5233_v34 = vld [vmem:[%s7460_s4 + $0xe0] sm:$0xff]   ;;  %v5236_v37 = vld [vmem:[%s7460_s4 + $0x58] sm:$0xff]  }
  0x1a   :  { %4920 = vmatprep.subr.bf16.mxu1 %v5180_v25  ;;  %v5225_v25 = vld [vmem:[%s7460_s4 + $0xf0] sm:$0xff]   ;;  %v5235_v36 = vld [vmem:[%s7460_s4 + $0xa0] sm:$0xff]   ;;  %v5238_v39 = vld [vmem:[%s7460_s4 + $0x18] sm:$0xff]  }
  0x1b   :  { %v5239_v40 = vld [vmem:[%s7460_s4 + $0x98] sm:$0xff]   ;;  %v5242_v43 = vld [vmem:[%s7460_s4 + $0x10] sm:$0xff]   ;;  %v5244_v46 = vld [vmem:[%s7460_s4 + $0x48] sm:$0xff]  }
  0x1c   :  { %4899 = vmatpush3.bf16.msra.mxu0 %v5181_v26  ;;  %v5226_v26 = vld [vmem:[%s7460_s4 + $0x30] sm:$0xff]  }
  0x1d   :  { %4921 = vmatpush3.bf16.msra.mxu1 %v5182_v27  ;;  %4900 = vmatprep.subr.bf16.mxu0 %v5183_v29  ;;  %v5227_v27 = vld [vmem:[%s7460_s4 + $0xb0] sm:$0xff]   ;;  %v5229_v29 = vld [vmem:[%s7460_s4 + $0xe8] sm:$0xff]  }
  0x1e   :  { %4922 = vmatprep.subr.bf16.mxu1 %v5184_v30  ;;  %v5230_v30 = vld [vmem:[%s7460_s4 + $0x28] sm:$0xff]   ;;  %v5243_v44 = vld [vmem:[%s7460_s4 + $0x90] sm:$0xff]  }
  0x20   :  { %4901 = vmatpush3.bf16.msra.mxu0 %v5185_v31  ;;  %v5231_v31 = vld [vmem:[%s7460_s4 + $0xa8] sm:$0xff]  }
  0x21   :  { %4923 = vmatpush3.bf16.msra.mxu1 %v5186_v32  ;;  %4930 = vmatprep.subr.bf16.mxu0 %v5187_v35  ;;  %v5232_v32 = vld [vmem:[%s7460_s4 + $0x60] sm:$0xff]  }
  0x22   :  { %4952 = vmatprep.subr.bf16.mxu1 %v5188_v38  ;;  %v5234_v35 = vld [vmem:[%s7460_s4 + $0x20] sm:$0xff]   ;;  %v5237_v38 = vld [vmem:[%s7460_s4 + $0xd8] sm:$0xff]  }
  0x23   :  { %652 = vmatmul.mubr.bf16.vlgmr.msra.gmra.mxu0 %v5963_v45 }
  0x24   :  { %4931 = vmatpush3.bf16.msra.mxu0 %v5189_v47  ;;  %692 = vmatmul.mubr.bf16.vlgmr.msra.gmra.mxu1 %v5981_v51  ;;  %v5245_v47 = vld [vmem:[%s7460_s4 + $0xc8] sm:$0xff]  }
  0x25   :  { %4932 = vmatprep.subr.bf16.mxu0 %v5191_v52  ;;  %4953 = vmatpush3.bf16.msra.mxu1 %v5190_v49  ;;  %v5247_v49 = vld [vmem:[%s7460_s4 + $0x88] sm:$0xff]   ;;  %v5248_v52 = vld [vmem:[%s7460_s4 + $0x40] sm:$0xff]  }
  0x26   :  { %731 = vmatprep.mubr.bf16.mxu0 %v5977_v50  ;;  %4954 = vmatprep.subr.bf16.mxu1 %v5192_v54  ;;  %v5250_v54 = vld [vmem:[%s7460_s4] sm:$0xff]  }
  0x27   :  { %771 = vmatprep.mubr.bf16.mxu1 %v6000_v56 }
  0x28   :  { %4933 = vmatpush3.bf16.msra.mxu0 %v5193_v55  ;;  %v5251_v55 = vld [vmem:[%s7460_s4 + $0x80] sm:$0xff]  }
  0x29   :  { %4934 = vmatprep.subr.bf16.mxu0 %v5195_v58  ;;  %4955 = vmatpush3.bf16.msra.mxu1 %v5194_v57  ;;  %v5252_v57 = vld [vmem:[%s7460_s4 + $0x178] sm:$0xff]  }
  0x2a   :  { %4956 = vmatprep.subr.bf16.mxu1 %v5196_v59  ;;  %v5253_v58 = vld [vmem:[%s7460_s4 + $0x1f8] sm:$0xff]  }
  0x2b   :  { %v5254_v59 = vld [vmem:[%s7460_s4 + $0x138] sm:$0xff]  }
  0x2c   :  { %4935 = vmatpush3.bf16.msra.mxu0 %v5197_v60  ;;  %v5255_v60 = vld [vmem:[%s7460_s4 + $0x1b8] sm:$0xff]  }
  0x2d   :  { %4936 = vmatprep.subr.bf16.mxu0 %v5199_v62  ;;  %4957 = vmatpush3.bf16.msra.mxu1 %v5198_v61  ;;  %v5256_v61 = vld [vmem:[%s7460_s4 + $0x170] sm:$0xff]  }
  0x2e   :  { %4958 = vmatprep.subr.bf16.mxu1 %v5200_v63  ;;  %v5257_v62 = vld [vmem:[%s7460_s4 + $0x1f0] sm:$0xff]  }
  0x2f   :  { %v5258_v63 = vld [vmem:[%s7460_s4 + $0x130] sm:$0xff]  }
  0x30   :  { %4937 = vmatpush3.bf16.msra.mxu0 %v5201_v0  ;;  %v5259_v0 = vld [vmem:[%s7460_s4 + $0x1b0] sm:$0xff]  }
  0x31   :  { %4938 = vmatprep.subr.bf16.mxu0 %v5203_v2  ;;  %4959 = vmatpush3.bf16.msra.mxu1 %v5202_v1  ;;  %v5260_v1 = vld [vmem:[%s7460_s4 + $0x168] sm:$0xff]  }
  0x32   :  { %4960 = vmatprep.subr.bf16.mxu1 %v5204_v3  ;;  %v5262_v2 = vld [vmem:[%s7460_s4 + $0x128] sm:$0xff]   ;;  %v5266_v3 = vld [vmem:[%s7460_s4 + $0x120] sm:$0xff]  }
  0x34   :  { %4939 = vmatpush3.bf16.msra.mxu0 %v5205_v4  ;;  %v5267_v4 = vld [vmem:[%s7460_s4 + $0x1a0] sm:$0xff]  }
  0x35   :  { %4940 = vmatprep.subr.bf16.mxu0 %v5207_v6  ;;  %4961 = vmatpush3.bf16.msra.mxu1 %v5206_v5  ;;  %v5268_v5 = vld [vmem:[%s7460_s4 + $0x158] sm:$0xff]  }
  0x36   :  { %4962 = vmatprep.subr.bf16.mxu1 %v5208_v7  ;;  %v5269_v6 = vld [vmem:[%s7460_s4 + $0x1d8] sm:$0xff]  }
  0x37   :  { %v5270_v7 = vld [vmem:[%s7460_s4 + $0x118] sm:$0xff]  }
  0x38   :  { %4941 = vmatpush3.bf16.msra.mxu0 %v5209_v8  ;;  %v5271_v8 = vld [vmem:[%s7460_s4 + $0x198] sm:$0xff]  }
  0x39   :  { %4942 = vmatprep.subr.bf16.mxu0 %v5211_v10  ;;  %4963 = vmatpush3.bf16.msra.mxu1 %v5210_v9  ;;  %v5272_v9 = vld [vmem:[%s7460_s4 + $0x150] sm:$0xff]  }
  0x3a   :  { %4964 = vmatprep.subr.bf16.mxu1 %v5212_v11  ;;  %v5273_v10 = vld [vmem:[%s7460_s4 + $0x1d0] sm:$0xff]  }
  0x3b   :  { %v5274_v11 = vld [vmem:[%s7460_s4 + $0x110] sm:$0xff]  }
  0x3c   :  { %4943 = vmatpush3.bf16.msra.mxu0 %v5213_v12  ;;  %v5275_v12 = vld [vmem:[%s7460_s4 + $0x190] sm:$0xff]  }
  0x3d   :  { %4944 = vmatprep.subr.bf16.mxu0 %v5215_v14  ;;  %4965 = vmatpush3.bf16.msra.mxu1 %v5214_v13  ;;  %v5276_v13 = vld [vmem:[%s7460_s4 + $0x148] sm:$0xff]  }
  0x3e   :  { %4966 = vmatprep.subr.bf16.mxu1 %v5216_v15  ;;  %v5277_v14 = vld [vmem:[%s7460_s4 + $0x1c8] sm:$0xff]  }
  0x3f   :  { %v5278_v15 = vld [vmem:[%s7460_s4 + $0x108] sm:$0xff]  }
  0x40   :  { %4945 = vmatpush3.bf16.msra.mxu0 %v5217_v16  ;;  %v5280_v16 = vld [vmem:[%s7460_s4 + $0x140] sm:$0xff]  }
  0x41   :  { %4974 = vmatprep.subr.bf16.mxu0 %v5220_v19  ;;  %4967 = vmatpush3.bf16.msra.mxu1 %v5218_v17  ;;  %v5279_v17 = vld [vmem:[%s7460_s4 + $0x188] sm:$0xff]   ;;  %v5281_v19 = vld [vmem:[%s7460_s4 + $0x1c0] sm:$0xff]  }
  0x42   :  { %4996 = vmatprep.subr.bf16.mxu1 %v5221_v20  ;;  %v5282_v20 = vld [vmem:[%s7460_s4 + $0x100] sm:$0xff]  }
  0x43   :  { %732 = vmatmul.mubr.bf16.vlgmr.msra.gmra.mxu0 %v6083_v18 }
  0x44   :  { %4975 = vmatpush3.bf16.msra.mxu0 %v5222_v21  ;;  %1330 = vmatprep.mubr.bf16.mxu0 %v5971_v48  ;;  %v5246_v48 = vld [vmem:[%s7460_s4 + $0x8] sm:$0xff]   ;;  %v5283_v21 = vld [vmem:[%s7460_s4 + $0x180] sm:$0xff]  }
  0x45   :  { %772 = vmatmul.mubr.bf16.vlgmr.msra.gmra.mxu1 %v6099_v23  ;;  %4976 = vmatprep.subr.bf16.mxu0 %v5224_v24  ;;  %v1480_v24 = vld [vmem:[%s7462_s6 + $0x60] sm:$0xff] }
  0x46   :  { %4997 = vmatpush3.bf16.msra.mxu1 %v5223_v22  ;;  %1370 = vmatprep.mubr.bf16.mxu1 %v5989_v53  ;;  %v5249_v53 = vld [vmem:[%s7460_s4 + $0xc0] sm:$0xff]  }
  0x47   :  { %4998 = vmatprep.subr.bf16.mxu1 %v5225_v25  ;;  %v1476_v22 = vld [vmem:[%s7462_s6 + $0x40] sm:$0xff]  ;;  %v1477_v25 = vld [vmem:[%s7462_s6 + $0x48] sm:$0xff] }
  0x48   :  { %4977 = vmatpush3.bf16.msra.mxu0 %v5226_v26  ;;  %v4554_v26 = vcombine.low %v1476_v22, %v1480_v24 }
  0x49   :  { %4978 = vmatprep.subr.bf16.mxu0 %v5228_v28  ;;  %v1472_v28 = vld [vmem:[%s7462_s6 + $0x20] sm:$0xff] }
  0x4a   :  { %4999 = vmatpush3.bf16.msra.mxu1 %v5227_v27  ;;  %v4555_v27 = vcombine.high %v1476_v22, %v1480_v24 }
  0x4b   :  { %5000 = vmatprep.subr.bf16.mxu1 %v5229_v29  ;;  %v5779_v29 = vmov 0  }
  0x4c   :  { %4979 = vmatpush3.bf16.msra.mxu0 %v5230_v30 }
  0x4d   :  { %4980 = vmatprep.subr.bf16.mxu0 %v5232_v32 }
  0x4e   :  { %5001 = vmatpush3.bf16.msra.mxu1 %v5231_v31 }
  0x4f   :  { %5002 = vmatprep.subr.bf16.mxu1 %v5233_v34  ;;  %v1469_v34 = vld [vmem:[%s7462_s6 + $0x8] sm:$0xff] }
  0x50   :  { %4981 = vmatpush3.bf16.msra.mxu0 %v5234_v35  ;;  %v1473_v35 = vld [vmem:[%s7462_s6 + $0x28] sm:$0xff] }
  0x51   :  { %4982 = vmatprep.subr.bf16.mxu0 %v5236_v37 }
  0x52   :  { %5003 = vmatpush3.bf16.msra.mxu1 %v5235_v36  ;;  %v4549_v36 = vcombine.high %v1469_v34, %v1473_v35 }
  0x53   :  { %5004 = vmatprep.subr.bf16.mxu1 %v5237_v38  ;;  %v4548_v38 = vcombine.low %v1469_v34, %v1473_v35 }
  0x54   :  { %4983 = vmatpush3.bf16.msra.mxu0 %v5238_v39 }
  0x55   :  { %4984 = vmatprep.subr.bf16.mxu0 %v5240_v41  ;;  %v6325_v41 = vld [vmem:[%s7462_s6 + $0x70] sm:$0xff] }
  0x56   :  { %5005 = vmatpush3.bf16.msra.mxu1 %v5239_v40  ;;  %v6320_v40 = vld [vmem:[%s7462_s6 + $0x50] sm:$0xff] }
  0x57   :  { %5006 = vmatprep.subr.bf16.mxu1 %v5241_v42  ;;  %v6330_v42 = vld [vmem:[%s7462_s6 + $0x58] sm:$0xff] }
  0x58   :  { %4985 = vmatpush3.bf16.msra.mxu0 %v5242_v43  ;;  %v4558_v43 = vcombine.low %v6320_v40, %v6325_v41 }
  0x59   :  { %4986 = vmatprep.subr.bf16.mxu0 %v5244_v46  ;;  %v6339_v46 = vld [vmem:[%s7462_s6 + $0x78] sm:$0xff] }
  0x5a   :  { %5007 = vmatpush3.bf16.msra.mxu1 %v5243_v44  ;;  %v4559_v44 = vcombine.high %v6320_v40, %v6325_v41 }
  0x5b   :  { %5008 = vmatprep.subr.bf16.mxu1 %v5245_v47 }
  0x5c   :  { %4987 = vmatpush3.bf16.msra.mxu0 %v5246_v48 }
  0x5d   :  { %4988 = vmatprep.subr.bf16.mxu0 %v5248_v52  ;;  %v4561_v52 = vcombine.high %v6330_v42, %v6339_v46 }
  0x5e   :  { %5009 = vmatpush3.bf16.msra.mxu1 %v5247_v49  ;;  %v4560_v49 = vcombine.low %v6330_v42, %v6339_v46 }
  0x5f   :  { %5010 = vmatprep.subr.bf16.mxu1 %v5249_v53 }
  0x60   :  { %4989 = vmatpush3.bf16.msra.mxu0 %v5250_v54 }
  0x61   :  { %5018 = vmatprep.subr.bf16.mxu0 %v5252_v57 }
  0x62   :  { %5011 = vmatpush3.bf16.msra.mxu1 %v5251_v55 }
  0x63   :  { %1331 = vmatmul.mubr.bf16.vlgmr.msra.gmra.mxu0 %v5963_v45  ;;  %5040 = vmatprep.subr.bf16.mxu1 %v5253_v58  ;;  %v5261_v45 = vld [vmem:[%s7460_s4 + $0x1e8] sm:$0xff]  }
  0x64   :  { %5019 = vmatpush3.bf16.msra.mxu0 %v5254_v59  ;;  %1410 = vmatprep.mubr.bf16.mxu0 %v5977_v50  ;;  %v5263_v50 = vld [vmem:[%s7460_s4 + $0x1a8] sm:$0xff]   ;;  %v4416_v59 = vld [vmem:[%s7459_s3] ss:$0 sm:$0xff] }
  0x65   :  { %1371 = vmatmul.mubr.bf16.vlgmr.msra.gmra.mxu1 %v5981_v51  ;;  %5020 = vmatprep.subr.bf16.mxu0 %v5256_v61  ;;  %v5264_v51 = vld [vmem:[%s7460_s4 + $0x160] sm:$0xff]  }
  0x66   :  { %5041 = vmatpush3.bf16.msra.mxu1 %v5255_v60  ;;  %1450 = vmatprep.mubr.bf16.mxu1 %v6000_v56  ;;  %v5265_v56 = vld [vmem:[%s7460_s4 + $0x1e0] sm:$0xff]  }
  0x67   :  { %5042 = vmatprep.subr.bf16.mxu1 %v5257_v62 }
  0x68   :  { %5021 = vmatpush3.bf16.msra.mxu0 %v5258_v63 }
  0x69   :  { %5022 = vmatprep.subr.bf16.mxu0 %v5260_v1 }
  0x6a   :  { %5043 = vmatpush3.bf16.msra.mxu1 %v5259_v0 }
  0x6b   :  { %5044 = vmatprep.subr.bf16.mxu1 %v5261_v45 }
  0x6c   :  { %5023 = vmatpush3.bf16.msra.mxu0 %v5262_v2 }
  0x6d   :  { %5024 = vmatprep.subr.bf16.mxu0 %v5264_v51 }
  0x6e   :  { %5045 = vmatpush3.bf16.msra.mxu1 %v5263_v50 }
  0x6f   :  { %5046 = vmatprep.subr.bf16.mxu1 %v5265_v56 }
  0x70   :  { %5025 = vmatpush3.bf16.msra.mxu0 %v5266_v3 }
  0x71   :  { %5026 = vmatprep.subr.bf16.mxu0 %v5268_v5 }
  0x72   :  { %5047 = vmatpush3.bf16.msra.mxu1 %v5267_v4 }
  0x73   :  { %5048 = vmatprep.subr.bf16.mxu1 %v5269_v6 }
  0x74   :  { %5027 = vmatpush3.bf16.msra.mxu0 %v5270_v7 }
  0x75   :  { %5028 = vmatprep.subr.bf16.mxu0 %v5272_v9 }
  0x76   :  { %5049 = vmatpush3.bf16.msra.mxu1 %v5271_v8 }
  0x77   :  { %5050 = vmatprep.subr.bf16.mxu1 %v5273_v10 }
  0x78   :  { %5029 = vmatpush3.bf16.msra.mxu0 %v5274_v11 }
  0x79   :  { %5030 = vmatprep.subr.bf16.mxu0 %v5276_v13 }
  0x7a   :  { %5051 = vmatpush3.bf16.msra.mxu1 %v5275_v12 }
  0x7b   :  { %5052 = vmatprep.subr.bf16.mxu1 %v5277_v14 }
  0x7c   :  { %5031 = vmatpush3.bf16.msra.mxu0 %v5278_v15 }
  0x7d   :  { %5032 = vmatprep.subr.bf16.mxu0 %v5280_v16 }
  0x7e   :  { %5053 = vmatpush3.bf16.msra.mxu1 %v5279_v17 }
  0x7f   :  { %5054 = vmatprep.subr.bf16.mxu1 %v5281_v19 }
  0x80   :  { %5033 = vmatpush3.bf16.msra.mxu0 %v5282_v20 }
  0x81   :  { %1622 = vmatprep.subr.bf16.mxu0 %v4555_v27 }
  0x82   :  { %5055 = vmatpush3.bf16.msra.mxu1 %v5283_v21 }
  0x83   :  { %1411 = vmatmul.mubr.bf16.vlgmr.msra.gmra.mxu0 %v6083_v18  ;;  %v1481_v18 = vld [vmem:[%s7462_s6 + $0x68] sm:$0xff] }
  0x84   :  { %1642 = vmatprep.mubr.bf16.mxu0 %v5779_v29  ;;  %v4556_v30 = vcombine.low %v1477_v25, %v1481_v18  ;;  %v4557_v31 = vcombine.high %v1477_v25, %v1481_v18  ;;  %1623 = vmatpush1.bf16.msra.mxu0 %v4554_v26 }
  0x85   :  { %1451 = vmatmul.mubr.bf16.vlgmr.msra.gmra.mxu1 %v6099_v23  ;;  %v1468_v23 = vld [vmem:[%s7462_s6] sm:$0xff] }
  0x86   :  { %1683 = vmatprep.mubr.bf16.mxu1 %v5779_v29  ;;  %v4547_v32 = vcombine.high %v1468_v23, %v1472_v28  ;;  %1663 = vmatprep.subr.bf16.mxu1 %v4557_v31  ;;  %v4546_v37 = vcombine.low %v1468_v23, %v1472_v28 }
  0x87   :  { %1664 = vmatpush1.bf16.msra.mxu1 %v4556_v30 }
  0x88   :  { %1624 = vmatprep.subr.bf16.mxu0 %v4547_v32  ;;  %1665 = vmatprep.subr.bf16.mxu1 %v4549_v36 }
  0x89   :  { %1625 = vmatpush1.bf16.msra.mxu0 %v4546_v37 }
  0x8a   :  { %1704 = vmatprep.subr.bf16.mxu0 %v4559_v44 }
  0x8b   :  { %1666 = vmatpush1.bf16.msra.mxu1 %v4548_v38 }
  0x8c   :  { %1745 = vmatprep.subr.bf16.mxu1 %v4561_v52 }
  0xe3   :  { %v4902_v39 = vpop.f32.mrf.mxu0 }
  0xe4   :  { %v4924_v47 = vpop.f32.mrf.mxu1 }
  0xe5   :  { %v4903_v48 = vpop.f32.mrf.mxu0 }
  0xe6   :  { %v4925_v53 = vpop.f32.mrf.mxu1  ;;  %v4904_v60 = vadd.f32 %v4903_v48, %v4902_v39 }
  0xe7   :  { %v4905_v54 = vpop.f32.mrf.mxu0  ;;  %v4926_v62 = vadd.f32 %v4925_v53, %v4924_v47 }
  0xe8   :  { %v4927_v55 = vpop.f32.mrf.mxu1  ;;  %v654_v61 = vadd.f32 %v4904_v60, %v4416_v59 }
  0xe9   :  { %v4906_v57 = vpop.f32.mrf.mxu0 }
  0xea   :  { %v4928_v58 = vpop.f32.mrf.mxu1  ;;  %v694_v45 = vadd.f32 %v4926_v62, %v654_v61 }
 0x103   :  { %v4946_v63 = vpop.f32.mrf.mxu0 }
 0x105   :  { %v4968_v0 = vpop.f32.mrf.mxu1  ;;  %v4947_v1 = vpop.f32.mrf.mxu0 }
 0x106   :  { %v4948_v2 = vadd.f32 %v4947_v1, %v4946_v63 }
 0x107   :  { %19 = vsyncpa [#allocation5], 0  ;;  %v4969_v50 = vpop.f32.mrf.mxu1  ;;  %v4949_v51 = vpop.f32.mrf.mxu0  ;;  %vm1458_vm0 = vcmask 254976   ;;  %v4481_v17 = vld [vmem:[%s7461_s5] ss:$0 sm:$0xff]  ;;  %v1470_v44 = vld [vmem:[%s7462_s6 + $0x10] sm:$0xff] }
 0x108   :  { %v734_v56 = vadd.f32 %v4948_v2, %v694_v45  ;;  %v4970_v3 = vadd.f32 %v4969_v50, %v4968_v0  ;;  %v1464_v37 = vld [vmem:[%s7457_s1] sm:$0x3]  ;;  %v1474_v47 = vld [vmem:[%s7462_s6 + $0x30] sm:$0xff]  ;;  %v1471_v48 = vld [vmem:[%s7462_s6 + $0x18] sm:$0xff]  ;;  %vm1606_vm1 = vcmask 261120   ;;  %s5781_s0 = smov [#allocation4]  }
 0x109   :  { %v4971_v4 = vpop.f32.mrf.mxu1  ;;  %v4950_v5 = vpop.f32.mrf.mxu0  ;;  %v1475_v52 = vld [vmem:[%s7462_s6 + $0x38] sm:$0xff]  ;;  %v4551_v55 = vcombine.high %v1470_v44, %v1474_v47  ;;  %v4550_v58 = vcombine.low %v1470_v44, %v1474_v47  ;;  %v5292_v42 = vld [vmem:[%s7464_s8 + $0xf4] ss:$20 sps:$4 sm:$0xff]   ;;  %v5293_v46 = vld [vmem:[%s7464_s8 + $0x370] ss:$20 sps:$4 sm:$0xff]   ;;  %s4400_s19 = sshll.u32 %s5781_s0, 4  ;;  %s4401_s19 = int_to_ptr.vmem [resolvable:$true] %s4400_s19 }
 0x10a   :  { %v774_v6 = vadd.f32 %v4970_v3, %v734_v56  ;;  %v4553_v57 = vcombine.high %v1471_v48, %v1475_v52  ;;  %v4552_v59 = vcombine.low %v1471_v48, %v1475_v52  ;;  %v5286_v60 = vld [vmem:[%s7464_s8 + $0x11c] ss:$20 sps:$4 sm:$0xff]   ;;  %v5284_v40 = vld [vmem:[%s7464_s8 + $0x118] ss:$20 sps:$4 sm:$0xff]   ;;  %v5302_v2 = vld [vmem:[%s7464_s8 + $0xa0] ss:$20 sps:$4 sm:$0xff]  }
 0x10b   :  { %v4972_v7 = vpop.f32.mrf.mxu1  ;;  %v5289_v61 = vld [vmem:[%s7464_s8 + $0x39c] ss:$20 sps:$4 sm:$0xff]   ;;  %v5287_v41 = vld [vmem:[%s7464_s8 + $0x398] ss:$20 sps:$4 sm:$0xff]   ;;  %v5305_v50 = vld [vmem:[%s7464_s8 + $0x320] ss:$20 sps:$4 sm:$0xff]  }
 0x10c   :  { %1459 = vst.msk [vmem:[#allocation2] sm:$0x3] %vm1458_vm0, %v774_v6  ;;  %v5301_v62 = vld [vmem:[%s7464_s8 + $0x34c] ss:$20 sps:$4 sm:$0xff]   ;;  %v5296_v63 = vld [vmem:[%s7464_s8 + $0xc8] ss:$20 sps:$4 sm:$0xff]  }
 0x10d   :  { %v5299_v0 = vld [vmem:[%s7464_s8 + $0x348] ss:$20 sps:$4 sm:$0xff]   ;;  %v5304_v1 = vld [vmem:[%s7464_s8 + $0xa4] ss:$20 sps:$4 sm:$0xff]   ;;  %v5370_v52 = vld [vmem:[%s7464_s8 + $0x16c] ss:$20 sps:$4 sm:$0xff]  }
 0x10e   :  { %v5307_v45 = vld [vmem:[%s7464_s8 + $0x324] ss:$20 sps:$4 sm:$0xff]   ;;  %v5310_v51 = vld [vmem:[%s7464_s8 + $0x7c] ss:$20 sps:$4 sm:$0xff]   ;;  %v5316_v5 = vld [vmem:[%s7464_s8 + $0x54] ss:$20 sps:$4 sm:$0xff]  }
 0x10f   :  { %v5313_v56 = vld [vmem:[%s7464_s8 + $0x2fc] ss:$20 sps:$4 sm:$0xff]   ;;  %v5308_v3 = vld [vmem:[%s7464_s8 + $0x78] ss:$20 sps:$4 sm:$0xff]   ;;  %v5367_v44 = vld [vmem:[%s7464_s8 + $0x414] ss:$20 sps:$4 sm:$0xff]  }
 0x110   :  { %v5311_v4 = vld [vmem:[%s7464_s8 + $0x2f8] ss:$20 sps:$4 sm:$0xff]   ;;  %v5314_v7 = vld [vmem:[%s7464_s8 + $0x50] ss:$20 sps:$4 sm:$0xff]  }
 0x111   :  { %v5362_v47 = vld [vmem:[%s7464_s8 + $0x190] ss:$20 sps:$4 sm:$0xff]  }
 0x112   :  { %v5365_v48 = vld [vmem:[%s7464_s8 + $0x410] ss:$20 sps:$4 sm:$0xff]  }
 0x123   :  { %v4990_v8 = vpop.f32.mrf.mxu0 }
 0x125   :  { %v5012_v9 = vpop.f32.mrf.mxu1  ;;  %v4991_v10 = vpop.f32.mrf.mxu0 }
 0x126   :  { %v4992_v16 = vadd.f32 %v4991_v10, %v4990_v8  ;;  %v5317_v8 = vld [vmem:[%s7464_s8 + $0x2d0] ss:$20 sps:$4 sm:$0xff]   ;;  %v5325_v10 = vld [vmem:[%s7464_s8 + $0x2ac] ss:$20 sps:$4 sm:$0xff]  }
 0x127   :  { %v5013_v11 = vpop.f32.mrf.mxu1  ;;  %v4993_v12 = vpop.f32.mrf.mxu0 }
 0x128   :  { %v1333_v19 = vadd.f32 %v4992_v16, %v4481_v17  ;;  %v5014_v20 = vadd.f32 %v5013_v11, %v5012_v9  ;;  %v5322_v9 = vld [vmem:[%s7464_s8 + $0x2c] ss:$20 sps:$4 sm:$0xff]   ;;  %v5320_v11 = vld [vmem:[%s7464_s8 + $0x28] ss:$20 sps:$4 sm:$0xff]  }
 0x129   :  { %v5015_v13 = vpop.f32.mrf.mxu1  ;;  %v4994_v14 = vpop.f32.mrf.mxu0  ;;  %v5323_v12 = vld [vmem:[%s7464_s8 + $0x2a8] ss:$20 sps:$4 sm:$0xff]   ;;  %v5329_v16 = vld [vmem:[%s7464_s8 + $0x280] ss:$20 sps:$4 sm:$0xff]  }
 0x12a   :  { %v1373_v25 = vadd.f32 %v5014_v20, %v1333_v19  ;;  %v5328_v13 = vld [vmem:[%s7464_s8 + $0x4] ss:$20 sps:$4 sm:$0xff]   ;;  %v5334_v17 = vld [vmem:[%s7464_s8 + $0x25c] ss:$20 sps:$4 sm:$0xff]  }
 0x12b   :  { %v5016_v15 = vpop.f32.mrf.mxu1  ;;  %v5331_v14 = vld [vmem:[%s7464_s8 + $0x284] ss:$20 sps:$4 sm:$0xff]   ;;  %v5337_v19 = vld [vmem:[%s7464_s8 + $0x4dc] ss:$20 sps:$4 sm:$0xff]  }
 0x12c   :  { %v5326_v15 = vld [vmem:[%s7464_s8] ss:$20 sps:$4 sm:$0xff]   ;;  %v5332_v20 = vld [vmem:[%s7464_s8 + $0x258] ss:$20 sps:$4 sm:$0xff]  }
 0x143   :  { %v5034_v21 = vpop.f32.mrf.mxu0 }
 0x145   :  { %v5056_v22 = vpop.f32.mrf.mxu1  ;;  %v5035_v24 = vpop.f32.mrf.mxu0 }
 0x146   :  { %v5036_v26 = vadd.f32 %v5035_v24, %v5034_v21  ;;  %v5335_v21 = vld [vmem:[%s7464_s8 + $0x4d8] ss:$20 sps:$4 sm:$0xff]   ;;  %v5343_v24 = vld [vmem:[%s7464_s8 + $0x4b4] ss:$20 sps:$4 sm:$0xff]  }
 0x147   :  { %v5057_v27 = vpop.f32.mrf.mxu1  ;;  %v5037_v18 = vpop.f32.mrf.mxu0 }
 0x148   :  { %v1413_v23 = vadd.f32 %v5036_v26, %v1373_v25  ;;  %v5058_v28 = vadd.f32 %v5057_v27, %v5056_v22  ;;  %v5340_v22 = vld [vmem:[%s7464_s8 + $0x234] ss:$20 sps:$4 sm:$0xff]   ;;  %v5338_v25 = vld [vmem:[%s7464_s8 + $0x230] ss:$20 sps:$4 sm:$0xff]   ;;  %v5346_v27 = vld [vmem:[%s7464_s8 + $0x20c] ss:$20 sps:$4 sm:$0xff]  }
 0x149   :  { %v5059_v30 = vpop.f32.mrf.mxu1  ;;  %v5038_v31 = vpop.f32.mrf.mxu0  ;;  %v5341_v26 = vld [vmem:[%s7464_s8 + $0x4b0] ss:$20 sps:$4 sm:$0xff]   ;;  %v5349_v18 = vld [vmem:[%s7464_s8 + $0x48c] ss:$20 sps:$4 sm:$0xff]  }
 0x14a   :  { %v1453_v32 = vadd.f32 %v5058_v28, %v1413_v23  ;;  %v5344_v23 = vld [vmem:[%s7464_s8 + $0x208] ss:$20 sps:$4 sm:$0xff]   ;;  %v5352_v30 = vld [vmem:[%s7464_s8 + $0x1e4] ss:$20 sps:$4 sm:$0xff]  }
 0x14b   :  { %v5060_v34 = vpop.f32.mrf.mxu1  ;;  %v5347_v28 = vld [vmem:[%s7464_s8 + $0x488] ss:$20 sps:$4 sm:$0xff]   ;;  %v5355_v31 = vld [vmem:[%s7464_s8 + $0x464] ss:$20 sps:$4 sm:$0xff]  }
 0x14c   :  { %v1461_v35 = vmul.f32 0.5, %v1453_v32  ;;  %1460 = vst.msk [vmem:[#allocation4] sm:$0x3] %vm1458_vm0, %v1453_v32  ;;  %v5350_v32 = vld [vmem:[%s7464_s8 + $0x1e0] ss:$20 sps:$4 sm:$0xff]  }
 0x14d   :  { %v5353_v34 = vld [vmem:[%s7464_s8 + $0x460] ss:$20 sps:$4 sm:$0xff]  }
 0x14e   :  { %v1462_v36 = vmul.f32 1.442695, %v1461_v35  ;;  %v5358_v35 = vld [vmem:[%s7464_s8 + $0x1bc] ss:$20 sps:$4 sm:$0xff]  }
 0x150   :  { %5732 = vpow2.f32 %v1462_v36  ;;  %v5361_v36 = vld [vmem:[%s7464_s8 + $0x43c] ss:$20 sps:$4 sm:$0xff]  }
 0x15d   :  { %v5733_v38 = vpop.eup %5732 }
 0x15e   :  { %v1465_v39 = vmul.f32 %v5733_v38, %v1464_v37  ;;  %v5356_v37 = vld [vmem:[%s7464_s8 + $0x1b8] ss:$20 sps:$4 sm:$0xff]  }
 0x15f   :  { %v5359_v38 = vld [vmem:[%s7464_s8 + $0x438] ss:$20 sps:$4 sm:$0xff]  }
 0x160   :  { %v1466_v53 = vadd.f32 %v1465_v39, %v774_v6  ;;  %v5319_v6 = vld [vmem:[%s7464_s8 + $0x2d4] ss:$20 sps:$4 sm:$0xff]  }
 0x161   :  { %v5364_v39 = vld [vmem:[%s7464_s8 + $0x194] ss:$20 sps:$4 sm:$0xff]  }
 0x162   :  { %v1467_v54 = vpack.c.bf16 %v1466_v53, %v1466_v53  ;;  %v5373_v53 = vld [vmem:[%s7464_s8 + $0x3ec] ss:$20 sps:$4 sm:$0xff]  }
 0x164   :  { %4562 = vmatmul.mubr.msk.bf16.vlgmr.msra.gmra.mxu0 %vm1606_vm1, %v1467_v54  ;;  %4563 = vmatmul.mubr.msk.bf16.vlgmr.msra.gmra.mxu1 %vm1606_vm1, %v1467_v54 }
 0x165   :  { %1705 = vmatpush1.bf16.msra.mxu0 %v4558_v43  ;;  %1746 = vmatpush1.bf16.msra.mxu1 %v4560_v49  ;;  %v5290_v43 = vld [vmem:[%s7464_s8 + $0xf0] ss:$20 sps:$4 sm:$0xff]   ;;  %v5298_v49 = vld [vmem:[%s7464_s8 + $0xcc] ss:$20 sps:$4 sm:$0xff]  }
 0x166   :  { %1706 = vmatprep.subr.bf16.mxu0 %v4551_v55  ;;  %1747 = vmatprep.subr.bf16.mxu1 %v4553_v57  ;;  %v5371_v55 = vld [vmem:[%s7464_s8 + $0x3e8] ss:$20 sps:$4 sm:$0xff]   ;;  %v5376_v57 = vld [vmem:[%s7464_s8 + $0x144] ss:$20 sps:$4 sm:$0xff]  }
 0x167   :  { %1724 = vmatprep.mubr.bf16.mxu0 %v5779_v29  ;;  %1765 = vmatprep.mubr.bf16.mxu1 %v5779_v29  ;;  %v5295_v29 = vld [vmem:[%s7464_s8 + $0x374] ss:$20 sps:$4 sm:$0xff]  }
 0x169   :  { %1707 = vmatpush1.bf16.msra.mxu0 %v4550_v58  ;;  %1748 = vmatpush1.bf16.msra.mxu1 %v4552_v59  ;;  %v5379_v58 = vld [vmem:[%s7464_s8 + $0x3c4] ss:$20 sps:$4 sm:$0xff]   ;;  %v5374_v59 = vld [vmem:[%s7464_s8 + $0x140] ss:$20 sps:$4 sm:$0xff]  }
 0x16a   :  { %3857 = vmatprep.subr.bf16.mxu0 %v5286_v60  ;;  %3898 = vmatprep.subr.bf16.mxu1 %v5289_v61  ;;  %v5377_v60 = vld [vmem:[%s7464_s8 + $0x3c0] ss:$20 sps:$4 sm:$0xff]   ;;  %v5382_v61 = vld [vmem:[%s7464_s8 + $0x61c] ss:$20 sps:$4 sm:$0xff]  }
 0x16c   :  { %4564 = vmatmul.mubr.msk.bf16.vlgmr.msra.gmra.mxu0 %vm1606_vm1, %v1467_v54  ;;  %4565 = vmatmul.mubr.msk.bf16.vlgmr.msra.gmra.mxu1 %vm1606_vm1, %v1467_v54  ;;  %v5368_v54 = vld [vmem:[%s7464_s8 + $0x168] ss:$20 sps:$4 sm:$0xff]  }
 0x16d   :  { %3858 = vmatpush1.bf16.msra.mxu0 %v5284_v40  ;;  %3899 = vmatpush1.bf16.msra.mxu1 %v5287_v41  ;;  %v5385_v40 = vld [vmem:[%s7464_s8 + $0x89c] ss:$20 sps:$4 sm:$0xff]   ;;  %v1488_v41 = vsub.s32 0, %v5944_v33 }
 0x16e   :  { %3859 = vmatprep.subr.bf16.mxu0 %v5292_v42  ;;  %3900 = vmatprep.subr.bf16.mxu1 %v5295_v29  ;;  %v1496_v42 = vsub.s32 2, %v5944_v33  ;;  %v6583_v29 = vld [vmem:[%s7463_s7] sm:$0xff] }
 0x171   :  { %3860 = vmatpush1.bf16.msra.mxu0 %v5290_v43  ;;  %3901 = vmatpush1.bf16.msra.mxu1 %v5293_v46  ;;  %v1492_v43 = vsub.s32 1, %v5944_v33  ;;  %v1500_v46 = vsub.s32 3, %v5944_v33 }
 0x172   :  { %3861 = vmatprep.subr.bf16.mxu0 %v5298_v49  ;;  %3902 = vmatprep.subr.bf16.mxu1 %v5301_v62  ;;  %v1489_v49 = vrot.slane %v6583_v29, %v1488_v41  ;;  %v1497_v62 = vrot.slane %v6583_v29, %v1496_v42 }
 0x175   :  { %3862 = vmatpush1.bf16.msra.mxu0 %v5296_v63  ;;  %3903 = vmatpush1.bf16.msra.mxu1 %v5299_v0  ;;  %v1493_v63 = vrot.slane %v6583_v29, %v1492_v43  ;;  %v1501_v0 = vrot.slane %v6583_v29, %v1500_v46 }
 0x176   :  { %3863 = vmatprep.subr.bf16.mxu0 %v5304_v1  ;;  %3904 = vmatprep.subr.bf16.mxu1 %v5307_v45 }
 0x179   :  { %3864 = vmatpush1.bf16.msra.mxu0 %v5302_v2  ;;  %3905 = vmatpush1.bf16.msra.mxu1 %v5305_v50 }
 0x17a   :  { %3865 = vmatprep.subr.bf16.mxu0 %v5310_v51  ;;  %3906 = vmatprep.subr.bf16.mxu1 %v5313_v56 }
 0x17d   :  { %3866 = vmatpush1.bf16.msra.mxu0 %v5308_v3  ;;  %3907 = vmatpush1.bf16.msra.mxu1 %v5311_v4 }
 0x17e   :  { %3867 = vmatprep.subr.bf16.mxu0 %v5316_v5  ;;  %3908 = vmatprep.subr.bf16.mxu1 %v5319_v6  ;;  %v1508_v5 = vsub.s32 5, %v5944_v33  ;;  %v1516_v6 = vsub.s32 7, %v5944_v33 }
 0x181   :  { %3868 = vmatpush1.bf16.msra.mxu0 %v5314_v7  ;;  %3909 = vmatpush1.bf16.msra.mxu1 %v5317_v8 }
 0x182   :  { %3869 = vmatprep.subr.bf16.mxu0 %v5322_v9  ;;  %3910 = vmatprep.subr.bf16.mxu1 %v5325_v10 }
 0x185   :  { %3870 = vmatpush1.bf16.msra.mxu0 %v5320_v11  ;;  %3911 = vmatpush1.bf16.msra.mxu1 %v5323_v12  ;;  %v5380_v11 = vld [vmem:[%s7464_s8 + $0x618] ss:$20 sps:$4 sm:$0xff]  }
 0x186   :  { %3871 = vmatprep.subr.bf16.mxu0 %v5328_v13  ;;  %3912 = vmatprep.subr.bf16.mxu1 %v5331_v14  ;;  %v5383_v12 = vld [vmem:[%s7464_s8 + $0x898] ss:$20 sps:$4 sm:$0xff]  }
 0x189   :  { %3872 = vmatpush1.bf16.msra.mxu0 %v5326_v15  ;;  %3913 = vmatpush1.bf16.msra.mxu1 %v5329_v16 }
 0x18a   :  { %3873 = vmatprep.subr.bf16.mxu0 %v5334_v17  ;;  %3914 = vmatprep.subr.bf16.mxu1 %v5337_v19  ;;  %v5388_v17 = vld [vmem:[%s7464_s8 + $0x5f4] ss:$20 sps:$4 sm:$0xff]  }
 0x18b   :  { %v5391_v19 = vld [vmem:[%s7464_s8 + $0x874] ss:$20 sps:$4 sm:$0xff]  }
 0x18d   :  { %3874 = vmatpush2.bf16.msra.mxu0 %v5332_v20  ;;  %3915 = vmatpush2.bf16.msra.mxu1 %v5335_v21  ;;  %v1509_v20 = vrot.slane %v6583_v29, %v1508_v5  ;;  %v1517_v21 = vrot.slane %v6583_v29, %v1516_v6  ;;  %v5436_v5 = vld [vmem:[%s7464_s8 + $0x734] ss:$20 sps:$4 sm:$0xff]  }
 0x18e   :  { %3875 = vmatprep.subr.bf16.mxu0 %v5340_v22  ;;  %3916 = vmatprep.subr.bf16.mxu1 %v5343_v24  ;;  %v5439_v6 = vld [vmem:[%s7464_s8 + $0x9b4] ss:$20 sps:$4 sm:$0xff]  }
 0x191   :  { %3876 = vmatpush2.bf16.msra.mxu0 %v5338_v25  ;;  %3917 = vmatpush2.bf16.msra.mxu1 %v5341_v26  ;;  %v5386_v25 = vld [vmem:[%s7464_s8 + $0x5f0] ss:$20 sps:$4 sm:$0xff]  }
 0x192   :  { %3877 = vmatprep.subr.bf16.mxu0 %v5346_v27  ;;  %3918 = vmatprep.subr.bf16.mxu1 %v5349_v18  ;;  %v5389_v26 = vld [vmem:[%s7464_s8 + $0x870] ss:$20 sps:$4 sm:$0xff]  }
 0x195   :  { %3878 = vmatpush2.bf16.msra.mxu0 %v5344_v23  ;;  %3919 = vmatpush2.bf16.msra.mxu1 %v5347_v28  ;;  %v5394_v23 = vld [vmem:[%s7464_s8 + $0x5cc] ss:$20 sps:$4 sm:$0xff]  }
 0x196   :  { %3879 = vmatprep.subr.bf16.mxu0 %v5352_v30  ;;  %3920 = vmatprep.subr.bf16.mxu1 %v5355_v31  ;;  %v5397_v28 = vld [vmem:[%s7464_s8 + $0x84c] ss:$20 sps:$4 sm:$0xff]  }
 0x199   :  { %3880 = vmatpush2.bf16.msra.mxu0 %v5350_v32  ;;  %3921 = vmatpush2.bf16.msra.mxu1 %v5353_v34 }
 0x19a   :  { %3881 = vmatprep.subr.bf16.mxu0 %v5358_v35  ;;  %3922 = vmatprep.subr.bf16.mxu1 %v5361_v36 }
 0x19d   :  { %3882 = vmatpush2.bf16.msra.mxu0 %v5356_v37  ;;  %3923 = vmatpush2.bf16.msra.mxu1 %v5359_v38  ;;  %v5392_v37 = vld [vmem:[%s7464_s8 + $0x5c8] ss:$20 sps:$4 sm:$0xff]  }
 0x19e   :  { %3883 = vmatprep.subr.bf16.mxu0 %v5364_v39  ;;  %3924 = vmatprep.subr.bf16.mxu1 %v5367_v44  ;;  %v5395_v38 = vld [vmem:[%s7464_s8 + $0x848] ss:$20 sps:$4 sm:$0xff]  }
 0x1a1   :  { %3884 = vmatpush2.bf16.msra.mxu0 %v5362_v47  ;;  %3925 = vmatpush2.bf16.msra.mxu1 %v5365_v48  ;;  %v5400_v47 = vld [vmem:[%s7464_s8 + $0x5a4] ss:$20 sps:$4 sm:$0xff]  }
 0x1a2   :  { %3885 = vmatprep.subr.bf16.mxu0 %v5370_v52  ;;  %3926 = vmatprep.subr.bf16.mxu1 %v5373_v53  ;;  %v5403_v48 = vld [vmem:[%s7464_s8 + $0x824] ss:$20 sps:$4 sm:$0xff]   ;;  %v5398_v52 = vld [vmem:[%s7464_s8 + $0x5a0] ss:$20 sps:$4 sm:$0xff]  }
 0x1a3   :  { %v5401_v53 = vld [vmem:[%s7464_s8 + $0x820] ss:$20 sps:$4 sm:$0xff]  }
 0x1a5   :  { %3886 = vmatpush2.bf16.msra.mxu0 %v5368_v54  ;;  %3927 = vmatpush2.bf16.msra.mxu1 %v5371_v55  ;;  %v5406_v54 = vld [vmem:[%s7464_s8 + $0x57c] ss:$20 sps:$4 sm:$0xff]  }
 0x1a6   :  { %3887 = vmatprep.subr.bf16.mxu0 %v5376_v57  ;;  %3928 = vmatprep.subr.bf16.mxu1 %v5379_v58  ;;  %v5409_v55 = vld [vmem:[%s7464_s8 + $0x7fc] ss:$20 sps:$4 sm:$0xff]   ;;  %v5404_v57 = vld [vmem:[%s7464_s8 + $0x578] ss:$20 sps:$4 sm:$0xff]  }
 0x1a7   :  { %v5407_v58 = vld [vmem:[%s7464_s8 + $0x7f8] ss:$20 sps:$4 sm:$0xff]  }
 0x1a9   :  { %3888 = vmatpush2.bf16.msra.mxu0 %v5374_v59  ;;  %3929 = vmatpush2.bf16.msra.mxu1 %v5377_v60  ;;  %v5412_v59 = vld [vmem:[%s7464_s8 + $0x554] ss:$20 sps:$4 sm:$0xff]  }
 0x1aa   :  { %3939 = vmatprep.subr.bf16.mxu0 %v5382_v61  ;;  %3980 = vmatprep.subr.bf16.mxu1 %v5385_v40  ;;  %v5415_v60 = vld [vmem:[%s7464_s8 + $0x7d4] ss:$20 sps:$4 sm:$0xff]   ;;  %v5410_v61 = vld [vmem:[%s7464_s8 + $0x550] ss:$20 sps:$4 sm:$0xff]  }
 0x1ab   :  { %v5413_v40 = vld [vmem:[%s7464_s8 + $0x7d0] ss:$20 sps:$4 sm:$0xff]  }
 0x224   :  { %v1644_v1 = vpop.f32.mrf.mxu0  ;;  %v1685_v45 = vpop.f32.mrf.mxu1 }
 0x225   :  { %v1645_v2 = vadd.f32 %v1644_v1, %v1489_v49  ;;  %v1686_v50 = vadd.f32 %v1685_v45, %v1497_v62  ;;  %v5418_v49 = vld [vmem:[%s7464_s8 + $0x52c] ss:$20 sps:$4 sm:$0xff]   ;;  %v5424_v1 = vld [vmem:[%s7464_s8 + $0x504] ss:$20 sps:$4 sm:$0xff]  }
 0x226   :  { %v1646_v51 = vpop.f32.mrf.mxu0  ;;  %v1687_v56 = vpop.f32.mrf.mxu1  ;;  %v5421_v62 = vld [vmem:[%s7464_s8 + $0x7ac] ss:$20 sps:$4 sm:$0xff]   ;;  %v5427_v45 = vld [vmem:[%s7464_s8 + $0x784] ss:$20 sps:$4 sm:$0xff]  }
 0x227   :  { %v1647_v3 = vadd.f32 %v1646_v51, %v1493_v63  ;;  %v1688_v4 = vadd.f32 %v1687_v56, %v1501_v0  ;;  %v6611_v13 = vpack.c.bf16 %v1645_v2, %v1645_v2  ;;  %v6613_v14 = vpack.c.bf16 %v1686_v50, %v1686_v50  ;;  %v5416_v63 = vld [vmem:[%s7464_s8 + $0x528] ss:$20 sps:$4 sm:$0xff]   ;;  %v5422_v2 = vld [vmem:[%s7464_s8 + $0x500] ss:$20 sps:$4 sm:$0xff]  }
 0x228   :  { %v1648_v7 = vpop.f32.mrf.mxu0  ;;  %v1689_v8 = vpop.f32.mrf.mxu1  ;;  %v5419_v0 = vld [vmem:[%s7464_s8 + $0x7a8] ss:$20 sps:$4 sm:$0xff]   ;;  %v5425_v50 = vld [vmem:[%s7464_s8 + $0x780] ss:$20 sps:$4 sm:$0xff]  }
 0x229   :  { %v6601_v9 = vpack.c.bf16 %v1647_v3, %v1647_v3  ;;  %v6603_v10 = vpack.c.bf16 %v1688_v4, %v1688_v4  ;;  %v5430_v51 = vld [vmem:[%s7464_s8 + $0x75c] ss:$20 sps:$4 sm:$0xff]   ;;  %v5428_v3 = vld [vmem:[%s7464_s8 + $0x758] ss:$20 sps:$4 sm:$0xff]  }
 0x22a   :  { %v1649_v15 = vpop.f32.mrf.mxu0  ;;  %v1690_v16 = vpop.f32.mrf.mxu1  ;;  %v5433_v56 = vld [vmem:[%s7464_s8 + $0x9dc] ss:$20 sps:$4 sm:$0xff]   ;;  %v5431_v4 = vld [vmem:[%s7464_s8 + $0x9d8] ss:$20 sps:$4 sm:$0xff]  }
 0x22b   :  { %3889 = vmatprep.mubr.bf16.mxu0 %v6601_v9  ;;  %3930 = vmatprep.mubr.bf16.mxu1 %v6603_v10  ;;  %v5434_v7 = vld [vmem:[%s7464_s8 + $0x730] ss:$20 sps:$4 sm:$0xff]   ;;  %v5440_v15 = vld [vmem:[%s7464_s8 + $0x708] ss:$20 sps:$4 sm:$0xff]  }
 0x22c   :  { %v6625_v22 = vpop.f32.mrf.mxu0  ;;  %v6627_v24 = vpop.f32.mrf.mxu1  ;;  %3890 = vmatmul.mubr.bf16.vlgmr.msra.gmra.mxu0 %v6611_v13  ;;  %3931 = vmatmul.mubr.bf16.vlgmr.msra.gmra.mxu1 %v6613_v14  ;;  %v5437_v8 = vld [vmem:[%s7464_s8 + $0x9b0] ss:$20 sps:$4 sm:$0xff]   ;;  %v5443_v16 = vld [vmem:[%s7464_s8 + $0x988] ss:$20 sps:$4 sm:$0xff]  }
 0x22d   :  { %3940 = vmatpush1.bf16.msra.mxu0 %v5380_v11  ;;  %3981 = vmatpush1.bf16.msra.mxu1 %v5383_v12  ;;  %v5442_v11 = vld [vmem:[%s7464_s8 + $0x70c] ss:$20 sps:$4 sm:$0xff]  }
 0x22e   :  { %v1728_v27 = vpop.f32.mrf.mxu0  ;;  %v1769_v18 = vpop.f32.mrf.mxu1  ;;  %3941 = vmatprep.subr.bf16.mxu0 %v5388_v17  ;;  %3982 = vmatprep.subr.bf16.mxu1 %v5391_v19  ;;  %v5445_v12 = vld [vmem:[%s7464_s8 + $0x98c] ss:$20 sps:$4 sm:$0xff]   ;;  %v5448_v17 = vld [vmem:[%s7464_s8 + $0x6e4] ss:$20 sps:$4 sm:$0xff]  }
 0x22f   :  { %v1729_v30 = vadd.f32 %v1728_v27, %v1509_v20  ;;  %v1770_v31 = vadd.f32 %v1769_v18, %v1517_v21  ;;  %v5451_v19 = vld [vmem:[%s7464_s8 + $0x964] ss:$20 sps:$4 sm:$0xff]   ;;  %v5446_v20 = vld [vmem:[%s7464_s8 + $0x6e0] ss:$20 sps:$4 sm:$0xff]  }
 0x230   :  { %v1730_v32 = vpop.f32.mrf.mxu0  ;;  %v1771_v34 = vpop.f32.mrf.mxu1  ;;  %v5449_v21 = vld [vmem:[%s7464_s8 + $0x960] ss:$20 sps:$4 sm:$0xff]   ;;  %v5452_v27 = vld [vmem:[%s7464_s8 + $0x6b8] ss:$20 sps:$4 sm:$0xff]  }
 0x231   :  { %v6643_v35 = vpack.c.bf16 %v1729_v30, %v1729_v30  ;;  %v6645_v36 = vpack.c.bf16 %v1770_v31, %v1770_v31  ;;  %3942 = vmatpush1.bf16.msra.mxu0 %v5386_v25  ;;  %3983 = vmatpush1.bf16.msra.mxu1 %v5389_v26  ;;  %v5454_v25 = vld [vmem:[%s7464_s8 + $0x6bc] ss:$20 sps:$4 sm:$0xff]   ;;  %v5455_v18 = vld [vmem:[%s7464_s8 + $0x938] ss:$20 sps:$4 sm:$0xff]   ;;  %v1504_v32 = vsub.s32 4, %v5944_v33  ;;  %v1512_v34 = vsub.s32 6, %v5944_v33 }
 0x232   :  { %v1731_v39 = vpop.f32.mrf.mxu0  ;;  %v1772_v44 = vpop.f32.mrf.mxu1  ;;  %3943 = vmatprep.subr.bf16.mxu0 %v5394_v23  ;;  %3984 = vmatprep.subr.bf16.mxu1 %v5397_v28  ;;  %v5457_v26 = vld [vmem:[%s7464_s8 + $0x93c] ss:$20 sps:$4 sm:$0xff]   ;;  %v5460_v23 = vld [vmem:[%s7464_s8 + $0x694] ss:$20 sps:$4 sm:$0xff]  }
 0x233   :  { %3971 = vmatprep.mubr.bf16.mxu0 %v6643_v35  ;;  %4012 = vmatprep.mubr.bf16.mxu1 %v6645_v36  ;;  %v5463_v28 = vld [vmem:[%s7464_s8 + $0x914] ss:$20 sps:$4 sm:$0xff]   ;;  %v5458_v30 = vld [vmem:[%s7464_s8 + $0x690] ss:$20 sps:$4 sm:$0xff]  }
 0x234   :  { %v5461_v31 = vld [vmem:[%s7464_s8 + $0x910] ss:$20 sps:$4 sm:$0xff]   ;;  %v5464_v39 = vld [vmem:[%s7464_s8 + $0x668] ss:$20 sps:$4 sm:$0xff]  }
 0x235   :  { %3944 = vmatpush1.bf16.msra.mxu0 %v5392_v37  ;;  %3985 = vmatpush1.bf16.msra.mxu1 %v5395_v38  ;;  %v5466_v37 = vld [vmem:[%s7464_s8 + $0x66c] ss:$20 sps:$4 sm:$0xff]   ;;  %v5467_v44 = vld [vmem:[%s7464_s8 + $0x8e8] ss:$20 sps:$4 sm:$0xff]  }
 0x236   :  { %3945 = vmatprep.subr.bf16.mxu0 %v5400_v47  ;;  %3986 = vmatprep.subr.bf16.mxu1 %v5403_v48  ;;  %v5469_v38 = vld [vmem:[%s7464_s8 + $0x8ec] ss:$20 sps:$4 sm:$0xff]   ;;  %v1505_v47 = vrot.slane %v6583_v29, %v1504_v32  ;;  %v1513_v48 = vrot.slane %v6583_v29, %v1512_v34  ;;  %v5535_v34 = vld [vmem:[%s7464_s8 + $0x4bc] ss:$20 sps:$4 sm:$0xff]  }
 0x237   :  { %v5473_v29 = vld [vmem:[%s7464_s8 + $0x8c0] ss:$20 sps:$4 sm:$0xff]  }
 0x239   :  { %3946 = vmatpush1.bf16.msra.mxu0 %v5398_v52  ;;  %3987 = vmatpush1.bf16.msra.mxu1 %v5401_v53  ;;  %v5472_v52 = vld [vmem:[%s7464_s8 + $0x644] ss:$20 sps:$4 sm:$0xff]  }
 0x23a   :  { %3947 = vmatprep.subr.bf16.mxu0 %v5406_v54  ;;  %3988 = vmatprep.subr.bf16.mxu1 %v5409_v55  ;;  %v5475_v53 = vld [vmem:[%s7464_s8 + $0x8c4] ss:$20 sps:$4 sm:$0xff]   ;;  %v5470_v54 = vld [vmem:[%s7464_s8 + $0x640] ss:$20 sps:$4 sm:$0xff]   ;;  %v1727_v55 = vadd.f32 %v6625_v22, %v1505_v47 }
 0x23b   :  { %v5536_v47 = vld [vmem:[%s7464_s8 + $0x210] ss:$20 sps:$4 sm:$0xff]  }
 0x23d   :  { %3948 = vmatpush1.bf16.msra.mxu0 %v5404_v57  ;;  %3989 = vmatpush1.bf16.msra.mxu1 %v5407_v58  ;;  %v1768_v57 = vadd.f32 %v6627_v24, %v1513_v48  ;;  %v5478_v58 = vld [vmem:[%s7464_s8 + $0x124] ss:$20 sps:$4 sm:$0xff]   ;;  %v5479_v24 = vld [vmem:[%s7464_s8 + $0x3a0] ss:$20 sps:$4 sm:$0xff]  }
 0x23e   :  { %3949 = vmatprep.subr.bf16.mxu0 %v5412_v59  ;;  %3990 = vmatprep.subr.bf16.mxu1 %v5415_v60  ;;  %v5481_v59 = vld [vmem:[%s7464_s8 + $0x3a4] ss:$20 sps:$4 sm:$0xff]   ;;  %v5476_v60 = vld [vmem:[%s7464_s8 + $0x120] ss:$20 sps:$4 sm:$0xff]  }
 0x23f   :  { %v6830_v22 = vpack.c.bf16 %v1768_v57, %v1768_v57  ;;  %v5539_v48 = vld [vmem:[%s7464_s8 + $0x490] ss:$20 sps:$4 sm:$0xff]  }
 0x240   :  { %v5553_v57 = vld [vmem:[%s7464_s8 + $0x444] ss:$20 sps:$4 sm:$0xff]  }
 0x241   :  { %3950 = vmatpush1.bf16.msra.mxu0 %v5410_v61  ;;  %3991 = vmatpush1.bf16.msra.mxu1 %v5413_v40  ;;  %v6828_v61 = vpack.c.bf16 %v1727_v55, %v1727_v55  ;;  %v5484_v40 = vld [vmem:[%s7464_s8 + $0xfc] ss:$20 sps:$4 sm:$0xff]   ;;  %v5550_v55 = vld [vmem:[%s7464_s8 + $0x1c4] ss:$20 sps:$4 sm:$0xff]  }
 0x242   :  { %3951 = vmatprep.subr.bf16.mxu0 %v5418_v49  ;;  %3992 = vmatprep.subr.bf16.mxu1 %v5421_v62  ;;  %v5487_v49 = vld [vmem:[%s7464_s8 + $0x37c] ss:$20 sps:$4 sm:$0xff]   ;;  %v5482_v62 = vld [vmem:[%s7464_s8 + $0xf8] ss:$20 sps:$4 sm:$0xff]  }
 0x245   :  { %3952 = vmatpush1.bf16.msra.mxu0 %v5416_v63  ;;  %3993 = vmatpush1.bf16.msra.mxu1 %v5419_v0  ;;  %v5485_v63 = vld [vmem:[%s7464_s8 + $0x378] ss:$20 sps:$4 sm:$0xff]   ;;  %v5490_v0 = vld [vmem:[%s7464_s8 + $0xd4] ss:$20 sps:$4 sm:$0xff]  }
 0x246   :  { %3953 = vmatprep.subr.bf16.mxu0 %v5424_v1  ;;  %3994 = vmatprep.subr.bf16.mxu1 %v5427_v45  ;;  %v5493_v1 = vld [vmem:[%s7464_s8 + $0x354] ss:$20 sps:$4 sm:$0xff]   ;;  %v5488_v45 = vld [vmem:[%s7464_s8 + $0xd0] ss:$20 sps:$4 sm:$0xff]  }
 0x249   :  { %3954 = vmatpush1.bf16.msra.mxu0 %v5422_v2  ;;  %3995 = vmatpush1.bf16.msra.mxu1 %v5425_v50  ;;  %v5491_v2 = vld [vmem:[%s7464_s8 + $0x350] ss:$20 sps:$4 sm:$0xff]   ;;  %v5496_v50 = vld [vmem:[%s7464_s8 + $0xac] ss:$20 sps:$4 sm:$0xff]  }
 0x24a   :  { %3955 = vmatprep.subr.bf16.mxu0 %v5430_v51  ;;  %3996 = vmatprep.subr.bf16.mxu1 %v5433_v56  ;;  %v5499_v51 = vld [vmem:[%s7464_s8 + $0x32c] ss:$20 sps:$4 sm:$0xff]   ;;  %v5494_v56 = vld [vmem:[%s7464_s8 + $0xa8] ss:$20 sps:$4 sm:$0xff]  }
 0x24d   :  { %3956 = vmatpush2.bf16.msra.mxu0 %v5428_v3  ;;  %3997 = vmatpush2.bf16.msra.mxu1 %v5431_v4  ;;  %v5497_v3 = vld [vmem:[%s7464_s8 + $0x328] ss:$20 sps:$4 sm:$0xff]   ;;  %v5502_v4 = vld [vmem:[%s7464_s8 + $0x84] ss:$20 sps:$4 sm:$0xff]  }
 0x24e   :  { %3957 = vmatprep.subr.bf16.mxu0 %v5436_v5  ;;  %3998 = vmatprep.subr.bf16.mxu1 %v5439_v6  ;;  %v5505_v5 = vld [vmem:[%s7464_s8 + $0x304] ss:$20 sps:$4 sm:$0xff]   ;;  %v5500_v6 = vld [vmem:[%s7464_s8 + $0x80] ss:$20 sps:$4 sm:$0xff]  }
 0x251   :  { %3958 = vmatpush2.bf16.msra.mxu0 %v5434_v7  ;;  %3999 = vmatpush2.bf16.msra.mxu1 %v5437_v8  ;;  %v5503_v7 = vld [vmem:[%s7464_s8 + $0x300] ss:$20 sps:$4 sm:$0xff]   ;;  %v5508_v8 = vld [vmem:[%s7464_s8 + $0x5c] ss:$20 sps:$4 sm:$0xff]  }
 0x252   :  { %3959 = vmatprep.subr.bf16.mxu0 %v5442_v11  ;;  %4000 = vmatprep.subr.bf16.mxu1 %v5445_v12  ;;  %v5511_v11 = vld [vmem:[%s7464_s8 + $0x2dc] ss:$20 sps:$4 sm:$0xff]   ;;  %v5506_v12 = vld [vmem:[%s7464_s8 + $0x58] ss:$20 sps:$4 sm:$0xff]  }
 0x255   :  { %3960 = vmatpush2.bf16.msra.mxu0 %v5440_v15  ;;  %4001 = vmatpush2.bf16.msra.mxu1 %v5443_v16  ;;  %v5509_v15 = vld [vmem:[%s7464_s8 + $0x2d8] ss:$20 sps:$4 sm:$0xff]   ;;  %v5514_v16 = vld [vmem:[%s7464_s8 + $0x34] ss:$20 sps:$4 sm:$0xff]  }
 0x256   :  { %3961 = vmatprep.subr.bf16.mxu0 %v5448_v17  ;;  %4002 = vmatprep.subr.bf16.mxu1 %v5451_v19  ;;  %v5517_v17 = vld [vmem:[%s7464_s8 + $0x2b4] ss:$20 sps:$4 sm:$0xff]   ;;  %v5512_v19 = vld [vmem:[%s7464_s8 + $0x30] ss:$20 sps:$4 sm:$0xff]  }
 0x259   :  { %3962 = vmatpush2.bf16.msra.mxu0 %v5446_v20  ;;  %4003 = vmatpush2.bf16.msra.mxu1 %v5449_v21  ;;  %v5515_v20 = vld [vmem:[%s7464_s8 + $0x2b0] ss:$20 sps:$4 sm:$0xff]   ;;  %v5520_v21 = vld [vmem:[%s7464_s8 + $0xc] ss:$20 sps:$4 sm:$0xff]  }
 0x25a   :  { %3963 = vmatprep.subr.bf16.mxu0 %v5454_v25  ;;  %4004 = vmatprep.subr.bf16.mxu1 %v5457_v26  ;;  %v5523_v25 = vld [vmem:[%s7464_s8 + $0x28c] ss:$20 sps:$4 sm:$0xff]   ;;  %v5518_v26 = vld [vmem:[%s7464_s8 + $0x8] ss:$20 sps:$4 sm:$0xff]  }
 0x25d   :  { %3964 = vmatpush2.bf16.msra.mxu0 %v5452_v27  ;;  %4005 = vmatpush2.bf16.msra.mxu1 %v5455_v18  ;;  %v5521_v27 = vld [vmem:[%s7464_s8 + $0x288] ss:$20 sps:$4 sm:$0xff]   ;;  %v5526_v18 = vld [vmem:[%s7464_s8 + $0x264] ss:$20 sps:$4 sm:$0xff]  }
 0x25e   :  { %3965 = vmatprep.subr.bf16.mxu0 %v5460_v23  ;;  %4006 = vmatprep.subr.bf16.mxu1 %v5463_v28  ;;  %v5529_v23 = vld [vmem:[%s7464_s8 + $0x4e4] ss:$20 sps:$4 sm:$0xff]   ;;  %v5524_v28 = vld [vmem:[%s7464_s8 + $0x260] ss:$20 sps:$4 sm:$0xff]  }
 0x261   :  { %3966 = vmatpush2.bf16.msra.mxu0 %v5458_v30  ;;  %4007 = vmatpush2.bf16.msra.mxu1 %v5461_v31  ;;  %v5527_v30 = vld [vmem:[%s7464_s8 + $0x4e0] ss:$20 sps:$4 sm:$0xff]   ;;  %v5532_v31 = vld [vmem:[%s7464_s8 + $0x23c] ss:$20 sps:$4 sm:$0xff]  }
 0x262   :  { %3967 = vmatprep.subr.bf16.mxu0 %v5466_v37  ;;  %4008 = vmatprep.subr.bf16.mxu1 %v5469_v38  ;;  %v5530_v37 = vld [vmem:[%s7464_s8 + $0x238] ss:$20 sps:$4 sm:$0xff]  }
 0x263   :  { %v5533_v38 = vld [vmem:[%s7464_s8 + $0x4b8] ss:$20 sps:$4 sm:$0xff]  }
 0x265   :  { %3968 = vmatpush2.bf16.msra.mxu0 %v5464_v39  ;;  %4009 = vmatpush2.bf16.msra.mxu1 %v5467_v44  ;;  %v5538_v39 = vld [vmem:[%s7464_s8 + $0x214] ss:$20 sps:$4 sm:$0xff]  }
 0x266   :  { %3969 = vmatprep.subr.bf16.mxu0 %v5472_v52  ;;  %4010 = vmatprep.subr.bf16.mxu1 %v5475_v53  ;;  %v5541_v44 = vld [vmem:[%s7464_s8 + $0x494] ss:$20 sps:$4 sm:$0xff]   ;;  %v5544_v52 = vld [vmem:[%s7464_s8 + $0x1ec] ss:$20 sps:$4 sm:$0xff]  }
 0x267   :  { %v5547_v53 = vld [vmem:[%s7464_s8 + $0x46c] ss:$20 sps:$4 sm:$0xff]  }
 0x269   :  { %3970 = vmatpush2.bf16.msra.mxu0 %v5470_v54  ;;  %4011 = vmatpush2.bf16.msra.mxu1 %v5473_v29  ;;  %v5542_v54 = vld [vmem:[%s7464_s8 + $0x1e8] ss:$20 sps:$4 sm:$0xff]  }
 0x26a   :  { %4021 = vmatprep.subr.bf16.mxu0 %v5478_v58  ;;  %4062 = vmatprep.subr.bf16.mxu1 %v5481_v59  ;;  %v5545_v29 = vld [vmem:[%s7464_s8 + $0x468] ss:$20 sps:$4 sm:$0xff]   ;;  %v5548_v58 = vld [vmem:[%s7464_s8 + $0x1c0] ss:$20 sps:$4 sm:$0xff]  }
 0x26b   :  { %v5551_v59 = vld [vmem:[%s7464_s8 + $0x440] ss:$20 sps:$4 sm:$0xff]  }
 0x26c   :  { %3972 = vmatmul.mubr.bf16.vlgmr.msra.gmra.mxu0 %v6828_v61  ;;  %4013 = vmatmul.mubr.bf16.vlgmr.msra.gmra.mxu1 %v6830_v22 }
 0x26d   :  { %4022 = vmatpush1.bf16.msra.mxu0 %v5476_v60  ;;  %4053 = vmatprep.mubr.bf16.mxu0 %v6601_v9  ;;  %v5556_v60 = vld [vmem:[%s7464_s8 + $0x19c] ss:$20 sps:$4 sm:$0xff]  }
 0x26e   :  { %4063 = vmatpush1.bf16.msra.mxu1 %v5479_v24  ;;  %4094 = vmatprep.mubr.bf16.mxu1 %v6603_v10  ;;  %v5559_v24 = vld [vmem:[%s7464_s8 + $0x41c] ss:$20 sps:$4 sm:$0xff]  }
 0x26f   :  { %4023 = vmatprep.subr.bf16.mxu0 %v5484_v40  ;;  %4064 = vmatprep.subr.bf16.mxu1 %v5487_v49  ;;  %v5554_v40 = vld [vmem:[%s7464_s8 + $0x198] ss:$20 sps:$4 sm:$0xff]  }
 0x270   :  { %v5557_v49 = vld [vmem:[%s7464_s8 + $0x418] ss:$20 sps:$4 sm:$0xff]  }
 0x271   :  { %4024 = vmatpush1.bf16.msra.mxu0 %v5482_v62  ;;  %v5562_v62 = vld [vmem:[%s7464_s8 + $0x174] ss:$20 sps:$4 sm:$0xff]  }
 0x272   :  { %4065 = vmatpush1.bf16.msra.mxu1 %v5485_v63  ;;  %4025 = vmatprep.subr.bf16.mxu0 %v5490_v0  ;;  %v5565_v63 = vld [vmem:[%s7464_s8 + $0x3f4] ss:$20 sps:$4 sm:$0xff]   ;;  %v5560_v0 = vld [vmem:[%s7464_s8 + $0x170] ss:$20 sps:$4 sm:$0xff]  }
 0x273   :  { %4066 = vmatprep.subr.bf16.mxu1 %v5493_v1  ;;  %v5563_v1 = vld [vmem:[%s7464_s8 + $0x3f0] ss:$20 sps:$4 sm:$0xff]  }
 0x275   :  { %4026 = vmatpush1.bf16.msra.mxu0 %v5488_v45  ;;  %v5568_v45 = vld [vmem:[%s7464_s8 + $0x14c] ss:$20 sps:$4 sm:$0xff]  }
 0x276   :  { %4067 = vmatpush1.bf16.msra.mxu1 %v5491_v2  ;;  %4027 = vmatprep.subr.bf16.mxu0 %v5496_v50  ;;  %v5571_v2 = vld [vmem:[%s7464_s8 + $0x3cc] ss:$20 sps:$4 sm:$0xff]   ;;  %v5566_v50 = vld [vmem:[%s7464_s8 + $0x148] ss:$20 sps:$4 sm:$0xff]  }
 0x277   :  { %4068 = vmatprep.subr.bf16.mxu1 %v5499_v51  ;;  %v5569_v51 = vld [vmem:[%s7464_s8 + $0x3c8] ss:$20 sps:$4 sm:$0xff]  }
 0x279   :  { %4028 = vmatpush1.bf16.msra.mxu0 %v5494_v56  ;;  %v5574_v56 = vld [vmem:[%s7464_s8 + $0x624] ss:$20 sps:$4 sm:$0xff]  }
 0x27a   :  { %4069 = vmatpush1.bf16.msra.mxu1 %v5497_v3  ;;  %4029 = vmatprep.subr.bf16.mxu0 %v5502_v4  ;;  %v5577_v3 = vld [vmem:[%s7464_s8 + $0x8a4] ss:$20 sps:$4 sm:$0xff]   ;;  %v5572_v4 = vld [vmem:[%s7464_s8 + $0x620] ss:$20 sps:$4 sm:$0xff]  }
 0x27b   :  { %4070 = vmatprep.subr.bf16.mxu1 %v5505_v5  ;;  %v5575_v5 = vld [vmem:[%s7464_s8 + $0x8a0] ss:$20 sps:$4 sm:$0xff]  }
 0x27d   :  { %4030 = vmatpush1.bf16.msra.mxu0 %v5500_v6  ;;  %v5580_v6 = vld [vmem:[%s7464_s8 + $0x5fc] ss:$20 sps:$4 sm:$0xff]  }
 0x27e   :  { %4071 = vmatpush1.bf16.msra.mxu1 %v5503_v7  ;;  %4031 = vmatprep.subr.bf16.mxu0 %v5508_v8  ;;  %v5583_v7 = vld [vmem:[%s7464_s8 + $0x87c] ss:$20 sps:$4 sm:$0xff]   ;;  %v5578_v8 = vld [vmem:[%s7464_s8 + $0x5f8] ss:$20 sps:$4 sm:$0xff]  }
 0x27f   :  { %4072 = vmatprep.subr.bf16.mxu1 %v5511_v11  ;;  %v5581_v11 = vld [vmem:[%s7464_s8 + $0x878] ss:$20 sps:$4 sm:$0xff]  }
 0x281   :  { %4032 = vmatpush1.bf16.msra.mxu0 %v5506_v12  ;;  %v5586_v12 = vld [vmem:[%s7464_s8 + $0x5d4] ss:$20 sps:$4 sm:$0xff]  }
 0x282   :  { %4073 = vmatpush1.bf16.msra.mxu1 %v5509_v15  ;;  %4033 = vmatprep.subr.bf16.mxu0 %v5514_v16  ;;  %v5589_v15 = vld [vmem:[%s7464_s8 + $0x854] ss:$20 sps:$4 sm:$0xff]   ;;  %v5584_v16 = vld [vmem:[%s7464_s8 + $0x5d0] ss:$20 sps:$4 sm:$0xff]  }
 0x283   :  { %4074 = vmatprep.subr.bf16.mxu1 %v5517_v17  ;;  %v5587_v17 = vld [vmem:[%s7464_s8 + $0x850] ss:$20 sps:$4 sm:$0xff]  }
 0x285   :  { %4034 = vmatpush1.bf16.msra.mxu0 %v5512_v19  ;;  %v5592_v19 = vld [vmem:[%s7464_s8 + $0x5ac] ss:$20 sps:$4 sm:$0xff]  }
 0x286   :  { %4075 = vmatpush1.bf16.msra.mxu1 %v5515_v20  ;;  %4035 = vmatprep.subr.bf16.mxu0 %v5520_v21  ;;  %v5595_v20 = vld [vmem:[%s7464_s8 + $0x82c] ss:$20 sps:$4 sm:$0xff]   ;;  %v5590_v21 = vld [vmem:[%s7464_s8 + $0x5a8] ss:$20 sps:$4 sm:$0xff]  }
 0x287   :  { %4076 = vmatprep.subr.bf16.mxu1 %v5523_v25  ;;  %v5593_v25 = vld [vmem:[%s7464_s8 + $0x828] ss:$20 sps:$4 sm:$0xff]  }
 0x289   :  { %4036 = vmatpush1.bf16.msra.mxu0 %v5518_v26  ;;  %v5598_v26 = vld [vmem:[%s7464_s8 + $0x584] ss:$20 sps:$4 sm:$0xff]  }
 0x28a   :  { %4077 = vmatpush1.bf16.msra.mxu1 %v5521_v27  ;;  %4037 = vmatprep.subr.bf16.mxu0 %v5526_v18  ;;  %v5601_v27 = vld [vmem:[%s7464_s8 + $0x804] ss:$20 sps:$4 sm:$0xff]   ;;  %v5596_v18 = vld [vmem:[%s7464_s8 + $0x580] ss:$20 sps:$4 sm:$0xff]  }
 0x28b   :  { %4078 = vmatprep.subr.bf16.mxu1 %v5529_v23  ;;  %v5599_v23 = vld [vmem:[%s7464_s8 + $0x800] ss:$20 sps:$4 sm:$0xff]  }
 0x28d   :  { %4038 = vmatpush2.bf16.msra.mxu0 %v5524_v28  ;;  %v5604_v28 = vld [vmem:[%s7464_s8 + $0x55c] ss:$20 sps:$4 sm:$0xff]  }
 0x28e   :  { %4079 = vmatpush2.bf16.msra.mxu1 %v5527_v30  ;;  %4039 = vmatprep.subr.bf16.mxu0 %v5532_v31  ;;  %v5607_v30 = vld [vmem:[%s7464_s8 + $0x7dc] ss:$20 sps:$4 sm:$0xff]   ;;  %v5602_v31 = vld [vmem:[%s7464_s8 + $0x558] ss:$20 sps:$4 sm:$0xff]  }
 0x28f   :  { %4080 = vmatprep.subr.bf16.mxu1 %v5535_v34  ;;  %v5605_v34 = vld [vmem:[%s7464_s8 + $0x7d8] ss:$20 sps:$4 sm:$0xff]  }
 0x291   :  { %4040 = vmatpush2.bf16.msra.mxu0 %v5530_v37  ;;  %v5610_v37 = vld [vmem:[%s7464_s8 + $0x534] ss:$20 sps:$4 sm:$0xff]  }
 0x292   :  { %4081 = vmatpush2.bf16.msra.mxu1 %v5533_v38  ;;  %4041 = vmatprep.subr.bf16.mxu0 %v5538_v39  ;;  %v5613_v38 = vld [vmem:[%s7464_s8 + $0x7b4] ss:$20 sps:$4 sm:$0xff]   ;;  %v5608_v39 = vld [vmem:[%s7464_s8 + $0x530] ss:$20 sps:$4 sm:$0xff]  }
 0x293   :  { %4082 = vmatprep.subr.bf16.mxu1 %v5541_v44  ;;  %v5611_v44 = vld [vmem:[%s7464_s8 + $0x7b0] ss:$20 sps:$4 sm:$0xff]  }
 0x295   :  { %4042 = vmatpush2.bf16.msra.mxu0 %v5536_v47  ;;  %v5616_v47 = vld [vmem:[%s7464_s8 + $0x50c] ss:$20 sps:$4 sm:$0xff]  }
 0x296   :  { %4083 = vmatpush2.bf16.msra.mxu1 %v5539_v48  ;;  %4043 = vmatprep.subr.bf16.mxu0 %v5544_v52  ;;  %v5619_v48 = vld [vmem:[%s7464_s8 + $0x78c] ss:$20 sps:$4 sm:$0xff]   ;;  %v5614_v52 = vld [vmem:[%s7464_s8 + $0x508] ss:$20 sps:$4 sm:$0xff]  }
 0x297   :  { %4084 = vmatprep.subr.bf16.mxu1 %v5547_v53  ;;  %v5617_v53 = vld [vmem:[%s7464_s8 + $0x788] ss:$20 sps:$4 sm:$0xff]  }
 0x299   :  { %4044 = vmatpush2.bf16.msra.mxu0 %v5542_v54  ;;  %v5622_v54 = vld [vmem:[%s7464_s8 + $0x764] ss:$20 sps:$4 sm:$0xff]  }
 0x29a   :  { %4085 = vmatpush2.bf16.msra.mxu1 %v5545_v29  ;;  %4045 = vmatprep.subr.bf16.mxu0 %v5550_v55  ;;  %v5625_v29 = vld [vmem:[%s7464_s8 + $0x9e4] ss:$20 sps:$4 sm:$0xff]   ;;  %v5620_v55 = vld [vmem:[%s7464_s8 + $0x760] ss:$20 sps:$4 sm:$0xff]  }
 0x29b   :  { %4086 = vmatprep.subr.bf16.mxu1 %v5553_v57  ;;  %v5623_v57 = vld [vmem:[%s7464_s8 + $0x9e0] ss:$20 sps:$4 sm:$0xff]  }
 0x29d   :  { %4046 = vmatpush2.bf16.msra.mxu0 %v5548_v58  ;;  %v5628_v58 = vld [vmem:[%s7464_s8 + $0x73c] ss:$20 sps:$4 sm:$0xff]  }
 0x29e   :  { %4087 = vmatpush2.bf16.msra.mxu1 %v5551_v59  ;;  %4047 = vmatprep.subr.bf16.mxu0 %v5556_v60  ;;  %v5631_v59 = vld [vmem:[%s7464_s8 + $0x9bc] ss:$20 sps:$4 sm:$0xff]   ;;  %v5626_v60 = vld [vmem:[%s7464_s8 + $0x738] ss:$20 sps:$4 sm:$0xff]  }
 0x29f   :  { %4088 = vmatprep.subr.bf16.mxu1 %v5559_v24  ;;  %v5629_v24 = vld [vmem:[%s7464_s8 + $0x9b8] ss:$20 sps:$4 sm:$0xff]  }
 0x2a1   :  { %4048 = vmatpush2.bf16.msra.mxu0 %v5554_v40  ;;  %v5634_v40 = vld [vmem:[%s7464_s8 + $0x714] ss:$20 sps:$4 sm:$0xff]  }
 0x2a2   :  { %4089 = vmatpush2.bf16.msra.mxu1 %v5557_v49  ;;  %4049 = vmatprep.subr.bf16.mxu0 %v5562_v62  ;;  %v5637_v49 = vld [vmem:[%s7464_s8 + $0x994] ss:$20 sps:$4 sm:$0xff]   ;;  %v5632_v62 = vld [vmem:[%s7464_s8 + $0x710] ss:$20 sps:$4 sm:$0xff]  }
 0x2a3   :  { %4090 = vmatprep.subr.bf16.mxu1 %v5565_v63  ;;  %v5635_v63 = vld [vmem:[%s7464_s8 + $0x990] ss:$20 sps:$4 sm:$0xff]  }
 0x2a5   :  { %4050 = vmatpush2.bf16.msra.mxu0 %v5560_v0  ;;  %v5640_v0 = vld [vmem:[%s7464_s8 + $0x6ec] ss:$20 sps:$4 sm:$0xff]  }
 0x2a6   :  { %4091 = vmatpush2.bf16.msra.mxu1 %v5563_v1  ;;  %4051 = vmatprep.subr.bf16.mxu0 %v5568_v45  ;;  %v5643_v1 = vld [vmem:[%s7464_s8 + $0x96c] ss:$20 sps:$4 sm:$0xff]   ;;  %v5638_v45 = vld [vmem:[%s7464_s8 + $0x6e8] ss:$20 sps:$4 sm:$0xff]  }
 0x2a7   :  { %4092 = vmatprep.subr.bf16.mxu1 %v5571_v2  ;;  %v5641_v2 = vld [vmem:[%s7464_s8 + $0x968] ss:$20 sps:$4 sm:$0xff]  }
 0x2a9   :  { %4052 = vmatpush2.bf16.msra.mxu0 %v5566_v50  ;;  %v5646_v50 = vld [vmem:[%s7464_s8 + $0x6c4] ss:$20 sps:$4 sm:$0xff]  }
 0x2aa   :  { %4093 = vmatpush2.bf16.msra.mxu1 %v5569_v51  ;;  %4103 = vmatprep.subr.bf16.mxu0 %v5574_v56  ;;  %v5649_v51 = vld [vmem:[%s7464_s8 + $0x944] ss:$20 sps:$4 sm:$0xff]   ;;  %v5644_v56 = vld [vmem:[%s7464_s8 + $0x6c0] ss:$20 sps:$4 sm:$0xff]  }
 0x2ab   :  { %4144 = vmatprep.subr.bf16.mxu1 %v5577_v3  ;;  %v5647_v3 = vld [vmem:[%s7464_s8 + $0x940] ss:$20 sps:$4 sm:$0xff]  }
 0x2ac   :  { %4054 = vmatmul.mubr.bf16.vlgmr.msra.gmra.mxu0 %v6611_v13 }
 0x2ad   :  { %4095 = vmatmul.mubr.bf16.vlgmr.msra.gmra.mxu1 %v6613_v14  ;;  %4104 = vmatpush1.bf16.msra.mxu0 %v5572_v4  ;;  %v5652_v4 = vld [vmem:[%s7464_s8 + $0x69c] ss:$20 sps:$4 sm:$0xff]  }
 0x2ae   :  { %4135 = vmatprep.mubr.bf16.mxu0 %v6643_v35  ;;  %4145 = vmatpush1.bf16.msra.mxu1 %v5575_v5  ;;  %v5655_v5 = vld [vmem:[%s7464_s8 + $0x91c] ss:$20 sps:$4 sm:$0xff]  }
 0x2af   :  { %4176 = vmatprep.mubr.bf16.mxu1 %v6645_v36  ;;  %4105 = vmatprep.subr.bf16.mxu0 %v5580_v6  ;;  %v5650_v6 = vld [vmem:[%s7464_s8 + $0x698] ss:$20 sps:$4 sm:$0xff]  }
 0x2b0   :  { %4146 = vmatprep.subr.bf16.mxu1 %v5583_v7  ;;  %v5653_v7 = vld [vmem:[%s7464_s8 + $0x918] ss:$20 sps:$4 sm:$0xff]  }
 0x2b1   :  { %4106 = vmatpush1.bf16.msra.mxu0 %v5578_v8  ;;  %v5658_v8 = vld [vmem:[%s7464_s8 + $0x674] ss:$20 sps:$4 sm:$0xff]  }
 0x2b2   :  { %4147 = vmatpush1.bf16.msra.mxu1 %v5581_v11  ;;  %4107 = vmatprep.subr.bf16.mxu0 %v5586_v12  ;;  %v5661_v11 = vld [vmem:[%s7464_s8 + $0x8f4] ss:$20 sps:$4 sm:$0xff]   ;;  %v5656_v12 = vld [vmem:[%s7464_s8 + $0x670] ss:$20 sps:$4 sm:$0xff]  }
 0x2b3   :  { %4148 = vmatprep.subr.bf16.mxu1 %v5589_v15  ;;  %v5659_v15 = vld [vmem:[%s7464_s8 + $0x8f0] ss:$20 sps:$4 sm:$0xff]  }
 0x2b5   :  { %4108 = vmatpush1.bf16.msra.mxu0 %v5584_v16  ;;  %v5664_v16 = vld [vmem:[%s7464_s8 + $0x64c] ss:$20 sps:$4 sm:$0xff]  }
 0x2b6   :  { %4149 = vmatpush1.bf16.msra.mxu1 %v5587_v17  ;;  %4109 = vmatprep.subr.bf16.mxu0 %v5592_v19  ;;  %v5667_v17 = vld [vmem:[%s7464_s8 + $0x8cc] ss:$20 sps:$4 sm:$0xff]   ;;  %v5662_v19 = vld [vmem:[%s7464_s8 + $0x648] ss:$20 sps:$4 sm:$0xff]  }
 0x2b7   :  { %4150 = vmatprep.subr.bf16.mxu1 %v5595_v20  ;;  %v5665_v20 = vld [vmem:[%s7464_s8 + $0x8c8] ss:$20 sps:$4 sm:$0xff]  }
 0x2b9   :  { %4110 = vmatpush1.bf16.msra.mxu0 %v5590_v21  ;;  %v5668_v21 = vld [vmem:[%s7464_s8 + $0x268] ss:$20 sps:$4 sm:$0xff]  }
 0x2ba   :  { %4151 = vmatpush1.bf16.msra.mxu1 %v5593_v25  ;;  %4111 = vmatprep.subr.bf16.mxu0 %v5598_v26  ;;  %v7221_v25 = vld [vmem:[%s7465_s9] sm:$0x1f]  ;;  %v5669_v26 = vld [vmem:[%s7464_s8 + $0x4e8] ss:$20 sps:$4 sm:$0xff]  }
 0x2bb   :  { %4152 = vmatprep.subr.bf16.mxu1 %v5601_v27  ;;  %v2171_v27 = vrot.slane %v7221_v25, %v1488_v41 }
 0x2bd   :  { %4112 = vmatpush1.bf16.msra.mxu0 %v5596_v18  ;;  %v5670_v18 = vld [vmem:[%s7464_s8 + $0x128] ss:$20 sps:$4 sm:$0xff]  }
 0x2be   :  { %4153 = vmatpush1.bf16.msra.mxu1 %v5599_v23  ;;  %4113 = vmatprep.subr.bf16.mxu0 %v5604_v28  ;;  %v5671_v23 = vld [vmem:[%s7464_s8 + $0x3a8] ss:$20 sps:$4 sm:$0xff]   ;;  %v2175_v28 = vrot.slane %v7221_v25, %v1492_v43  ;;  %v5674_v43 = vld [vmem:[%s7464_s8 + $0x100] ss:$20 sps:$4 sm:$0xff]  }
 0x2bf   :  { %4154 = vmatprep.subr.bf16.mxu1 %v5607_v30  ;;  %v5672_v30 = vld [vmem:[%s7464_s8 + $0x240] ss:$20 sps:$4 sm:$0xff]  }
 0x2c1   :  { %4114 = vmatpush1.bf16.msra.mxu0 %v5602_v31 }
 0x2c2   :  { %4155 = vmatpush1.bf16.msra.mxu1 %v5605_v34  ;;  %4115 = vmatprep.subr.bf16.mxu0 %v5610_v37  ;;  %v5673_v34 = vld [vmem:[%s7464_s8 + $0x4c0] ss:$20 sps:$4 sm:$0xff]  }
 0x2c3   :  { %4156 = vmatprep.subr.bf16.mxu1 %v5613_v38 }
 0x2c5   :  { %4116 = vmatpush1.bf16.msra.mxu0 %v5608_v39 }
 0x2c6   :  { %4157 = vmatpush1.bf16.msra.mxu1 %v5611_v44  ;;  %4117 = vmatprep.subr.bf16.mxu0 %v5616_v47  ;;  %v5675_v44 = vld [vmem:[%s7464_s8 + $0x380] ss:$20 sps:$4 sm:$0xff]   ;;  %v5676_v47 = vld [vmem:[%s7464_s8 + $0x218] ss:$20 sps:$4 sm:$0xff]  }
 0x2c7   :  { %4158 = vmatprep.subr.bf16.mxu1 %v5619_v48 }
 0x2c9   :  { %4118 = vmatpush1.bf16.msra.mxu0 %v5614_v52 }
 0x2ca   :  { %4159 = vmatpush1.bf16.msra.mxu1 %v5617_v53  ;;  %4119 = vmatprep.subr.bf16.mxu0 %v5622_v54 }
 0x2cb   :  { %4160 = vmatprep.subr.bf16.mxu1 %v5625_v29 }
 0x2cd   :  { %4120 = vmatpush2.bf16.msra.mxu0 %v5620_v55  ;;  %v5678_v55 = vld [vmem:[%s7464_s8 + $0xd8] ss:$20 sps:$4 sm:$0xff]  }
 0x2ce   :  { %4161 = vmatpush2.bf16.msra.mxu1 %v5623_v57  ;;  %4121 = vmatprep.subr.bf16.mxu0 %v5628_v58 }
 0x2cf   :  { %4162 = vmatprep.subr.bf16.mxu1 %v5631_v59  ;;  %v5680_v59 = vld [vmem:[%s7464_s8 + $0x1f0] ss:$20 sps:$4 sm:$0xff]  }
 0x2d1   :  { %4122 = vmatpush2.bf16.msra.mxu0 %v5626_v60  ;;  %v5681_v60 = vld [vmem:[%s7464_s8 + $0x470] ss:$20 sps:$4 sm:$0xff]  }
 0x2d2   :  { %4163 = vmatpush2.bf16.msra.mxu1 %v5629_v24  ;;  %4123 = vmatprep.subr.bf16.mxu0 %v5634_v40  ;;  %v5682_v24 = vld [vmem:[%s7464_s8 + $0xb0] ss:$20 sps:$4 sm:$0xff]  }
 0x2d3   :  { %4164 = vmatprep.subr.bf16.mxu1 %v5637_v49  ;;  %v5683_v40 = vld [vmem:[%s7464_s8 + $0x330] ss:$20 sps:$4 sm:$0xff]   ;;  %v5684_v49 = vld [vmem:[%s7464_s8 + $0x1c8] ss:$20 sps:$4 sm:$0xff]  }
 0x2d5   :  { %4124 = vmatpush2.bf16.msra.mxu0 %v5632_v62  ;;  %v5685_v62 = vld [vmem:[%s7464_s8 + $0x448] ss:$20 sps:$4 sm:$0xff]  }
 0x2d6   :  { %4165 = vmatpush2.bf16.msra.mxu1 %v5635_v63  ;;  %4125 = vmatprep.subr.bf16.mxu0 %v5640_v0  ;;  %v5686_v63 = vld [vmem:[%s7464_s8 + $0x88] ss:$20 sps:$4 sm:$0xff]  }
 0x2d7   :  { %4166 = vmatprep.subr.bf16.mxu1 %v5643_v1  ;;  %v5687_v0 = vld [vmem:[%s7464_s8 + $0x308] ss:$20 sps:$4 sm:$0xff]   ;;  %v5688_v1 = vld [vmem:[%s7464_s8 + $0x1a0] ss:$20 sps:$4 sm:$0xff]  }
 0x2d9   :  { %4126 = vmatpush2.bf16.msra.mxu0 %v5638_v45  ;;  %v5689_v45 = vld [vmem:[%s7464_s8 + $0x420] ss:$20 sps:$4 sm:$0xff]  }
 0x2da   :  { %4167 = vmatpush2.bf16.msra.mxu1 %v5641_v2  ;;  %4127 = vmatprep.subr.bf16.mxu0 %v5646_v50  ;;  %v5690_v2 = vld [vmem:[%s7464_s8 + $0x60] ss:$20 sps:$4 sm:$0xff]  }
 0x2db   :  { %4168 = vmatprep.subr.bf16.mxu1 %v5649_v51  ;;  %v5691_v50 = vld [vmem:[%s7464_s8 + $0x2e0] ss:$20 sps:$4 sm:$0xff]   ;;  %v5692_v51 = vld [vmem:[%s7464_s8 + $0x178] ss:$20 sps:$4 sm:$0xff]  }
 0x2dd   :  { %4128 = vmatpush2.bf16.msra.mxu0 %v5644_v56  ;;  %v5693_v56 = vld [vmem:[%s7464_s8 + $0x3f8] ss:$20 sps:$4 sm:$0xff]  }
 0x2de   :  { %4169 = vmatpush2.bf16.msra.mxu1 %v5647_v3  ;;  %4129 = vmatprep.subr.bf16.mxu0 %v5652_v4  ;;  %v5694_v3 = vld [vmem:[%s7464_s8 + $0x38] ss:$20 sps:$4 sm:$0xff]  }
 0x2df   :  { %4170 = vmatprep.subr.bf16.mxu1 %v5655_v5  ;;  %v5695_v4 = vld [vmem:[%s7464_s8 + $0x2b8] ss:$20 sps:$4 sm:$0xff]   ;;  %v5696_v5 = vld [vmem:[%s7464_s8 + $0x150] ss:$20 sps:$4 sm:$0xff]  }
 0x2e1   :  { %4130 = vmatpush2.bf16.msra.mxu0 %v5650_v6  ;;  %v5697_v6 = vld [vmem:[%s7464_s8 + $0x3d0] ss:$20 sps:$4 sm:$0xff]  }
 0x2e2   :  { %4171 = vmatpush2.bf16.msra.mxu1 %v5653_v7  ;;  %4131 = vmatprep.subr.bf16.mxu0 %v5658_v8  ;;  %v5698_v7 = vld [vmem:[%s7464_s8 + $0x10] ss:$20 sps:$4 sm:$0xff]  }
 0x2e3   :  { %4172 = vmatprep.subr.bf16.mxu1 %v5661_v11  ;;  %v5699_v8 = vld [vmem:[%s7464_s8 + $0x290] ss:$20 sps:$4 sm:$0xff]   ;;  %v5700_v11 = vld [vmem:[%s7464_s8 + $0x768] ss:$20 sps:$4 sm:$0xff]  }
 0x2e5   :  { %4132 = vmatpush2.bf16.msra.mxu0 %v5656_v12  ;;  %v5701_v12 = vld [vmem:[%s7464_s8 + $0x9e8] ss:$20 sps:$4 sm:$0xff]  }
 0x2e6   :  { %4173 = vmatpush2.bf16.msra.mxu1 %v5659_v15  ;;  %4133 = vmatprep.subr.bf16.mxu0 %v5664_v16  ;;  %v5702_v15 = vld [vmem:[%s7464_s8 + $0x628] ss:$20 sps:$4 sm:$0xff]  }
 0x2e7   :  { %4174 = vmatprep.subr.bf16.mxu1 %v5667_v17  ;;  %v5703_v16 = vld [vmem:[%s7464_s8 + $0x8a8] ss:$20 sps:$4 sm:$0xff]   ;;  %v5704_v17 = vld [vmem:[%s7464_s8 + $0x740] ss:$20 sps:$4 sm:$0xff]  }
 0x2e9   :  { %4134 = vmatpush2.bf16.msra.mxu0 %v5662_v19  ;;  %v5705_v19 = vld [vmem:[%s7464_s8 + $0x9c0] ss:$20 sps:$4 sm:$0xff]  }
 0x2ea   :  { %4175 = vmatpush2.bf16.msra.mxu1 %v5665_v20  ;;  %5062 = vmatprep.subr.bf16.mxu0 %v5668_v21  ;;  %v5706_v20 = vld [vmem:[%s7464_s8 + $0x600] ss:$20 sps:$4 sm:$0xff]  }
 0x2eb   :  { %5084 = vmatprep.subr.bf16.mxu1 %v5669_v26  ;;  %v5707_v21 = vld [vmem:[%s7464_s8 + $0x880] ss:$20 sps:$4 sm:$0xff]   ;;  %v5711_v26 = vld [vmem:[%s7464_s8 + $0x858] ss:$20 sps:$4 sm:$0xff]  }
 0x2ec   :  { %4136 = vmatmul.mubr.bf16.vlgmr.msra.gmra.mxu0 %v6828_v61  ;;  %v3891_v41 = vpop.f32.mrf.mxu0  ;;  %v3932_v31 = vpop.f32.mrf.mxu1 }
 0x2ed   :  { %4177 = vmatmul.mubr.bf16.vlgmr.msra.gmra.mxu1 %v6830_v22  ;;  %v3892_v37 = vadd.f32 %v3891_v41, %v2171_v27  ;;  %5063 = vmatpush3.bf16.msra.mxu0 %v5670_v18  ;;  %v5713_v27 = vld [vmem:[%s7464_s8 + $0x970] ss:$20 sps:$4 sm:$0xff]   ;;  %v5718_v41 = vld [vmem:[%s7464_s8 + $0x588] ss:$20 sps:$4 sm:$0xff]  }
 0x2ee   :  { %4217 = vmatprep.mubr.bf16.mxu0 %v6601_v9  ;;  %5085 = vmatpush3.bf16.msra.mxu1 %v5671_v23  ;;  %v3893_v38 = vpop.f32.mrf.mxu0  ;;  %v3934_v39 = vpop.f32.mrf.mxu1  ;;  %v5677_v9 = vld [vmem:[%s7464_s8 + $0x498] ss:$20 sps:$4 sm:$0xff]   ;;  %v5714_v18 = vld [vmem:[%s7464_s8 + $0x5b0] ss:$20 sps:$4 sm:$0xff]  }
 0x2ef   :  { %v7256_v48 = vadd.f32 %v3932_v31, %v3892_v37  ;;  %4257 = vmatprep.mubr.bf16.mxu1 %v6603_v10  ;;  %v3894_v52 = vadd.f32 %v3893_v38, %v2175_v28  ;;  %5064 = vmatprep.subr.bf16.mxu0 %v5672_v30  ;;  %v5679_v10 = vld [vmem:[%s7464_s8 + $0x358] ss:$20 sps:$4 sm:$0xff]   ;;  %v5715_v23 = vld [vmem:[%s7464_s8 + $0x830] ss:$20 sps:$4 sm:$0xff]   ;;  %v5716_v28 = vld [vmem:[%s7464_s8 + $0x6c8] ss:$20 sps:$4 sm:$0xff]  }
 0x2f0   :  { %5086 = vmatprep.subr.bf16.mxu1 %v5673_v34  ;;  %v3895_v53 = vpop.f32.mrf.mxu0  ;;  %v3936_v54 = vpop.f32.mrf.mxu1  ;;  %v5717_v30 = vld [vmem:[%s7464_s8 + $0x948] ss:$20 sps:$4 sm:$0xff]   ;;  %v5720_v34 = vld [vmem:[%s7464_s8 + $0x6a0] ss:$20 sps:$4 sm:$0xff]  }
 0x2f1   :  { %v7262_v29 = vadd.f32 %v3934_v39, %v3894_v52  ;;  %5065 = vmatpush3.bf16.msra.mxu0 %v5674_v43  ;;  %v5719_v31 = vld [vmem:[%s7464_s8 + $0x808] ss:$20 sps:$4 sm:$0xff]   ;;  %v5721_v37 = vld [vmem:[%s7464_s8 + $0x920] ss:$20 sps:$4 sm:$0xff]   ;;  %v5724_v39 = vld [vmem:[%s7464_s8 + $0x678] ss:$20 sps:$4 sm:$0xff]  }
 0x2f2   :  { %5087 = vmatpush3.bf16.msra.mxu1 %v5675_v44  ;;  %v3896_v57 = vpop.f32.mrf.mxu0  ;;  %v3937_v58 = vpop.f32.mrf.mxu1  ;;  %5066 = vmatprep.subr.bf16.mxu0 %v5676_v47  ;;  %v5722_v43 = vld [vmem:[%s7464_s8 + $0x560] ss:$20 sps:$4 sm:$0xff]   ;;  %v5725_v44 = vld [vmem:[%s7464_s8 + $0x8f8] ss:$20 sps:$4 sm:$0xff]   ;;  %v5729_v53 = vld [vmem:[%s7464_s8 + $0x8d0] ss:$20 sps:$4 sm:$0xff]  }
 0x2f3   :  { %5088 = vmatprep.subr.bf16.mxu1 %v5677_v9  ;;  %v5723_v38 = vld [vmem:[%s7464_s8 + $0x7e0] ss:$20 sps:$4 sm:$0xff]   ;;  %v5726_v47 = vld [vmem:[%s7464_s8 + $0x538] ss:$20 sps:$4 sm:$0xff]   ;;  %v5728_v9 = vld [vmem:[%s7464_s8 + $0x650] ss:$20 sps:$4 sm:$0xff]  }
 0x2f4   :  { %v5727_v52 = vld [vmem:[%s7464_s8 + $0x7b8] ss:$20 sps:$4 sm:$0xff]   ;;  %v5730_v54 = vld [vmem:[%s7464_s8 + $0x510] ss:$20 sps:$4 sm:$0xff]  }
 0x2f5   :  { %5067 = vmatpush3.bf16.msra.mxu0 %v5678_v55  ;;  %v5731_v55 = vld [vmem:[%s7464_s8 + $0x790] ss:$20 sps:$4 sm:$0xff]  }
 0x2f6   :  { %5089 = vmatpush3.bf16.msra.mxu1 %v5679_v10  ;;  %5068 = vmatprep.subr.bf16.mxu0 %v5680_v59 }
 0x2f7   :  { %5090 = vmatprep.subr.bf16.mxu1 %v5681_v60 }
 0x2f9   :  { %5069 = vmatpush3.bf16.msra.mxu0 %v5682_v24 }
 0x2fa   :  { %5091 = vmatpush3.bf16.msra.mxu1 %v5683_v40  ;;  %5070 = vmatprep.subr.bf16.mxu0 %v5684_v49 }
 0x2fb   :  { %5092 = vmatprep.subr.bf16.mxu1 %v5685_v62 }
 0x2fd   :  { %5071 = vmatpush3.bf16.msra.mxu0 %v5686_v63 }
 0x2fe   :  { %5093 = vmatpush3.bf16.msra.mxu1 %v5687_v0  ;;  %5072 = vmatprep.subr.bf16.mxu0 %v5688_v1 }
 0x2ff   :  { %5094 = vmatprep.subr.bf16.mxu1 %v5689_v45 }
 0x301   :  { %5073 = vmatpush3.bf16.msra.mxu0 %v5690_v2 }
 0x302   :  { %5095 = vmatpush3.bf16.msra.mxu1 %v5691_v50  ;;  %5074 = vmatprep.subr.bf16.mxu0 %v5692_v51 }
 0x303   :  { %5096 = vmatprep.subr.bf16.mxu1 %v5693_v56 }
 0x305   :  { %5075 = vmatpush3.bf16.msra.mxu0 %v5694_v3 }
 0x306   :  { %5097 = vmatpush3.bf16.msra.mxu1 %v5695_v4  ;;  %5076 = vmatprep.subr.bf16.mxu0 %v5696_v5 }
 0x307   :  { %5098 = vmatprep.subr.bf16.mxu1 %v5697_v6 }
 0x309   :  { %5077 = vmatpush3.bf16.msra.mxu0 %v5698_v7 }
 0x30a   :  { %5099 = vmatpush3.bf16.msra.mxu1 %v5699_v8  ;;  %5106 = vmatprep.subr.bf16.mxu0 %v5700_v11 }
 0x30b   :  { %5128 = vmatprep.subr.bf16.mxu1 %v5701_v12 }
 0x30c   :  { %4218 = vmatmul.mubr.bf16.vlgmr.msra.gmra.mxu0 %v6611_v13  ;;  %v5708_v13 = vld [vmem:[%s7464_s8 + $0x718] ss:$20 sps:$4 sm:$0xff]  }
 0x30d   :  { %4258 = vmatmul.mubr.bf16.vlgmr.msra.gmra.mxu1 %v6613_v14  ;;  %5107 = vmatpush3.bf16.msra.mxu0 %v5702_v15  ;;  %v5709_v14 = vld [vmem:[%s7464_s8 + $0x998] ss:$20 sps:$4 sm:$0xff]  }
 0x30e   :  { %4297 = vmatprep.mubr.bf16.mxu0 %v6643_v35  ;;  %5129 = vmatpush3.bf16.msra.mxu1 %v5703_v16  ;;  %v5710_v35 = vld [vmem:[%s7464_s8 + $0x5d8] ss:$20 sps:$4 sm:$0xff]  }
 0x30f   :  { %4337 = vmatprep.mubr.bf16.mxu1 %v6645_v36  ;;  %5108 = vmatprep.subr.bf16.mxu0 %v5704_v17  ;;  %v5712_v36 = vld [vmem:[%s7464_s8 + $0x6f0] ss:$20 sps:$4 sm:$0xff]   ;;  %s5780_s8 = smov [#allocation2]  }
 0x310   :  { %5130 = vmatprep.subr.bf16.mxu1 %v5705_v19  ;;  %s4390_s18 = sshll.u32 %s5780_s8, 4  ;;  %s4391_s18 = int_to_ptr.vmem [resolvable:$true] %s4390_s18 }
 0x311   :  { %5109 = vmatpush3.bf16.msra.mxu0 %v5706_v20  ;;  %s5734_s20 = scalar_lea.vmem %s4391_s18, 32  ;;  %p5739_p1 = scmp.lt.s32.totalorder %s4391_s18, %s4391_s18 }
 0x312   :  { %5131 = vmatpush3.bf16.msra.mxu1 %v5707_v21  ;;  %5110 = vmatprep.subr.bf16.mxu0 %v5708_v13  ;;  %p5735_p0 = scmp.ne.s32.totalorder %s4391_s18, %s5734_s20  ;;  %p5740_p2 = scmp.lt.s32.totalorder %s5734_s20, %s5734_s20 }
 0x313   :  { %5132 = vmatprep.subr.bf16.mxu1 %v5709_v14 }
 0x314   :  { %p5741_p3 = por %p5740_p2, %p5739_p1 }
 0x315   :  { %5111 = vmatpush3.bf16.msra.mxu0 %v5710_v35 }
 0x316   :  { %5133 = vmatpush3.bf16.msra.mxu1 %v5711_v26  ;;  %5112 = vmatprep.subr.bf16.mxu0 %v5712_v36  ;;  %p5742_p4 = pnand %p5741_p3, %p5735_p0 }
 0x317   :  { %5134 = vmatprep.subr.bf16.mxu1 %v5713_v27 }
 0x319   :  { %5113 = vmatpush3.bf16.msra.mxu0 %v5714_v18 }
 0x31a   :  { %5135 = vmatpush3.bf16.msra.mxu1 %v5715_v23  ;;  %5114 = vmatprep.subr.bf16.mxu0 %v5716_v28 }
 0x31b   :  { %5136 = vmatprep.subr.bf16.mxu1 %v5717_v30 }
 0x31d   :  { %5115 = vmatpush3.bf16.msra.mxu0 %v5718_v41 }
 0x31e   :  { %5137 = vmatpush3.bf16.msra.mxu1 %v5719_v31  ;;  %5116 = vmatprep.subr.bf16.mxu0 %v5720_v34 }
 0x31f   :  { %5138 = vmatprep.subr.bf16.mxu1 %v5721_v37 }
 0x321   :  { %5117 = vmatpush3.bf16.msra.mxu0 %v5722_v43 }
 0x322   :  { %5139 = vmatpush3.bf16.msra.mxu1 %v5723_v38  ;;  %5118 = vmatprep.subr.bf16.mxu0 %v5724_v39 }
 0x323   :  { %5140 = vmatprep.subr.bf16.mxu1 %v5725_v44 }
 0x325   :  { %5119 = vmatpush3.bf16.msra.mxu0 %v5726_v47 }
 0x326   :  { %5141 = vmatpush3.bf16.msra.mxu1 %v5727_v52  ;;  %5120 = vmatprep.subr.bf16.mxu0 %v5728_v9 }
 0x327   :  { %5142 = vmatprep.subr.bf16.mxu1 %v5729_v53 }
 0x329   :  { %5121 = vmatpush3.bf16.msra.mxu0 %v5730_v54 }
 0x32a   :  { %5143 = vmatpush3.bf16.msra.mxu1 %v5731_v55 }
 0x32c   :  { %v3973_v57 = vpop.f32.mrf.mxu0  ;;  %v4014_v58 = vpop.f32.mrf.mxu1  ;;  %4298 = vmatmul.mubr.bf16.vlgmr.msra.gmra.mxu0 %v6828_v61 }
 0x32d   :  { %v3974_v10 = vadd.f32 %v3973_v57, %v7256_v48  ;;  %4338 = vmatmul.mubr.bf16.vlgmr.msra.gmra.mxu1 %v6830_v22 }
 0x32e   :  { %v3975_v59 = vpop.f32.mrf.mxu0  ;;  %v4016_v60 = vpop.f32.mrf.mxu1 }
 0x32f   :  { %v4015_v24 = vadd.f32 %v4014_v58, %v3974_v10  ;;  %v3976_v40 = vadd.f32 %v3975_v59, %v7262_v29 }
 0x330   :  { %v3977_v49 = vpop.f32.mrf.mxu0  ;;  %v4018_v62 = vpop.f32.mrf.mxu1 }
 0x331   :  { %v4017_v63 = vadd.f32 %v4016_v60, %v3976_v40  ;;  %v4345_v45 = vmax.f32 %v4015_v24, 0.0 }
 0x332   :  { %v3978_v0 = vpop.f32.mrf.mxu0  ;;  %v4019_v1 = vpop.f32.mrf.mxu1 }
 0x333   :  { %v4346_v2 = vmax.f32 %v4017_v63, 0.0 }
 0x335   :  { %v4355_v50 = vcombine.low %v4345_v45, %v4346_v2 }
 0x36c   :  { %v4055_v51 = vpop.f32.mrf.mxu0 }
 0x36d   :  { %v4096_v56 = vpop.f32.mrf.mxu1 }
 0x36e   :  { %v4057_v61 = vpop.f32.mrf.mxu0 }
 0x36f   :  { %v4098_v3 = vpop.f32.mrf.mxu1 }
 0x370   :  { %v4059_v48 = vpop.f32.mrf.mxu0 }
 0x371   :  { %v4100_v4 = vpop.f32.mrf.mxu1 }
 0x372   :  { %v4060_v22 = vpop.f32.mrf.mxu0 }
 0x373   :  { %v4101_v5 = vpop.f32.mrf.mxu1 }
 0x374   :  { %5745 = shalt.err (!%p5742_p4)
}
 0x375   :  { %4393 = dma.vmem_to_hbm [thread:$0]  %s4391_s18, 32, %s7466_s10, [#allocation3]  }
 0x376   :  { %s5754_s1 = scalar_lea.vmem %s4401_s19, 32  ;;  %p5759_p6 = scmp.lt.s32.totalorder %s4401_s19, %s4401_s19 }
 0x377   :  { %p5755_p5 = scmp.ne.s32.totalorder %s4401_s19, %s5754_s1  ;;  %p5760_p7 = scmp.lt.s32.totalorder %s5754_s1, %s5754_s1 }
 0x379   :  { %p5761_p8 = por %p5760_p7, %p5759_p6 }
 0x37b   :  { %p5762_p9 = pnand %p5761_p8, %p5755_p5 }
 0x37d   :  { %5765 = shalt.err (!%p5762_p9)
}
 0x37e   :  { %4403 = dma.vmem_to_hbm [thread:$0]  %s4401_s19, 32, %s7467_s11, [#allocation5]   ;;  %v2179_v29 = vrot.slane %v7221_v25, %v1496_v42  ;;  %v2183_v6 = vrot.slane %v7221_v25, %v1500_v46  ;;  %v5782_v11 = vmov 1983009808   ;;  %v2187_v54 = vrot.slane %v7221_v25, %v1504_v32 }
 0x37f   :  { %v4358_v12 = vunpack.c.l.s4 %v5782_v11  ;;  %vm4382_vm2 = vcmask 517120  }
 0x380   :  { %v4056_v7 = vadd.f32 %v4055_v51, %v2179_v29  ;;  %v4058_v8 = vadd.f32 %v4057_v61, %v2183_v6 }
 0x381   :  { %v4359_v13 = vunpack.c.0.s8 %v4358_v12 }
 0x382   :  { %v4097_v15 = vadd.f32 %v4096_v56, %v4056_v7  ;;  %v4099_v17 = vadd.f32 %v4098_v3, %v4058_v8 }
 0x383   :  { %v4362_v46 = vsub.s32 %v4359_v13, %v5944_v33 }
 0x385   :  { %v4363_v31 = vrot.slane %v4355_v50, %v4362_v46 }
 0x3ac   :  { %v4137_v16 = vpop.f32.mrf.mxu0 }
 0x3ad   :  { %v4138_v19 = vadd.f32 %v4137_v16, %v4097_v15  ;;  %v4178_v20 = vpop.f32.mrf.mxu1 }
 0x3ae   :  { %v4139_v21 = vpop.f32.mrf.mxu0 }
 0x3af   :  { %v4179_v14 = vadd.f32 %v4178_v20, %v4138_v19  ;;  %v4140_v35 = vadd.f32 %v4139_v21, %v4099_v17  ;;  %v4180_v26 = vpop.f32.mrf.mxu1 }
 0x3b0   :  { %v4141_v36 = vpop.f32.mrf.mxu0 }
 0x3b1   :  { %v4181_v42 = vadd.f32 %v4180_v26, %v4140_v35  ;;  %v4182_v27 = vpop.f32.mrf.mxu1  ;;  %v4347_v23 = vmax.f32 %v4179_v14, 0.0 }
 0x3b2   :  { %v4142_v18 = vpop.f32.mrf.mxu0 }
 0x3b3   :  { %v4348_v28 = vmax.f32 %v4181_v42, 0.0  ;;  %v4183_v30 = vpop.f32.mrf.mxu1 }
 0x3b5   :  { %v4356_v41 = vcombine.low %v4347_v23, %v4348_v28 }
 0x3b7   :  { %v4370_v34 = vrot.slane %v4356_v41, %v4362_v46 }
 0x3b9   :  { %v4371_v37 = vcombine.low %v4363_v31, %v4370_v34 }
 0x3bb   :  { %4381 = vst [vmem:[%s7468_s12] sm:$0xff] %v4371_v37 }
 0x3cc   :  { %v5078_v43 = vpop.f32.mrf.mxu0 }
 0x3cd   :  { %v5100_v38 = vpop.f32.mrf.mxu1 }
 0x3ce   :  { %v5079_v39 = vpop.f32.mrf.mxu0 }
 0x3cf   :  { %v5101_v44 = vpop.f32.mrf.mxu1  ;;  %v5080_v55 = vadd.f32 %v5079_v39, %v5078_v43 }
 0x3d0   :  { %v5081_v47 = vpop.f32.mrf.mxu0  ;;  %v5102_v10 = vadd.f32 %v5101_v44, %v5100_v38 }
 0x3d1   :  { %v5103_v52 = vpop.f32.mrf.mxu1  ;;  %v4220_v57 = vadd.f32 %v5080_v55, %v2187_v54 }
 0x3d2   :  { %v5082_v9 = vpop.f32.mrf.mxu0 }
 0x3d3   :  { %v5104_v53 = vpop.f32.mrf.mxu1  ;;  %v4260_v24 = vadd.f32 %v5102_v10, %v4220_v57 }
 0x3ec   :  { %v5122_v58 = vpop.f32.mrf.mxu0 }
 0x3ed   :  { %v5144_v59 = vpop.f32.mrf.mxu1 }
 0x3ee   :  { %v5123_v60 = vpop.f32.mrf.mxu0 }
 0x3ef   :  { %v5124_v40 = vadd.f32 %v5123_v60, %v5122_v58  ;;  %v5145_v49 = vpop.f32.mrf.mxu1 }
 0x3f0   :  { %v5125_v62 = vpop.f32.mrf.mxu0  ;;  %v5146_v0 = vadd.f32 %v5145_v49, %v5144_v59 }
 0x3f1   :  { %v4300_v63 = vadd.f32 %v5124_v40, %v4260_v24  ;;  %v5147_v1 = vpop.f32.mrf.mxu1 }
 0x3f2   :  { %v5126_v45 = vpop.f32.mrf.mxu0 }
 0x3f3   :  { %v4340_v2 = vadd.f32 %v5146_v0, %v4300_v63  ;;  %v5148_v50 = vpop.f32.mrf.mxu1 }
 0x3f5   :  { %v4349_v51 = vmax.f32 %v4340_v2, 0.0 }
 0x3f7   :  { %v4378_v33 = vrot.slane %v4349_v51, %v4362_v46 }
 0x3f9   :  { %4383 = vst.msk [vmem:[%s7468_s12 + $0x8] sm:$0x3] %vm4382_vm2, %v4378_v33 }
 0x3fa   :  { %5774 = dma.done.wait [#allocation3], 32  }
 0x3fb   :  { %5775 = vsyncadd [#allocation3], 4294967264 }
 0x3fc   :  { %5776 = dma.done.wait [#allocation5], 32  }
 0x3fd   :  { %5777 = vsyncadd [#allocation5], 4294967264 }
 0x3fe   :  { %4414 = vsyncpa [#allocation3], 1 }
 0x3ff   :  { %4415 = vsyncpa [#allocation5], 1 }

// kernel: vae_forward.12
= control target key start
LH: loop header
LB: loop body
LE: loop exit
PB: predicated region body
PF: predicated region fallthrough
CT: control target
= control target key end

     0   :  { %v721_v1 = vmov 0   ;;  %vm536_vm0 = vcmask 1043456   ;;  %vm537_vm1 = vcmask 588804   ;;  %s958_s1 = inlined_call_operand.vmem [shape: bf16[512,200], index: 1, kind: input, shape index: {}]   ;;  %s959_s0 = inlined_call_operand.vmem [shape: bf16[16,512], index: 0, kind: input, shape index: {}]   ;;  %s960_s2 = inlined_call_operand.vmem [shape: f32[16,1], index: 2, kind: input, shape index: {}]   ;;  %s961_s3 = inlined_call_operand.vmem [shape: bf16[16,200], index: 3, kind: output, shape index: {}]  }
   0x1   :  { %v619_v0 = vld [vmem:[%s958_s1 + $0x74] ss:$8 sps:$4 sm:$0xff]   ;;  %618 = vset.pattern.permute.xlu0 %v721_v1  ;;  %v623_v3 = vld [vmem:[%s958_s1 + $0x70] ss:$8 sps:$4 sm:$0xff]   ;;  %v625_v5 = vld [vmem:[%s958_s1 + $0x64] ss:$8 sps:$4 sm:$0xff]  }
   0x2   :  { %v621_v2 = vld [vmem:[%s958_s1 + $0x174] ss:$8 sps:$4 sm:$0xff]   ;;  %434 = vmatprep.subr.bf16.mxu0 %v619_v0  ;;  %v624_v4 = vld [vmem:[%s958_s1 + $0x170] ss:$8 sps:$4 sm:$0xff]   ;;  %v627_v6 = vld [vmem:[%s958_s1 + $0x164] ss:$8 sps:$4 sm:$0xff]  }
   0x3   :  { %477 = vmatprep.subr.bf16.mxu1 %v621_v2  ;;  %435 = vmatpush1.bf16.msra.mxu0 %v623_v3  ;;  %v629_v7 = vld [vmem:[%s958_s1 + $0x60] ss:$8 sps:$4 sm:$0xff]   ;;  %v631_v9 = vld [vmem:[%s958_s1 + $0x54] ss:$8 sps:$4 sm:$0xff]   ;;  %v635_v11 = vld [vmem:[%s958_s1 + $0x50] ss:$8 sps:$4 sm:$0xff]  }
   0x4   :  { %478 = vmatpush1.bf16.msra.mxu1 %v624_v4  ;;  %436 = vmatprep.subr.bf16.mxu0 %v625_v5  ;;  %v630_v8 = vld [vmem:[%s958_s1 + $0x160] ss:$8 sps:$4 sm:$0xff]   ;;  %v633_v10 = vld [vmem:[%s958_s1 + $0x154] ss:$8 sps:$4 sm:$0xff]   ;;  %v636_v12 = vld [vmem:[%s958_s1 + $0x150] ss:$8 sps:$4 sm:$0xff]  }
   0x5   :  { %479 = vmatprep.subr.bf16.mxu1 %v627_v6  ;;  %v637_v13 = vld [vmem:[%s958_s1 + $0x44] ss:$8 sps:$4 sm:$0xff]   ;;  %v641_v15 = vld [vmem:[%s958_s1 + $0x40] ss:$8 sps:$4 sm:$0xff]   ;;  %v643_v17 = vld [vmem:[%s958_s1 + $0x34] ss:$8 sps:$4 sm:$0xff]  }
   0x6   :  { %v639_v14 = vld [vmem:[%s958_s1 + $0x144] ss:$8 sps:$4 sm:$0xff]   ;;  %v642_v16 = vld [vmem:[%s958_s1 + $0x140] ss:$8 sps:$4 sm:$0xff]   ;;  %v645_v18 = vld [vmem:[%s958_s1 + $0x134] ss:$8 sps:$4 sm:$0xff]  }
   0x7   :  { %437 = vmatpush1.bf16.msra.mxu0 %v629_v7  ;;  %v647_v19 = vld [vmem:[%s958_s1 + $0x30] ss:$8 sps:$4 sm:$0xff]   ;;  %v649_v21 = vld [vmem:[%s958_s1 + $0x24] ss:$8 sps:$4 sm:$0xff]   ;;  %v653_v23 = vld [vmem:[%s958_s1 + $0x20] ss:$8 sps:$4 sm:$0xff]  }
   0x8   :  { %480 = vmatpush1.bf16.msra.mxu1 %v630_v8  ;;  %438 = vmatprep.subr.bf16.mxu0 %v631_v9  ;;  %v648_v20 = vld [vmem:[%s958_s1 + $0x130] ss:$8 sps:$4 sm:$0xff]   ;;  %v651_v22 = vld [vmem:[%s958_s1 + $0x124] ss:$8 sps:$4 sm:$0xff]   ;;  %v654_v24 = vld [vmem:[%s958_s1 + $0x120] ss:$8 sps:$4 sm:$0xff]  }
   0x9   :  { %481 = vmatprep.subr.bf16.mxu1 %v633_v10  ;;  %v655_v25 = vld [vmem:[%s958_s1 + $0x14] ss:$8 sps:$4 sm:$0xff]   ;;  %v659_v27 = vld [vmem:[%s958_s1 + $0x10] ss:$8 sps:$4 sm:$0xff]   ;;  %v661_v29 = vld [vmem:[%s958_s1 + $0x4] ss:$8 sps:$4 sm:$0xff]  }
   0xa   :  { %v657_v26 = vld [vmem:[%s958_s1 + $0x114] ss:$8 sps:$4 sm:$0xff]   ;;  %v660_v28 = vld [vmem:[%s958_s1 + $0x110] ss:$8 sps:$4 sm:$0xff]   ;;  %v663_v30 = vld [vmem:[%s958_s1 + $0x104] ss:$8 sps:$4 sm:$0xff]  }
   0xb   :  { %439 = vmatpush1.bf16.msra.mxu0 %v635_v11  ;;  %v665_v31 = vld [vmem:[%s958_s1] ss:$8 sps:$4 sm:$0xff]   ;;  %v667_v33 = vld [vmem:[%s958_s1 + $0xf4] ss:$8 sps:$4 sm:$0xff]   ;;  %v671_v35 = vld [vmem:[%s958_s1 + $0xf0] ss:$8 sps:$4 sm:$0xff]  }
   0xc   :  { %482 = vmatpush1.bf16.msra.mxu1 %v636_v12  ;;  %440 = vmatprep.subr.bf16.mxu0 %v637_v13  ;;  %v666_v32 = vld [vmem:[%s958_s1 + $0x100] ss:$8 sps:$4 sm:$0xff]   ;;  %v669_v34 = vld [vmem:[%s958_s1 + $0x1f4] ss:$8 sps:$4 sm:$0xff]   ;;  %v672_v36 = vld [vmem:[%s958_s1 + $0x1f0] ss:$8 sps:$4 sm:$0xff]  }
   0xd   :  { %483 = vmatprep.subr.bf16.mxu1 %v639_v14  ;;  %v673_v37 = vld [vmem:[%s958_s1 + $0xe4] ss:$8 sps:$4 sm:$0xff]   ;;  %v677_v39 = vld [vmem:[%s958_s1 + $0xe0] ss:$8 sps:$4 sm:$0xff]   ;;  %v679_v41 = vld [vmem:[%s958_s1 + $0xd4] ss:$8 sps:$4 sm:$0xff]  }
   0xe   :  { %v675_v38 = vld [vmem:[%s958_s1 + $0x1e4] ss:$8 sps:$4 sm:$0xff]   ;;  %v678_v40 = vld [vmem:[%s958_s1 + $0x1e0] ss:$8 sps:$4 sm:$0xff]   ;;  %v681_v42 = vld [vmem:[%s958_s1 + $0x1d4] ss:$8 sps:$4 sm:$0xff]  }
   0xf   :  { %441 = vmatpush1.bf16.msra.mxu0 %v641_v15  ;;  %v683_v43 = vld [vmem:[%s958_s1 + $0xd0] ss:$8 sps:$4 sm:$0xff]   ;;  %v685_v45 = vld [vmem:[%s958_s1 + $0xc4] ss:$8 sps:$4 sm:$0xff]   ;;  %v689_v47 = vld [vmem:[%s958_s1 + $0xc0] ss:$8 sps:$4 sm:$0xff]  }
  0x10   :  { %484 = vmatpush1.bf16.msra.mxu1 %v642_v16  ;;  %442 = vmatprep.subr.bf16.mxu0 %v643_v17  ;;  %v684_v44 = vld [vmem:[%s958_s1 + $0x1d0] ss:$8 sps:$4 sm:$0xff]   ;;  %v687_v46 = vld [vmem:[%s958_s1 + $0x1c4] ss:$8 sps:$4 sm:$0xff]   ;;  %v690_v48 = vld [vmem:[%s958_s1 + $0x1c0] ss:$8 sps:$4 sm:$0xff]  }
  0x11   :  { %485 = vmatprep.subr.bf16.mxu1 %v645_v18  ;;  %v717_v49 = vld [vmem:[%s959_s0 + $0x4] ss:$16 sps:$4 sm:$0xff]   ;;  %v720_v52 = vld [vmem:[%s959_s0 + $0xc] ss:$16 sps:$4 sm:$0xff]   ;;  %v695_v55 = vld [vmem:[%s958_s1 + $0xb0] ss:$8 sps:$4 sm:$0xff]  }
  0x12   :  { %v691_v50 = vld [vmem:[%s958_s1 + $0xb4] ss:$8 sps:$4 sm:$0xff]   ;;  %v82_v53 = vld [vmem:[%s960_s2] sm:$0xff]  ;;  %466 = vmatprep.mubr.bf16.mxu0 %v717_v49  ;;  %509 = vmatprep.mubr.bf16.mxu1 %v720_v52  ;;  %v83_v54 = vld [vmem:[%s960_s2 + $0x8] sm:$0xff] }
  0x13   :  { %443 = vmatpush1.bf16.msra.mxu0 %v647_v19  ;;  %v693_v51 = vld [vmem:[%s958_s1 + $0x1b4] ss:$8 sps:$4 sm:$0xff]   ;;  %86 = vperm.xlu0 %618, %v82_v53   ;;  %v696_v56 = vld [vmem:[%s958_s1 + $0x1b0] ss:$8 sps:$4 sm:$0xff]   ;;  %v697_v57 = vld [vmem:[%s958_s1 + $0xa4] ss:$8 sps:$4 sm:$0xff]  }
  0x14   :  { %486 = vmatpush1.bf16.msra.mxu1 %v648_v20  ;;  %444 = vmatprep.subr.bf16.mxu0 %v649_v21  ;;  %v699_v58 = vld [vmem:[%s958_s1 + $0x1a4] ss:$8 sps:$4 sm:$0xff]   ;;  %v701_v59 = vld [vmem:[%s958_s1 + $0xa0] ss:$8 sps:$4 sm:$0xff]   ;;  %v703_v61 = vld [vmem:[%s958_s1 + $0x94] ss:$8 sps:$4 sm:$0xff]  }
  0x15   :  { %487 = vmatprep.subr.bf16.mxu1 %v651_v22  ;;  %v702_v60 = vld [vmem:[%s958_s1 + $0x1a0] ss:$8 sps:$4 sm:$0xff]   ;;  %v705_v62 = vld [vmem:[%s958_s1 + $0x194] ss:$8 sps:$4 sm:$0xff]   ;;  %v707_v63 = vld [vmem:[%s958_s1 + $0x90] ss:$8 sps:$4 sm:$0xff]  }
  0x16   :  { %v708_v0 = vld [vmem:[%s958_s1 + $0x190] ss:$8 sps:$4 sm:$0xff]   ;;  %v709_v1 = vld [vmem:[%s958_s1 + $0x84] ss:$8 sps:$4 sm:$0xff]   ;;  %v713_v3 = vld [vmem:[%s958_s1 + $0x80] ss:$8 sps:$4 sm:$0xff]  }
  0x17   :  { %445 = vmatpush1.bf16.msra.mxu0 %v653_v23  ;;  %91 = vperm.xlu0 %618, %v83_v54   ;;  %v711_v2 = vld [vmem:[%s958_s1 + $0x184] ss:$8 sps:$4 sm:$0xff]   ;;  %v714_v4 = vld [vmem:[%s958_s1 + $0x180] ss:$8 sps:$4 sm:$0xff]   ;;  %vm538_vm2 = vmor %vm537_vm1, %vm536_vm0 }
  0x18   :  { %488 = vmatpush1.bf16.msra.mxu1 %v654_v24  ;;  %446 = vmatprep.subr.bf16.mxu0 %v655_v25  ;;  %v715_v5 = vld [vmem:[%s959_s0] ss:$16 sps:$4 sm:$0xff]   ;;  %v718_v6 = vld [vmem:[%s959_s0 + $0x8] ss:$16 sps:$4 sm:$0xff]  }
  0x19   :  { %489 = vmatprep.subr.bf16.mxu1 %v657_v26 }
  0x1b   :  { %447 = vmatpush1.bf16.msra.mxu0 %v659_v27 }
  0x1c   :  { %490 = vmatpush1.bf16.msra.mxu1 %v660_v28  ;;  %448 = vmatprep.subr.bf16.mxu0 %v661_v29 }
  0x1d   :  { %491 = vmatprep.subr.bf16.mxu1 %v663_v30 }
  0x1f   :  { %449 = vmatpush1.bf16.msra.mxu0 %v665_v31 }
  0x20   :  { %492 = vmatpush1.bf16.msra.mxu1 %v666_v32  ;;  %450 = vmatprep.subr.bf16.mxu0 %v667_v33 }
  0x21   :  { %493 = vmatprep.subr.bf16.mxu1 %v669_v34 }
  0x23   :  { %451 = vmatpush2.bf16.msra.mxu0 %v671_v35 }
  0x24   :  { %494 = vmatpush2.bf16.msra.mxu1 %v672_v36  ;;  %452 = vmatprep.subr.bf16.mxu0 %v673_v37 }
  0x25   :  { %495 = vmatprep.subr.bf16.mxu1 %v675_v38 }
  0x27   :  { %453 = vmatpush2.bf16.msra.mxu0 %v677_v39 }
  0x28   :  { %496 = vmatpush2.bf16.msra.mxu1 %v678_v40  ;;  %454 = vmatprep.subr.bf16.mxu0 %v679_v41 }
  0x29   :  { %497 = vmatprep.subr.bf16.mxu1 %v681_v42 }
  0x2b   :  { %455 = vmatpush2.bf16.msra.mxu0 %v683_v43 }
  0x2c   :  { %498 = vmatpush2.bf16.msra.mxu1 %v684_v44  ;;  %456 = vmatprep.subr.bf16.mxu0 %v685_v45 }
  0x2d   :  { %499 = vmatprep.subr.bf16.mxu1 %v687_v46 }
  0x2f   :  { %457 = vmatpush2.bf16.msra.mxu0 %v689_v47 }
  0x30   :  { %500 = vmatpush2.bf16.msra.mxu1 %v690_v48  ;;  %458 = vmatprep.subr.bf16.mxu0 %v691_v50 }
  0x31   :  { %501 = vmatprep.subr.bf16.mxu1 %v693_v51 }
  0x33   :  { %459 = vmatpush2.bf16.msra.mxu0 %v695_v55 }
  0x34   :  { %502 = vmatpush2.bf16.msra.mxu1 %v696_v56  ;;  %460 = vmatprep.subr.bf16.mxu0 %v697_v57 }
  0x35   :  { %503 = vmatprep.subr.bf16.mxu1 %v699_v58 }
  0x37   :  { %461 = vmatpush2.bf16.msra.mxu0 %v701_v59 }
  0x38   :  { %504 = vmatpush2.bf16.msra.mxu1 %v702_v60  ;;  %462 = vmatprep.subr.bf16.mxu0 %v703_v61 }
  0x39   :  { %505 = vmatprep.subr.bf16.mxu1 %v705_v62 }
  0x3b   :  { %463 = vmatpush2.bf16.msra.mxu0 %v707_v63 }
  0x3c   :  { %506 = vmatpush2.bf16.msra.mxu1 %v708_v0  ;;  %464 = vmatprep.subr.bf16.mxu0 %v709_v1 }
  0x3d   :  { %507 = vmatprep.subr.bf16.mxu1 %v711_v2 }
  0x3f   :  { %465 = vmatpush2.bf16.msra.mxu0 %v713_v3 }
  0x40   :  { %508 = vmatpush2.bf16.msra.mxu1 %v714_v4 }
  0x42   :  { %467 = vmatmul.mubr.bf16.vlgmr.msra.gmra.mxu0 %v715_v5 }
  0x43   :  { %510 = vmatmul.mubr.bf16.vlgmr.msra.gmra.mxu1 %v718_v6 }
  0x8e   :  { %v87_v7 = vpop.permute.xlu0 %86 }
  0x92   :  { %v92_v14 = vpop.permute.xlu0 %91 }
 0x102   :  { %v468_v8 = vpop.f32.mrf.mxu0 }
 0x103   :  { %v511_v9 = vpop.f32.mrf.mxu1  ;;  %v469_v10 = vadd.f32 %v468_v8, %v87_v7 }
 0x104   :  { %v470_v11 = vpop.f32.mrf.mxu0 }
 0x105   :  { %v513_v12 = vpop.f32.mrf.mxu1  ;;  %v512_v13 = vadd.f32 %v511_v9, %v469_v10  ;;  %v471_v15 = vadd.f32 %v470_v11, %v87_v7 }
 0x106   :  { %v472_v16 = vpop.f32.mrf.mxu0 }
 0x107   :  { %v515_v17 = vpop.f32.mrf.mxu1  ;;  %v514_v18 = vadd.f32 %v513_v12, %v471_v15  ;;  %v473_v19 = vadd.f32 %v472_v16, %v92_v14  ;;  %v520_v21 = vmax.f32 %v512_v13, 0.0 }
 0x108   :  { %v474_v20 = vpop.f32.mrf.mxu0 }
 0x109   :  { %v521_v22 = vmax.f32 %v514_v18, 0.0  ;;  %v516_v23 = vadd.f32 %v515_v17, %v473_v19  ;;  %v475_v24 = vadd.f32 %v474_v20, %v92_v14  ;;  %v517_v25 = vpop.f32.mrf.mxu1 }
 0x10b   :  { %v615_v26 = vpack.c.bf16 %v521_v22, %v520_v21  ;;  %v518_v27 = vadd.f32 %v517_v25, %v475_v24  ;;  %v522_v28 = vmax.f32 %v516_v23, 0.0 }
 0x10d   :  { %539 = vst.msk [vmem:[%s961_s3] sm:$0xff] %vm538_vm2, %v615_v26  ;;  %v523_v29 = vmax.f32 %v518_v27, 0.0 }
 0x10f   :  { %v616_v30 = vpack.c.bf16 %v523_v29, %v522_v28 }
 0x111   :  { %540 = vst.msk [vmem:[%s961_s3 + $0x8] sm:$0xff] %vm538_vm2, %v616_v30 }

// kernel: vae_forward.13
= control target key start
LH: loop header
LB: loop body
LE: loop exit
PB: predicated region body
PF: predicated region fallthrough
CT: control target
= control target key end

     0   :  { %v1353_v9 = vmov 0   ;;  %v152_v40 = vlaneseq  ;;  %v1354_v41 = vmov 1966171168   ;;  %s1742_s1 = inlined_call_operand.vmem [shape: bf16[256,800], index: 1, kind: input, shape index: {}]   ;;  %s1743_s2 = inlined_call_operand.<no memory space> [shape: f32[1,1], index: 2, kind: input, shape index: {}]   ;;  %s1744_s0 = inlined_call_operand.vmem [shape: bf16[1,256], index: 0, kind: input, shape index: {}]   ;;  %s1745_s3 = inlined_call_operand.vmem [shape: f32[1,800], index: 3, kind: output, shape index: {}]  }
   0x1   :  { %v1165_v0 = vld [vmem:[%s1742_s1 + $0x18c] ss:$28 sps:$4 sm:$0xff]   ;;  %v8_v1 = vstv %s1743_s2  ;;  %v1167_v2 = vld [vmem:[%s1742_s1 + $0x194] ss:$28 sps:$4 sm:$0xff]   ;;  %v1173_v6 = vld [vmem:[%s1742_s1 + $0x15c] ss:$28 sps:$4 sm:$0xff]   ;;  %1164 = vset.pattern.permute.xlu0 %v1353_v9  ;;  %v166_v42 = vunpack.c.l.s4 %v1354_v41 }
   0x2   :  { %9 = vst [vmem:[#allocation2] sm:$0x1] %v8_v1  ;;  %757 = vmatprep.subr.bf16.mxu0 %v1165_v0  ;;  %v1169_v3 = vld [vmem:[%s1742_s1 + $0x188] ss:$28 sps:$4 sm:$0xff]   ;;  %v1170_v4 = vld [vmem:[%s1742_s1 + $0x190] ss:$28 sps:$4 sm:$0xff]   ;;  %798 = vmatprep.subr.bf16.mxu1 %v1167_v2 }
   0x3   :  { %v1171_v5 = vld [vmem:[%s1742_s1 + $0x154] ss:$28 sps:$4 sm:$0xff]   ;;  %758 = vmatpush1.bf16.msra.mxu0 %v1169_v3  ;;  %799 = vmatpush1.bf16.msra.mxu1 %v1170_v4  ;;  %v1177_v10 = vld [vmem:[%s1742_s1 + $0x11c] ss:$28 sps:$4 sm:$0xff]   ;;  %v1179_v11 = vld [vmem:[%s1742_s1 + $0x124] ss:$28 sps:$4 sm:$0xff]   ;;  %v167_v48 = vunpack.c.0.s8 %v166_v42 }
   0x4   :  { %v1175_v7 = vld [vmem:[%s1742_s1 + $0x150] ss:$28 sps:$4 sm:$0xff]   ;;  %759 = vmatprep.subr.bf16.mxu0 %v1171_v5  ;;  %v1176_v8 = vld [vmem:[%s1742_s1 + $0x158] ss:$28 sps:$4 sm:$0xff]   ;;  %800 = vmatprep.subr.bf16.mxu1 %v1173_v6  ;;  %v1182_v13 = vld [vmem:[%s1742_s1 + $0x120] ss:$28 sps:$4 sm:$0xff]  }
   0x5   :  { %v1181_v12 = vld [vmem:[%s1742_s1 + $0x118] ss:$28 sps:$4 sm:$0xff]   ;;  %v1183_v14 = vld [vmem:[%s1742_s1 + $0xe4] ss:$28 sps:$4 sm:$0xff]   ;;  %v1185_v15 = vld [vmem:[%s1742_s1 + $0xec] ss:$28 sps:$4 sm:$0xff]  }
   0x6   :  { %v1187_v16 = vld [vmem:[%s1742_s1 + $0xe0] ss:$28 sps:$4 sm:$0xff]   ;;  %v1188_v17 = vld [vmem:[%s1742_s1 + $0xe8] ss:$28 sps:$4 sm:$0xff]   ;;  %v1191_v19 = vld [vmem:[%s1742_s1 + $0xb4] ss:$28 sps:$4 sm:$0xff]  }
   0x7   :  { %760 = vmatpush1.bf16.msra.mxu0 %v1175_v7  ;;  %801 = vmatpush1.bf16.msra.mxu1 %v1176_v8  ;;  %v1189_v18 = vld [vmem:[%s1742_s1 + $0xac] ss:$28 sps:$4 sm:$0xff]   ;;  %v1195_v22 = vld [vmem:[%s1742_s1 + $0x74] ss:$28 sps:$4 sm:$0xff]   ;;  %v1197_v23 = vld [vmem:[%s1742_s1 + $0x7c] ss:$28 sps:$4 sm:$0xff]  }
   0x8   :  { %761 = vmatprep.subr.bf16.mxu0 %v1177_v10  ;;  %802 = vmatprep.subr.bf16.mxu1 %v1179_v11  ;;  %v1193_v20 = vld [vmem:[%s1742_s1 + $0xa8] ss:$28 sps:$4 sm:$0xff]   ;;  %v1194_v21 = vld [vmem:[%s1742_s1 + $0xb0] ss:$28 sps:$4 sm:$0xff]   ;;  %v1200_v25 = vld [vmem:[%s1742_s1 + $0x78] ss:$28 sps:$4 sm:$0xff]  }
   0x9   :  { %v1199_v24 = vld [vmem:[%s1742_s1 + $0x70] ss:$28 sps:$4 sm:$0xff]   ;;  %v1201_v26 = vld [vmem:[%s1742_s1 + $0x3c] ss:$28 sps:$4 sm:$0xff]   ;;  %v1203_v27 = vld [vmem:[%s1742_s1 + $0x44] ss:$28 sps:$4 sm:$0xff]  }
   0xa   :  { %v1205_v28 = vld [vmem:[%s1742_s1 + $0x38] ss:$28 sps:$4 sm:$0xff]   ;;  %v1206_v29 = vld [vmem:[%s1742_s1 + $0x40] ss:$28 sps:$4 sm:$0xff]   ;;  %v1209_v31 = vld [vmem:[%s1742_s1 + $0xc] ss:$28 sps:$4 sm:$0xff]  }
   0xb   :  { %762 = vmatpush1.bf16.msra.mxu0 %v1181_v12  ;;  %803 = vmatpush1.bf16.msra.mxu1 %v1182_v13  ;;  %v1207_v30 = vld [vmem:[%s1742_s1 + $0x4] ss:$28 sps:$4 sm:$0xff]   ;;  %v1213_v34 = vld [vmem:[%s1742_s1 + $0x34c] ss:$28 sps:$4 sm:$0xff]   ;;  %v1215_v35 = vld [vmem:[%s1742_s1 + $0x354] ss:$28 sps:$4 sm:$0xff]  }
   0xc   :  { %763 = vmatprep.subr.bf16.mxu0 %v1183_v14  ;;  %804 = vmatprep.subr.bf16.mxu1 %v1185_v15  ;;  %v1211_v32 = vld [vmem:[%s1742_s1] ss:$28 sps:$4 sm:$0xff]   ;;  %v1212_v33 = vld [vmem:[%s1742_s1 + $0x8] ss:$28 sps:$4 sm:$0xff]   ;;  %v1218_v37 = vld [vmem:[%s1742_s1 + $0x350] ss:$28 sps:$4 sm:$0xff]  }
   0xd   :  { %v1217_v36 = vld [vmem:[%s1742_s1 + $0x348] ss:$28 sps:$4 sm:$0xff]   ;;  %v1219_v38 = vld [vmem:[%s1742_s1 + $0x314] ss:$28 sps:$4 sm:$0xff]   ;;  %v1221_v39 = vld [vmem:[%s1742_s1 + $0x31c] ss:$28 sps:$4 sm:$0xff]  }
   0xe   :  { %v1223_v43 = vld [vmem:[%s1742_s1 + $0x310] ss:$28 sps:$4 sm:$0xff]   ;;  %v1224_v44 = vld [vmem:[%s1742_s1 + $0x318] ss:$28 sps:$4 sm:$0xff]   ;;  %v1227_v46 = vld [vmem:[%s1742_s1 + $0x2e4] ss:$28 sps:$4 sm:$0xff]  }
   0xf   :  { %764 = vmatpush1.bf16.msra.mxu0 %v1187_v16  ;;  %805 = vmatpush1.bf16.msra.mxu1 %v1188_v17  ;;  %v1225_v45 = vld [vmem:[%s1742_s1 + $0x2dc] ss:$28 sps:$4 sm:$0xff]   ;;  %v1505_v47 = vshrl.u32 %v152_v40, 7  ;;  %v1231_v51 = vld [vmem:[%s1742_s1 + $0x2a4] ss:$28 sps:$4 sm:$0xff]   ;;  %vm1020_vm0 = vcmp.lt.s32.totalorder %v152_v40, 800 }
  0x10   :  { %765 = vmatprep.subr.bf16.mxu0 %v1189_v18  ;;  %806 = vmatprep.subr.bf16.mxu1 %v1191_v19  ;;  %v1229_v49 = vld [vmem:[%s1742_s1 + $0x2d8] ss:$28 sps:$4 sm:$0xff]   ;;  %v1230_v50 = vld [vmem:[%s1742_s1 + $0x2e0] ss:$28 sps:$4 sm:$0xff]   ;;  %v1233_v52 = vld [vmem:[%s1742_s1 + $0x2ac] ss:$28 sps:$4 sm:$0xff]  }
  0x11   :  { %v1520_v53 = vsub.s32 %v167_v48, %v1505_v47  ;;  %v1027_v54 = vld.sshfl [vmem:[%s1744_s0] sm:$0x11 pattern:$0x75316420]  ;;  %v1236_v56 = vld [vmem:[%s1742_s1 + $0x2a8] ss:$28 sps:$4 sm:$0xff]  }
  0x12   :  { %v1235_v55 = vld [vmem:[%s1742_s1 + $0x2a0] ss:$28 sps:$4 sm:$0xff]   ;;  %v164_v57 = vcombine.high %v1027_v54, %v1027_v54  ;;  %v1237_v58 = vld [vmem:[%s1742_s1 + $0x26c] ss:$28 sps:$4 sm:$0xff]   ;;  %v1239_v59 = vld [vmem:[%s1742_s1 + $0x274] ss:$28 sps:$4 sm:$0xff]  }
  0x13   :  { %766 = vmatpush1.bf16.msra.mxu0 %v1193_v20  ;;  %807 = vmatpush1.bf16.msra.mxu1 %v1194_v21  ;;  %v1241_v61 = vld [vmem:[%s1742_s1 + $0x268] ss:$28 sps:$4 sm:$0xff]   ;;  %v1242_v62 = vld [vmem:[%s1742_s1 + $0x270] ss:$28 sps:$4 sm:$0xff]   ;;  %v1245_v0 = vld [vmem:[%s1742_s1 + $0x23c] ss:$28 sps:$4 sm:$0xff]   ;;  %v1587_v13 = vrot.slane %v1027_v54, %v1520_v53 }
  0x14   :  { %767 = vmatprep.subr.bf16.mxu0 %v1195_v22  ;;  %808 = vmatprep.subr.bf16.mxu1 %v1197_v23  ;;  %v178_v60 = vrot.slane %v164_v57, %v1520_v53  ;;  %v1243_v63 = vld [vmem:[%s1742_s1 + $0x234] ss:$28 sps:$4 sm:$0xff]   ;;  %v1249_v3 = vld [vmem:[%s1742_s1 + $0x1fc] ss:$28 sps:$4 sm:$0xff]   ;;  %v1251_v4 = vld [vmem:[%s1742_s1 + $0x204] ss:$28 sps:$4 sm:$0xff]  }
  0x15   :  { %v1247_v1 = vld [vmem:[%s1742_s1 + $0x230] ss:$28 sps:$4 sm:$0xff]   ;;  %v1248_v2 = vld [vmem:[%s1742_s1 + $0x238] ss:$28 sps:$4 sm:$0xff]   ;;  %v1254_v6 = vld [vmem:[%s1742_s1 + $0x200] ss:$28 sps:$4 sm:$0xff]  }
  0x16   :  { %789 = vmatprep.mubr.bf16.mxu0 %v178_v60  ;;  %830 = vmatprep.mubr.bf16.mxu1 %v178_v60  ;;  %v1253_v5 = vld [vmem:[%s1742_s1 + $0x1f8] ss:$28 sps:$4 sm:$0xff]   ;;  %v1255_v7 = vld [vmem:[%s1742_s1 + $0x1c4] ss:$28 sps:$4 sm:$0xff]   ;;  %v1257_v8 = vld [vmem:[%s1742_s1 + $0x1cc] ss:$28 sps:$4 sm:$0xff]  }
  0x17   :  { %768 = vmatpush1.bf16.msra.mxu0 %v1199_v24  ;;  %809 = vmatpush1.bf16.msra.mxu1 %v1200_v25  ;;  %v1259_v9 = vld [vmem:[%s1742_s1 + $0x1c0] ss:$28 sps:$4 sm:$0xff]   ;;  %v1260_v10 = vld [vmem:[%s1742_s1 + $0x1c8] ss:$28 sps:$4 sm:$0xff]   ;;  %v1261_v14 = vld [vmem:[%s1742_s1 + $0x198] ss:$28 sps:$4 sm:$0xff]  }
  0x18   :  { %769 = vmatprep.subr.bf16.mxu0 %v1201_v26  ;;  %810 = vmatprep.subr.bf16.mxu1 %v1203_v27  ;;  %v1263_v11 = vld [vmem:[%s1742_s1 + $0x19c] ss:$28 sps:$4 sm:$0xff]   ;;  %v1266_v16 = vld [vmem:[%s1742_s1 + $0x164] ss:$28 sps:$4 sm:$0xff]   ;;  %v1269_v19 = vld [vmem:[%s1742_s1 + $0x12c] ss:$28 sps:$4 sm:$0xff]  }
  0x19   :  { %v1282_v12 = vld [vmem:[%s1742_s1 + $0x360] ss:$28 sps:$4 sm:$0xff]   ;;  %v1287_v17 = vld [vmem:[%s1742_s1 + $0x328] ss:$28 sps:$4 sm:$0xff]   ;;  %v1292_v21 = vld [vmem:[%s1742_s1 + $0x2f0] ss:$28 sps:$4 sm:$0xff]  }
  0x1a   :  { %v1283_v15 = vld [vmem:[%s1742_s1 + $0x1a0] ss:$28 sps:$4 sm:$0xff]   ;;  %v1288_v20 = vld [vmem:[%s1742_s1 + $0x168] ss:$28 sps:$4 sm:$0xff]   ;;  %v1272_v23 = vld [vmem:[%s1742_s1 + $0xf4] ss:$28 sps:$4 sm:$0xff]  }
  0x1b   :  { %770 = vmatpush1.bf16.msra.mxu0 %v1205_v28  ;;  %811 = vmatpush1.bf16.msra.mxu1 %v1206_v29  ;;  %v1264_v18 = vld [vmem:[%s1742_s1 + $0x160] ss:$28 sps:$4 sm:$0xff]   ;;  %v1267_v22 = vld [vmem:[%s1742_s1 + $0x128] ss:$28 sps:$4 sm:$0xff]   ;;  %v1293_v24 = vld [vmem:[%s1742_s1 + $0x130] ss:$28 sps:$4 sm:$0xff]  }
  0x1c   :  { %771 = vmatprep.subr.bf16.mxu0 %v1207_v30  ;;  %812 = vmatprep.subr.bf16.mxu1 %v1209_v31  ;;  %v1297_v25 = vld [vmem:[%s1742_s1 + $0x2b8] ss:$28 sps:$4 sm:$0xff]   ;;  %v1270_v26 = vld [vmem:[%s1742_s1 + $0xf0] ss:$28 sps:$4 sm:$0xff]   ;;  %v1302_v29 = vld [vmem:[%s1742_s1 + $0x280] ss:$28 sps:$4 sm:$0xff]  }
  0x1d   :  { %v1275_v27 = vld [vmem:[%s1742_s1 + $0xbc] ss:$28 sps:$4 sm:$0xff]   ;;  %v1313_v41 = vld [vmem:[%s1742_s1 + $0x50] ss:$28 sps:$4 sm:$0xff]  }
  0x1e   :  { %v1298_v28 = vld [vmem:[%s1742_s1 + $0xf8] ss:$28 sps:$4 sm:$0xff]   ;;  %v1303_v31 = vld [vmem:[%s1742_s1 + $0xc0] ss:$28 sps:$4 sm:$0xff]  }
  0x1f   :  { %772 = vmatpush1.bf16.msra.mxu0 %v1211_v32  ;;  %813 = vmatpush1.bf16.msra.mxu1 %v1212_v33  ;;  %v1273_v30 = vld [vmem:[%s1742_s1 + $0xb8] ss:$28 sps:$4 sm:$0xff]   ;;  %v146_v32 = vld [vmem:[#allocation2] sm:$0x1] }
  0x20   :  { %773 = vmatprep.subr.bf16.mxu0 %v1213_v34  ;;  %814 = vmatprep.subr.bf16.mxu1 %v1215_v35  ;;  %v1278_v33 = vld [vmem:[%s1742_s1 + $0x84] ss:$28 sps:$4 sm:$0xff]   ;;  %v1286_v42 = vld [vmem:[%s1742_s1 + $0x14] ss:$28 sps:$4 sm:$0xff]  }
  0x21   :  { %v1307_v34 = vld [vmem:[%s1742_s1 + $0x248] ss:$28 sps:$4 sm:$0xff]   ;;  %149 = vperm.xlu0 %1164, %v146_v32   ;;  %v1276_v35 = vld [vmem:[%s1742_s1 + $0x80] ss:$28 sps:$4 sm:$0xff]   ;;  %v1289_v48 = vld [vmem:[%s1742_s1 + $0x358] ss:$28 sps:$4 sm:$0xff]  }
  0x22   :  { %v1306_v54 = vld [vmem:[%s1742_s1 + $0x2b4] ss:$28 sps:$4 sm:$0xff]  }
  0x23   :  { %774 = vmatpush2.bf16.msra.mxu0 %v1217_v36  ;;  %815 = vmatpush2.bf16.msra.mxu1 %v1218_v37  ;;  %v1308_v36 = vld [vmem:[%s1742_s1 + $0x88] ss:$28 sps:$4 sm:$0xff]   ;;  %v1309_v57 = vld [vmem:[%s1742_s1 + $0x278] ss:$28 sps:$4 sm:$0xff]  }
  0x24   :  { %775 = vmatprep.subr.bf16.mxu0 %v1219_v38  ;;  %816 = vmatprep.subr.bf16.mxu1 %v1221_v39  ;;  %v1281_v37 = vld [vmem:[%s1742_s1 + $0x4c] ss:$28 sps:$4 sm:$0xff]  }
  0x25   :  { %v1312_v38 = vld [vmem:[%s1742_s1 + $0x210] ss:$28 sps:$4 sm:$0xff]   ;;  %v1279_v39 = vld [vmem:[%s1742_s1 + $0x48] ss:$28 sps:$4 sm:$0xff]  }
  0x27   :  { %776 = vmatpush2.bf16.msra.mxu0 %v1223_v43  ;;  %817 = vmatpush2.bf16.msra.mxu1 %v1224_v44  ;;  %v1317_v43 = vld [vmem:[%s1742_s1 + $0x1d8] ss:$28 sps:$4 sm:$0xff]   ;;  %v1284_v44 = vld [vmem:[%s1742_s1 + $0x10] ss:$28 sps:$4 sm:$0xff]  }
  0x28   :  { %777 = vmatprep.subr.bf16.mxu0 %v1225_v45  ;;  %818 = vmatprep.subr.bf16.mxu1 %v1227_v46  ;;  %v1318_v45 = vld [vmem:[%s1742_s1 + $0x18] ss:$28 sps:$4 sm:$0xff]  }
  0x29   :  { %v1291_v46 = vld [vmem:[%s1742_s1 + $0x35c] ss:$28 sps:$4 sm:$0xff]  }
  0x2b   :  { %778 = vmatpush2.bf16.msra.mxu0 %v1229_v49  ;;  %819 = vmatpush2.bf16.msra.mxu1 %v1230_v50  ;;  %v1296_v49 = vld [vmem:[%s1742_s1 + $0x324] ss:$28 sps:$4 sm:$0xff]  }
  0x2c   :  { %779 = vmatprep.subr.bf16.mxu0 %v1231_v51  ;;  %820 = vmatprep.subr.bf16.mxu1 %v1233_v52  ;;  %v1294_v50 = vld [vmem:[%s1742_s1 + $0x320] ss:$28 sps:$4 sm:$0xff]   ;;  %v1301_v51 = vld [vmem:[%s1742_s1 + $0x2ec] ss:$28 sps:$4 sm:$0xff]  }
  0x2d   :  { %v1299_v52 = vld [vmem:[%s1742_s1 + $0x2e8] ss:$28 sps:$4 sm:$0xff]  }
  0x2f   :  { %780 = vmatpush2.bf16.msra.mxu0 %v1235_v55  ;;  %821 = vmatpush2.bf16.msra.mxu1 %v1236_v56  ;;  %v1304_v55 = vld [vmem:[%s1742_s1 + $0x2b0] ss:$28 sps:$4 sm:$0xff]   ;;  %v1311_v56 = vld [vmem:[%s1742_s1 + $0x27c] ss:$28 sps:$4 sm:$0xff]  }
  0x30   :  { %781 = vmatprep.subr.bf16.mxu0 %v1237_v58  ;;  %822 = vmatprep.subr.bf16.mxu1 %v1239_v59  ;;  %v1316_v58 = vld [vmem:[%s1742_s1 + $0x244] ss:$28 sps:$4 sm:$0xff]  }
  0x31   :  { %v1314_v59 = vld [vmem:[%s1742_s1 + $0x240] ss:$28 sps:$4 sm:$0xff]  }
  0x33   :  { %782 = vmatpush2.bf16.msra.mxu0 %v1241_v61  ;;  %823 = vmatpush2.bf16.msra.mxu1 %v1242_v62  ;;  %v1319_v61 = vld [vmem:[%s1742_s1 + $0x208] ss:$28 sps:$4 sm:$0xff]   ;;  %v1324_v62 = vld [vmem:[%s1742_s1 + $0x1d4] ss:$28 sps:$4 sm:$0xff]  }
  0x34   :  { %783 = vmatprep.subr.bf16.mxu0 %v1243_v63  ;;  %824 = vmatprep.subr.bf16.mxu1 %v1245_v0  ;;  %v1322_v63 = vld [vmem:[%s1742_s1 + $0x1d0] ss:$28 sps:$4 sm:$0xff]   ;;  %v154_v0 = vsub.s32 0, %v1505_v47 }
  0x37   :  { %784 = vmatpush2.bf16.msra.mxu0 %v1247_v1  ;;  %825 = vmatpush2.bf16.msra.mxu1 %v1248_v2 }
  0x38   :  { %785 = vmatprep.subr.bf16.mxu0 %v1249_v3  ;;  %826 = vmatprep.subr.bf16.mxu1 %v1251_v4 }
  0x3b   :  { %786 = vmatpush2.bf16.msra.mxu0 %v1253_v5  ;;  %827 = vmatpush2.bf16.msra.mxu1 %v1254_v6 }
  0x3c   :  { %787 = vmatprep.subr.bf16.mxu0 %v1255_v7  ;;  %828 = vmatprep.subr.bf16.mxu1 %v1257_v8 }
  0x3f   :  { %788 = vmatpush2.bf16.msra.mxu0 %v1259_v9  ;;  %829 = vmatpush2.bf16.msra.mxu1 %v1260_v10 }
  0x40   :  { %839 = vmatprep.subr.bf16.mxu0 %v1263_v11  ;;  %1140 = vmatprep.subr.bf16.mxu1 %v1282_v12 }
  0x42   :  { %790 = vmatmul.mubr.bf16.vlgmr.msra.gmra.mxu0 %v1587_v13  ;;  %831 = vmatmul.mubr.bf16.vlgmr.msra.gmra.mxu1 %v1587_v13 }
  0x43   :  { %840 = vmatpush1.bf16.msra.mxu0 %v1261_v14  ;;  %1141 = vmatpush3.bf16.msra.mxu1 %v1283_v15 }
  0x44   :  { %841 = vmatprep.subr.bf16.mxu0 %v1266_v16  ;;  %1142 = vmatprep.subr.bf16.mxu1 %v1287_v17 }
  0x45   :  { %912 = vmatprep.mubr.bf16.mxu1 %v178_v60  ;;  %871 = vmatprep.mubr.bf16.mxu0 %v178_v60  ;;  %v1321_v60 = vld [vmem:[%s1742_s1 + $0x20c] ss:$28 sps:$4 sm:$0xff]  }
  0x47   :  { %842 = vmatpush1.bf16.msra.mxu0 %v1264_v18  ;;  %1143 = vmatpush3.bf16.msra.mxu1 %v1288_v20 }
  0x48   :  { %843 = vmatprep.subr.bf16.mxu0 %v1269_v19  ;;  %1144 = vmatprep.subr.bf16.mxu1 %v1292_v21 }
  0x4b   :  { %844 = vmatpush1.bf16.msra.mxu0 %v1267_v22  ;;  %1145 = vmatpush3.bf16.msra.mxu1 %v1293_v24 }
  0x4c   :  { %845 = vmatprep.subr.bf16.mxu0 %v1272_v23  ;;  %1146 = vmatprep.subr.bf16.mxu1 %v1297_v25 }
  0x4f   :  { %846 = vmatpush1.bf16.msra.mxu0 %v1270_v26  ;;  %1147 = vmatpush3.bf16.msra.mxu1 %v1298_v28 }
  0x50   :  { %847 = vmatprep.subr.bf16.mxu0 %v1275_v27  ;;  %1148 = vmatprep.subr.bf16.mxu1 %v1302_v29 }
  0x53   :  { %848 = vmatpush1.bf16.msra.mxu0 %v1273_v30  ;;  %1149 = vmatpush3.bf16.msra.mxu1 %v1303_v31 }
  0x54   :  { %849 = vmatprep.subr.bf16.mxu0 %v1278_v33  ;;  %1150 = vmatprep.subr.bf16.mxu1 %v1307_v34 }
  0x57   :  { %850 = vmatpush1.bf16.msra.mxu0 %v1276_v35  ;;  %1151 = vmatpush3.bf16.msra.mxu1 %v1308_v36 }
  0x58   :  { %851 = vmatprep.subr.bf16.mxu0 %v1281_v37  ;;  %1152 = vmatprep.subr.bf16.mxu1 %v1312_v38 }
  0x5b   :  { %852 = vmatpush1.bf16.msra.mxu0 %v1279_v39  ;;  %1153 = vmatpush3.bf16.msra.mxu1 %v1313_v41 }
  0x5c   :  { %853 = vmatprep.subr.bf16.mxu0 %v1286_v42  ;;  %1154 = vmatprep.subr.bf16.mxu1 %v1317_v43 }
  0x5f   :  { %854 = vmatpush1.bf16.msra.mxu0 %v1284_v44  ;;  %1155 = vmatpush3.bf16.msra.mxu1 %v1318_v45 }
  0x60   :  { %855 = vmatprep.subr.bf16.mxu0 %v1291_v46 }
  0x62   :  { %913 = vmatmul.mubr.bf16.vlgmr.msra.gmra.mxu1 %v1587_v13 }
  0x63   :  { %856 = vmatpush2.bf16.msra.mxu0 %v1289_v48 }
  0x64   :  { %857 = vmatprep.subr.bf16.mxu0 %v1296_v49 }
  0x67   :  { %858 = vmatpush2.bf16.msra.mxu0 %v1294_v50 }
  0x68   :  { %859 = vmatprep.subr.bf16.mxu0 %v1301_v51 }
  0x6b   :  { %860 = vmatpush2.bf16.msra.mxu0 %v1299_v52 }
  0x6c   :  { %861 = vmatprep.subr.bf16.mxu0 %v1306_v54 }
  0x6f   :  { %862 = vmatpush2.bf16.msra.mxu0 %v1304_v55 }
  0x70   :  { %863 = vmatprep.subr.bf16.mxu0 %v1311_v56 }
  0x73   :  { %864 = vmatpush2.bf16.msra.mxu0 %v1309_v57 }
  0x74   :  { %865 = vmatprep.subr.bf16.mxu0 %v1316_v58 }
  0x77   :  { %866 = vmatpush2.bf16.msra.mxu0 %v1314_v59 }
  0x78   :  { %867 = vmatprep.subr.bf16.mxu0 %v1321_v60 }
  0x7b   :  { %868 = vmatpush2.bf16.msra.mxu0 %v1319_v61 }
  0x7c   :  { %869 = vmatprep.subr.bf16.mxu0 %v1324_v62 }
  0x7f   :  { %870 = vmatpush2.bf16.msra.mxu0 %v1322_v63 }
  0x82   :  { %872 = vmatmul.mubr.bf16.vlgmr.msra.gmra.mxu0 %v1587_v13 }
  0x9c   :  { %v150_v1 = vpop.permute.xlu0 %149 }
  0x9d   :  { %v155_v2 = vrot.slane %v150_v1, %v154_v0 }
 0x102   :  { %v791_v3 = vpop.f32.mrf.mxu0  ;;  %v832_v4 = vpop.f32.mrf.mxu1 }
 0x103   :  { %v792_v5 = vadd.f32 %v791_v3, %v155_v2  ;;  %v833_v6 = vadd.f32 %v832_v4, %v155_v2 }
 0x104   :  { %v793_v7 = vpop.f32.mrf.mxu0  ;;  %v834_v8 = vpop.f32.mrf.mxu1 }
 0x105   :  { %v920_v9 = vsub.f32 0.0, %v792_v5  ;;  %v922_v10 = vsub.f32 0.0, %v833_v6  ;;  %v794_v11 = vadd.f32 %v793_v7, %v155_v2  ;;  %v835_v12 = vadd.f32 %v834_v8, %v155_v2 }
 0x106   :  { %v795_v14 = vpop.f32.mrf.mxu0  ;;  %v836_v15 = vpop.f32.mrf.mxu1 }
 0x107   :  { %v927_v16 = vmul.f32 1.442695, %v920_v9  ;;  %v931_v17 = vmul.f32 1.442695, %v922_v10  ;;  %v921_v18 = vsub.f32 0.0, %v794_v11  ;;  %v923_v13 = vsub.f32 0.0, %v835_v12 }
 0x108   :  { %v796_v19 = vpop.f32.mrf.mxu0  ;;  %v837_v47 = vpop.f32.mrf.mxu1 }
 0x109   :  { %1325 = vpow2.f32 %v927_v16  ;;  %v929_v20 = vmul.f32 1.442695, %v921_v18  ;;  %v933_v21 = vmul.f32 1.442695, %v923_v13 }
 0x10a   :  { %1327 = vpow2.f32 %v931_v17 }
 0x10b   :  { %1329 = vpow2.f32 %v929_v20 }
 0x10c   :  { %1331 = vpow2.f32 %v933_v21 }
 0x116   :  { %v1326_v22 = vpop.eup %1325 }
 0x117   :  { %v1328_v23 = vpop.eup %1327  ;;  %v941_v24 = vadd.f32 1.0, %v1326_v22 }
 0x118   :  { %v1330_v25 = vpop.eup %1329  ;;  %v943_v26 = vadd.f32 1.0, %v1328_v23 }
 0x119   :  { %v1332_v27 = vpop.eup %1331  ;;  %1333 = vrcp.f32 %v941_v24  ;;  %v942_v28 = vadd.f32 1.0, %v1330_v25 }
 0x11a   :  { %1335 = vrcp.f32 %v943_v26  ;;  %v944_v29 = vadd.f32 1.0, %v1332_v27 }
 0x11b   :  { %1337 = vrcp.f32 %v942_v28 }
 0x11c   :  { %1339 = vrcp.f32 %v944_v29 }
 0x122   :  { %v1156_v30 = vpop.f32.mrf.mxu1 }
 0x124   :  { %v1157_v31 = vpop.f32.mrf.mxu1 }
 0x125   :  { %v1158_v44 = vadd.f32 %v1157_v31, %v1156_v30 }
 0x126   :  { %v1334_v32 = vpop.eup %1333  ;;  %v1159_v33 = vpop.f32.mrf.mxu1 }
 0x127   :  { %v1336_v34 = vpop.eup %1335  ;;  %v915_v45 = vadd.f32 %v1158_v44, %v155_v2 }
 0x128   :  { %v1338_v35 = vpop.eup %1337  ;;  %v1160_v36 = vpop.f32.mrf.mxu1 }
 0x129   :  { %v1340_v37 = vpop.eup %1339  ;;  %v969_v38 = vcombine.low %v1334_v32, %v1338_v35  ;;  %v926_v46 = vsub.f32 0.0, %v915_v45 }
 0x12a   :  { %v970_v39 = vcombine.low %v1336_v34, %v1340_v37 }
 0x12b   :  { %v978_v41 = vrot.slane %v969_v38, %v1520_v53  ;;  %v939_v48 = vmul.f32 1.442695, %v926_v46 }
 0x12c   :  { %v985_v42 = vrot.slane %v970_v39, %v1520_v53 }
 0x12d   :  { %1341 = vpow2.f32 %v939_v48 }
 0x12e   :  { %v1000_v43 = vcombine.low %v978_v41, %v985_v42 }
 0x130   :  { %v1008_v9 = vrot.slane %v1000_v43, %v1520_v53 }
 0x13a   :  { %v1342_v60 = vpop.eup %1341 }
 0x13b   :  { %v947_v61 = vadd.f32 1.0, %v1342_v60 }
 0x142   :  { %v873_v49 = vpop.f32.mrf.mxu0 }
 0x143   :  { %v874_v50 = vadd.f32 %v873_v49, %v155_v2 }
 0x144   :  { %v875_v51 = vpop.f32.mrf.mxu0 }
 0x145   :  { %v924_v52 = vsub.f32 0.0, %v874_v50  ;;  %v876_v54 = vadd.f32 %v875_v51, %v155_v2 }
 0x146   :  { %v877_v55 = vpop.f32.mrf.mxu0 }
 0x147   :  { %v935_v56 = vmul.f32 1.442695, %v924_v52  ;;  %v925_v57 = vsub.f32 0.0, %v876_v54 }
 0x148   :  { %v878_v58 = vpop.f32.mrf.mxu0 }
 0x149   :  { %1343 = vpow2.f32 %v935_v56  ;;  %v937_v59 = vmul.f32 1.442695, %v925_v57 }
 0x14b   :  { %1345 = vpow2.f32 %v937_v59 }
 0x14c   :  { %1347 = vrcp.f32 %v947_v61 }
 0x156   :  { %v1344_v62 = vpop.eup %1343 }
 0x157   :  { %v945_v63 = vadd.f32 1.0, %v1344_v62 }
 0x158   :  { %v1346_v0 = vpop.eup %1345 }
 0x159   :  { %v946_v1 = vadd.f32 1.0, %v1346_v0  ;;  %1349 = vrcp.f32 %v945_v63  ;;  %v1348_v3 = vpop.eup %1347 }
 0x15a   :  { %v999_v6 = vrot.slane %v1348_v3, %v1520_v53 }
 0x15b   :  { %1351 = vrcp.f32 %v946_v1 }
 0x166   :  { %v1350_v4 = vpop.eup %1349 }
 0x168   :  { %v1352_v5 = vpop.eup %1351 }
 0x169   :  { %v971_v2 = vcombine.low %v1350_v4, %v1352_v5 }
 0x16b   :  { %v992_v7 = vrot.slane %v971_v2, %v1520_v53 }
 0x16d   :  { %v1001_v8 = vcombine.low %v992_v7, %v999_v6 }
 0x16f   :  { %v1015_v10 = vrot.slane %v1001_v8, %v1520_v53 }
 0x171   :  { %v1016_v11 = vcombine.low %v1008_v9, %v1015_v10 }
 0x173   :  { %1022 = vst.msk [vmem:[%s1745_s3] sm:$0x7f] %vm1020_vm0, %v1016_v11 }

</bundles_post_ra>
